<compile_context>
chip_gen: v5e
topology: v5e:2x2
jax: 0.10.0
libtpu: 0.0.40
codegen_flags: <defaults>
</compile_context>

<pallas_src>
import functools

import jax
import jax.numpy as jnp
from jax.experimental import pallas as pl
from jax.experimental.pallas import tpu as pltpu


def _round_up(x, m):
    return ((x + m - 1) // m) * m


# ---------------------------------------------------------------------------
# Fused kernel: reflect-padded x -> conv3x3 -> LeakyReLU -> reflect pad
#                -> conv3x3 -> + x    (one grid step = one batch element)
# ---------------------------------------------------------------------------
def _resblock_kernel(xp_ref, w1_ref, b1_ref, w2_ref, b2_ref, o_ref,
                     ypad_ref, acc_ref, *, H, W, C, slope):
    # xp_ref   : (H+2, W+2, C) f32   reflection-padded input (batch squeezed)
    # w*_ref   : (9, C, C)     bf16  weights, tap-major (k = 3*i + j), [Cin, Cout]
    # b*_ref   : (1, C)        f32
    # o_ref    : (H, W, C)     f32
    # ypad_ref : (H+2, W+2, C) f32   VMEM scratch for the padded intermediate
    # acc_ref  : (H*W, C)      f32   VMEM accumulator (reused by both convs)

    def conv3x3(src_ref, w_ref, b_ref):
        acc_ref[...] = jnp.zeros_like(acc_ref)
        for i in range(3):
            for j in range(3):
                win = src_ref[i:i + H, j:j + W, :]
                win = win.astype(jnp.bfloat16).reshape(H * W, C)
                acc_ref[...] += jnp.dot(win, w_ref[3 * i + j],
                                        preferred_element_type=jnp.float32)
        return (acc_ref[...] + b_ref[...]).reshape(H, W, C)

    # conv1 + LeakyReLU(0.01)
    y1 = conv3x3(xp_ref, w1_ref, b1_ref)
    y1 = jnp.where(y1 >= 0.0, y1, slope * y1)

    # in-kernel ReflectionPad2d(1) of y1 into VMEM scratch
    ypad_ref[1:H + 1, 1:W + 1, :] = y1
    ypad_ref[0:1, 1:W + 1, :] = y1[1:2]                    # top row    = y1[1]
    ypad_ref[H + 1:H + 2, 1:W + 1, :] = y1[H - 2:H - 1]    # bottom row = y1[H-2]
    ypad_ref[:, 0:1, :] = ypad_ref[:, 2:3, :]              # left col (corners too)
    ypad_ref[:, W + 1:W + 2, :] = ypad_ref[:, W - 1:W, :]  # right col

    # conv2 + residual add (both in f32)
    y2 = conv3x3(ypad_ref, w2_ref, b2_ref)
    o_ref[...] = xp_ref[1:H + 1, 1:W + 1, :] + y2


# ---------------------------------------------------------------------------
# Wrapper (PyTorch-facing: NCHW activations, OIHW weights)
# ---------------------------------------------------------------------------
@jax.jit
def residual_block_pallas(x_nchw, w1, b1, w2, b2):
    N, C, H, W = x_nchw.shape
    Cp = _round_up(C, 128)          # lane-dense channel count

    # TODO(synk): the reflection pad of the *external* input is wrapper glue
    # (jnp.pad); only the intermediate pad is done inside the kernel.
    x = jnp.transpose(x_nchw, (0, 2, 3, 1)).astype(jnp.float32)          # NHWC
    xp = jnp.pad(x, ((0, 0), (1, 1), (1, 1), (0, 0)), mode="reflect")
    if Cp != C:
        xp = jnp.pad(xp, ((0, 0), (0, 0), (0, 0), (0, Cp - C)))

    def prep_w(w):  # torch (Cout, Cin, 3, 3) -> (9, Cin_p, Cout_p) bf16
        wm = jnp.transpose(w, (2, 3, 1, 0)).reshape(9, C, C)
        wm = jnp.pad(wm, ((0, 0), (0, Cp - C), (0, Cp - C)))
        return wm.astype(jnp.bfloat16)

    def prep_b(b):
        return jnp.pad(b, (0, Cp - C)).reshape(1, Cp).astype(jnp.float32)

    w1p, w2p = prep_w(w1), prep_w(w2)
    b1p, b2p = prep_b(b1), prep_b(b2)

    flops = 2 * 2 * N * H * W * (9 * Cp) * Cp
    bytes_accessed = (N * (H + 2) * (W + 2) * Cp * 4      # padded input (f32)
                      + 2 * 9 * Cp * Cp * 2               # two bf16 weight sets
                      + 2 * Cp * 4                        # biases
                      + N * H * W * Cp * 4)               # output

    out = pl.pallas_call(
        functools.partial(_resblock_kernel, H=H, W=W, C=Cp, slope=0.01),
        out_shape=jax.ShapeDtypeStruct((N, H, W, Cp), jnp.float32),
        grid=(N,),
        in_specs=[
            pl.BlockSpec((None, H + 2, W + 2, Cp), lambda n: (n, 0, 0, 0)),
            pl.BlockSpec((9, Cp, Cp), lambda n: (0, 0, 0)),
            pl.BlockSpec((1, Cp), lambda n: (0, 0)),
            pl.BlockSpec((9, Cp, Cp), lambda n: (0, 0, 0)),
            pl.BlockSpec((1, Cp), lambda n: (0, 0)),
        ],
        out_specs=pl.BlockSpec((None, H, W, Cp), lambda n: (n, 0, 0, 0)),
        scratch_shapes=[
            pltpu.VMEM((H + 2, W + 2, Cp), jnp.float32),   # padded intermediate
            pltpu.VMEM((H * W, Cp), jnp.float32),          # matmul accumulator
        ],
        compiler_params=pltpu.CompilerParams(
            dimension_semantics=("parallel",),
            vmem_limit_bytes=64 * 1024 * 1024),
        cost_estimate=pl.CostEstimate(flops=flops, transcendentals=0,
                                      bytes_accessed=bytes_accessed),
    )(xp, w1p, b1p, w2p, b2p)

    out = out[..., :C]                                      # drop lane padding
    return jnp.transpose(out, (0, 3, 1, 2))                 # back to NCHW


# ---------------------------------------------------------------------------
# Pure-JAX f32 reference (mirrors the PyTorch module) for a runtime check
# ---------------------------------------------------------------------------
def residual_block_ref(x, w1, b1, w2, b2):
    def conv(h, w, b):
        hp = jnp.pad(h, ((0, 0), (0, 0), (1, 1), (1, 1)), mode="reflect")
        y = jax.lax.conv_general_dilated(
            hp, w, window_strides=(1, 1), padding="VALID",
            dimension_numbers=("NCHW", "OIHW", "NCHW"))
        return y + b.reshape(1, -1, 1, 1)

    y = conv(x, w1, b1)
    y = jnp.where(y >= 0.0, y, 0.01 * y)      # LeakyReLU default slope
    y = conv(y, w2, b2)
    return x + y


# ---------------------------------------------------------------------------
if __name__ == "__main__":
    key = jax.random.PRNGKey(0)
    kx, kw1, kb1, kw2, kb2 = jax.random.split(key, 5)

    B, C, H, W = 2, 64, 16, 16          # ResidualBlock(in_features=64)
    x = jax.random.normal(kx, (B, C, H, W), jnp.float32)
    w1 = jax.random.normal(kw1, (C, C, 3, 3), jnp.float32) * 0.05
    b1 = jax.random.normal(kb1, (C,), jnp.float32) * 0.05
    w2 = jax.random.normal(kw2, (C, C, 3, 3), jnp.float32) * 0.05
    b2 = jax.random.normal(kb2, (C,), jnp.float32) * 0.05

    out = jax.block_until_ready(residual_block_pallas(x, w1, b1, w2, b2))
    ref = jax.block_until_ready(residual_block_ref(x, w1, b1, w2, b2))

    assert out.shape == (B, C, H, W), out.shape
    assert bool(jnp.all(jnp.isfinite(out)))
    err = float(jnp.max(jnp.abs(out - ref)))
    scale = float(jnp.max(jnp.abs(ref))) + 1e-6
    assert err <= 2e-2 * scale + 1e-2, (err, scale)   # bf16-MXU tolerance

    print("KERNEL_OK")
</pallas_src>

<mosaic_0001>
module attributes {stable_mosaic.version = 11 : i64} {
  func.func @_resblock_kernel(%arg0: i32, %arg1: memref<1x18x18x128xf32, #tpu.memory_space<vmem>>, %arg2: memref<9x128x128xbf16, #tpu.memory_space<vmem>>, %arg3: memref<1x128xf32, #tpu.memory_space<vmem>>, %arg4: memref<9x128x128xbf16, #tpu.memory_space<vmem>>, %arg5: memref<1x128xf32, #tpu.memory_space<vmem>>, %arg6: memref<1x16x16x128xf32, #tpu.memory_space<vmem>>, %arg7: memref<18x18x128xf32, #tpu.memory_space<vmem>>, %arg8: memref<256x128xf32, #tpu.memory_space<vmem>>) attributes {dimension_semantics = [#tpu.dimension_semantics<parallel>], iteration_bounds = array<i64: 2>, scalar_prefetch = 0 : i64, scratch_operands = 2 : i64, tpu.core_type = #tpu.core_type<tc>, window_params = [{transform_indices = @transform_0, window_bounds = array<i64: 1, 18, 18, 128>}, {pipeline_mode = #tpu.pipeline_mode<synchronous>, transform_indices = @transform_1, window_bounds = array<i64: 9, 128, 128>}, {pipeline_mode = #tpu.pipeline_mode<synchronous>, transform_indices = @transform_2, window_bounds = array<i64: 1, 128>}, {pipeline_mode = #tpu.pipeline_mode<synchronous>, transform_indices = @transform_3, window_bounds = array<i64: 9, 128, 128>}, {pipeline_mode = #tpu.pipeline_mode<synchronous>, transform_indices = @transform_4, window_bounds = array<i64: 1, 128>}, {transform_indices = @transform_5, window_bounds = array<i64: 1, 16, 16, 128>}]} {
    %cst = arith.constant 0.000000e+00 : f32
    %0 = vector.broadcast %cst : f32 to vector<256x128xf32>
    %c0 = arith.constant 0 : index
    %c0_0 = arith.constant 0 : index
    %1 = vector.load %arg8[%c0, %c0_0] : memref<256x128xf32, #tpu.memory_space<vmem>>, vector<256x128xf32>
    tpu.vector_store %arg8[%c0, %c0_0], %0 {strides = array<i32>} : memref<256x128xf32, #tpu.memory_space<vmem>>, vector<256x128xf32>,
    %c0_1 = arith.constant 0 : index
    %c0_2 = arith.constant 0 : index
    %c0_3 = arith.constant 0 : index
    %c0_4 = arith.constant 0 : index
    %2 = vector.load %arg1[%c0_1, %c0_2, %c0_3, %c0_4] : memref<1x18x18x128xf32, #tpu.memory_space<vmem>>, vector<1x16x16x128xf32>
    %3 = vector.shape_cast %2 : vector<1x16x16x128xf32> to vector<16x16x128xf32>
    %4 = arith.truncf %3 : vector<16x16x128xf32> to vector<16x16x128xbf16>
    %5 = vector.shape_cast %4 : vector<16x16x128xbf16> to vector<256x128xbf16>
    %c0_5 = arith.constant 0 : index
    %c0_6 = arith.constant 0 : index
    %6 = vector.load %arg8[%c0_5, %c0_6] : memref<256x128xf32, #tpu.memory_space<vmem>>, vector<256x128xf32>
    %c0_7 = arith.constant 0 : index
    %c0_8 = arith.constant 0 : index
    %c0_9 = arith.constant 0 : index
    %7 = vector.load %arg2[%c0_7, %c0_8, %c0_9] : memref<9x128x128xbf16, #tpu.memory_space<vmem>>, vector<1x128x128xbf16>
    %8 = vector.shape_cast %7 : vector<1x128x128xbf16> to vector<128x128xbf16>
    %cst_10 = arith.constant dense<0.000000e+00> : vector<256x128xf32>
    %9 = tpu.matmul %5, %8, %cst_10 {dimension_numbers = #tpu.dot_dimension_numbers<[1], [0], [0], [1], [0, 0, 1, 1], [], []>} : vector<256x128xbf16>, vector<128x128xbf16>, vector<256x128xf32> -> vector<256x128xf32>
    %10 = arith.addf %6, %9 : vector<256x128xf32>
    %c0_11 = arith.constant 0 : index
    %c0_12 = arith.constant 0 : index
    %11 = vector.load %arg8[%c0_11, %c0_12] : memref<256x128xf32, #tpu.memory_space<vmem>>, vector<256x128xf32>
    tpu.vector_store %arg8[%c0_11, %c0_12], %10 {strides = array<i32>} : memref<256x128xf32, #tpu.memory_space<vmem>>, vector<256x128xf32>,
    %c0_13 = arith.constant 0 : index
    %c0_14 = arith.constant 0 : index
    %c1 = arith.constant 1 : index
    %c0_15 = arith.constant 0 : index
    %12 = vector.load %arg1[%c0_13, %c0_14, %c1, %c0_15] : memref<1x18x18x128xf32, #tpu.memory_space<vmem>>, vector<1x16x16x128xf32>
    %13 = vector.shape_cast %12 : vector<1x16x16x128xf32> to vector<16x16x128xf32>
    %14 = arith.truncf %13 : vector<16x16x128xf32> to vector<16x16x128xbf16>
    %15 = vector.shape_cast %14 : vector<16x16x128xbf16> to vector<256x128xbf16>
    %c0_16 = arith.constant 0 : index
    %c0_17 = arith.constant 0 : index
    %16 = vector.load %arg8[%c0_16, %c0_17] : memref<256x128xf32, #tpu.memory_space<vmem>>, vector<256x128xf32>
    %c1_18 = arith.constant 1 : index
    %c0_19 = arith.constant 0 : index
    %c0_20 = arith.constant 0 : index
    %17 = vector.load %arg2[%c1_18, %c0_19, %c0_20] : memref<9x128x128xbf16, #tpu.memory_space<vmem>>, vector<1x128x128xbf16>
    %18 = vector.shape_cast %17 : vector<1x128x128xbf16> to vector<128x128xbf16>
    %cst_21 = arith.constant dense<0.000000e+00> : vector<256x128xf32>
    %19 = tpu.matmul %15, %18, %cst_21 {dimension_numbers = #tpu.dot_dimension_numbers<[1], [0], [0], [1], [0, 0, 1, 1], [], []>} : vector<256x128xbf16>, vector<128x128xbf16>, vector<256x128xf32> -> vector<256x128xf32>
    %20 = arith.addf %16, %19 : vector<256x128xf32>
    %c0_22 = arith.constant 0 : index
    %c0_23 = arith.constant 0 : index
    %21 = vector.load %arg8[%c0_22, %c0_23] : memref<256x128xf32, #tpu.memory_space<vmem>>, vector<256x128xf32>
    tpu.vector_store %arg8[%c0_22, %c0_23], %20 {strides = array<i32>} : memref<256x128xf32, #tpu.memory_space<vmem>>, vector<256x128xf32>,
    %c0_24 = arith.constant 0 : index
    %c0_25 = arith.constant 0 : index
    %c2 = arith.constant 2 : index
    %c0_26 = arith.constant 0 : index
    %22 = vector.load %arg1[%c0_24, %c0_25, %c2, %c0_26] : memref<1x18x18x128xf32, #tpu.memory_space<vmem>>, vector<1x16x16x128xf32>
    %23 = vector.shape_cast %22 : vector<1x16x16x128xf32> to vector<16x16x128xf32>
    %24 = arith.truncf %23 : vector<16x16x128xf32> to vector<16x16x128xbf16>
    %25 = vector.shape_cast %24 : vector<16x16x128xbf16> to vector<256x128xbf16>
    %c0_27 = arith.constant 0 : index
    %c0_28 = arith.constant 0 : index
    %26 = vector.load %arg8[%c0_27, %c0_28] : memref<256x128xf32, #tpu.memory_space<vmem>>, vector<256x128xf32>
    %c2_29 = arith.constant 2 : index
    %c0_30 = arith.constant 0 : index
    %c0_31 = arith.constant 0 : index
    %27 = vector.load %arg2[%c2_29, %c0_30, %c0_31] : memref<9x128x128xbf16, #tpu.memory_space<vmem>>, vector<1x128x128xbf16>
    %28 = vector.shape_cast %27 : vector<1x128x128xbf16> to vector<128x128xbf16>
    %cst_32 = arith.constant dense<0.000000e+00> : vector<256x128xf32>
    %29 = tpu.matmul %25, %28, %cst_32 {dimension_numbers = #tpu.dot_dimension_numbers<[1], [0], [0], [1], [0, 0, 1, 1], [], []>} : vector<256x128xbf16>, vector<128x128xbf16>, vector<256x128xf32> -> vector<256x128xf32>
    %30 = arith.addf %26, %29 : vector<256x128xf32>
    %c0_33 = arith.constant 0 : index
    %c0_34 = arith.constant 0 : index
    %31 = vector.load %arg8[%c0_33, %c0_34] : memref<256x128xf32, #tpu.memory_space<vmem>>, vector<256x128xf32>
    tpu.vector_store %arg8[%c0_33, %c0_34], %30 {strides = array<i32>} : memref<256x128xf32, #tpu.memory_space<vmem>>, vector<256x128xf32>,
    %c0_35 = arith.constant 0 : index
    %c1_36 = arith.constant 1 : index
    %c0_37 = arith.constant 0 : index
    %c0_38 = arith.constant 0 : index
    %32 = vector.load %arg1[%c0_35, %c1_36, %c0_37, %c0_38] : memref<1x18x18x128xf32, #tpu.memory_space<vmem>>, vector<1x16x16x128xf32>
    %33 = vector.shape_cast %32 : vector<1x16x16x128xf32> to vector<16x16x128xf32>
    %34 = arith.truncf %33 : vector<16x16x128xf32> to vector<16x16x128xbf16>
    %35 = vector.shape_cast %34 : vector<16x16x128xbf16> to vector<256x128xbf16>
    %c0_39 = arith.constant 0 : index
    %c0_40 = arith.constant 0 : index
    %36 = vector.load %arg8[%c0_39, %c0_40] : memref<256x128xf32, #tpu.memory_space<vmem>>, vector<256x128xf32>
    %c3 = arith.constant 3 : index
    %c0_41 = arith.constant 0 : index
    %c0_42 = arith.constant 0 : index
    %37 = vector.load %arg2[%c3, %c0_41, %c0_42] : memref<9x128x128xbf16, #tpu.memory_space<vmem>>, vector<1x128x128xbf16>
    %38 = vector.shape_cast %37 : vector<1x128x128xbf16> to vector<128x128xbf16>
    %cst_43 = arith.constant dense<0.000000e+00> : vector<256x128xf32>
    %39 = tpu.matmul %35, %38, %cst_43 {dimension_numbers = #tpu.dot_dimension_numbers<[1], [0], [0], [1], [0, 0, 1, 1], [], []>} : vector<256x128xbf16>, vector<128x128xbf16>, vector<256x128xf32> -> vector<256x128xf32>
    %40 = arith.addf %36, %39 : vector<256x128xf32>
    %c0_44 = arith.constant 0 : index
    %c0_45 = arith.constant 0 : index
    %41 = vector.load %arg8[%c0_44, %c0_45] : memref<256x128xf32, #tpu.memory_space<vmem>>, vector<256x128xf32>
    tpu.vector_store %arg8[%c0_44, %c0_45], %40 {strides = array<i32>} : memref<256x128xf32, #tpu.memory_space<vmem>>, vector<256x128xf32>,
    %c0_46 = arith.constant 0 : index
    %c1_47 = arith.constant 1 : index
    %c1_48 = arith.constant 1 : index
    %c0_49 = arith.constant 0 : index
    %42 = vector.load %arg1[%c0_46, %c1_47, %c1_48, %c0_49] : memref<1x18x18x128xf32, #tpu.memory_space<vmem>>, vector<1x16x16x128xf32>
    %43 = vector.shape_cast %42 : vector<1x16x16x128xf32> to vector<16x16x128xf32>
    %44 = arith.truncf %43 : vector<16x16x128xf32> to vector<16x16x128xbf16>
    %45 = vector.shape_cast %44 : vector<16x16x128xbf16> to vector<256x128xbf16>
    %c0_50 = arith.constant 0 : index
    %c0_51 = arith.constant 0 : index
    %46 = vector.load %arg8[%c0_50, %c0_51] : memref<256x128xf32, #tpu.memory_space<vmem>>, vector<256x128xf32>
    %c4 = arith.constant 4 : index
    %c0_52 = arith.constant 0 : index
    %c0_53 = arith.constant 0 : index
    %47 = vector.load %arg2[%c4, %c0_52, %c0_53] : memref<9x128x128xbf16, #tpu.memory_space<vmem>>, vector<1x128x128xbf16>
    %48 = vector.shape_cast %47 : vector<1x128x128xbf16> to vector<128x128xbf16>
    %cst_54 = arith.constant dense<0.000000e+00> : vector<256x128xf32>
    %49 = tpu.matmul %45, %48, %cst_54 {dimension_numbers = #tpu.dot_dimension_numbers<[1], [0], [0], [1], [0, 0, 1, 1], [], []>} : vector<256x128xbf16>, vector<128x128xbf16>, vector<256x128xf32> -> vector<256x128xf32>
    %50 = arith.addf %46, %49 : vector<256x128xf32>
    %c0_55 = arith.constant 0 : index
    %c0_56 = arith.constant 0 : index
    %51 = vector.load %arg8[%c0_55, %c0_56] : memref<256x128xf32, #tpu.memory_space<vmem>>, vector<256x128xf32>
    tpu.vector_store %arg8[%c0_55, %c0_56], %50 {strides = array<i32>} : memref<256x128xf32, #tpu.memory_space<vmem>>, vector<256x128xf32>,
    %c0_57 = arith.constant 0 : index
    %c1_58 = arith.constant 1 : index
    %c2_59 = arith.constant 2 : index
    %c0_60 = arith.constant 0 : index
    %52 = vector.load %arg1[%c0_57, %c1_58, %c2_59, %c0_60] : memref<1x18x18x128xf32, #tpu.memory_space<vmem>>, vector<1x16x16x128xf32>
    %53 = vector.shape_cast %52 : vector<1x16x16x128xf32> to vector<16x16x128xf32>
    %54 = arith.truncf %53 : vector<16x16x128xf32> to vector<16x16x128xbf16>
    %55 = vector.shape_cast %54 : vector<16x16x128xbf16> to vector<256x128xbf16>
    %c0_61 = arith.constant 0 : index
    %c0_62 = arith.constant 0 : index
    %56 = vector.load %arg8[%c0_61, %c0_62] : memref<256x128xf32, #tpu.memory_space<vmem>>, vector<256x128xf32>
    %c5 = arith.constant 5 : index
    %c0_63 = arith.constant 0 : index
    %c0_64 = arith.constant 0 : index
    %57 = vector.load %arg2[%c5, %c0_63, %c0_64] : memref<9x128x128xbf16, #tpu.memory_space<vmem>>, vector<1x128x128xbf16>
    %58 = vector.shape_cast %57 : vector<1x128x128xbf16> to vector<128x128xbf16>
    %cst_65 = arith.constant dense<0.000000e+00> : vector<256x128xf32>
    %59 = tpu.matmul %55, %58, %cst_65 {dimension_numbers = #tpu.dot_dimension_numbers<[1], [0], [0], [1], [0, 0, 1, 1], [], []>} : vector<256x128xbf16>, vector<128x128xbf16>, vector<256x128xf32> -> vector<256x128xf32>
    %60 = arith.addf %56, %59 : vector<256x128xf32>
    %c0_66 = arith.constant 0 : index
    %c0_67 = arith.constant 0 : index
    %61 = vector.load %arg8[%c0_66, %c0_67] : memref<256x128xf32, #tpu.memory_space<vmem>>, vector<256x128xf32>
    tpu.vector_store %arg8[%c0_66, %c0_67], %60 {strides = array<i32>} : memref<256x128xf32, #tpu.memory_space<vmem>>, vector<256x128xf32>,
    %c0_68 = arith.constant 0 : index
    %c2_69 = arith.constant 2 : index
    %c0_70 = arith.constant 0 : index
    %c0_71 = arith.constant 0 : index
    %62 = vector.load %arg1[%c0_68, %c2_69, %c0_70, %c0_71] : memref<1x18x18x128xf32, #tpu.memory_space<vmem>>, vector<1x16x16x128xf32>
    %63 = vector.shape_cast %62 : vector<1x16x16x128xf32> to vector<16x16x128xf32>
    %64 = arith.truncf %63 : vector<16x16x128xf32> to vector<16x16x128xbf16>
    %65 = vector.shape_cast %64 : vector<16x16x128xbf16> to vector<256x128xbf16>
    %c0_72 = arith.constant 0 : index
    %c0_73 = arith.constant 0 : index
    %66 = vector.load %arg8[%c0_72, %c0_73] : memref<256x128xf32, #tpu.memory_space<vmem>>, vector<256x128xf32>
    %c6 = arith.constant 6 : index
    %c0_74 = arith.constant 0 : index
    %c0_75 = arith.constant 0 : index
    %67 = vector.load %arg2[%c6, %c0_74, %c0_75] : memref<9x128x128xbf16, #tpu.memory_space<vmem>>, vector<1x128x128xbf16>
    %68 = vector.shape_cast %67 : vector<1x128x128xbf16> to vector<128x128xbf16>
    %cst_76 = arith.constant dense<0.000000e+00> : vector<256x128xf32>
    %69 = tpu.matmul %65, %68, %cst_76 {dimension_numbers = #tpu.dot_dimension_numbers<[1], [0], [0], [1], [0, 0, 1, 1], [], []>} : vector<256x128xbf16>, vector<128x128xbf16>, vector<256x128xf32> -> vector<256x128xf32>
    %70 = arith.addf %66, %69 : vector<256x128xf32>
    %c0_77 = arith.constant 0 : index
    %c0_78 = arith.constant 0 : index
    %71 = vector.load %arg8[%c0_77, %c0_78] : memref<256x128xf32, #tpu.memory_space<vmem>>, vector<256x128xf32>
    tpu.vector_store %arg8[%c0_77, %c0_78], %70 {strides = array<i32>} : memref<256x128xf32, #tpu.memory_space<vmem>>, vector<256x128xf32>,
    %c0_79 = arith.constant 0 : index
    %c2_80 = arith.constant 2 : index
    %c1_81 = arith.constant 1 : index
    %c0_82 = arith.constant 0 : index
    %72 = vector.load %arg1[%c0_79, %c2_80, %c1_81, %c0_82] : memref<1x18x18x128xf32, #tpu.memory_space<vmem>>, vector<1x16x16x128xf32>
    %73 = vector.shape_cast %72 : vector<1x16x16x128xf32> to vector<16x16x128xf32>
    %74 = arith.truncf %73 : vector<16x16x128xf32> to vector<16x16x128xbf16>
    %75 = vector.shape_cast %74 : vector<16x16x128xbf16> to vector<256x128xbf16>
    %c0_83 = arith.constant 0 : index
    %c0_84 = arith.constant 0 : index
    %76 = vector.load %arg8[%c0_83, %c0_84] : memref<256x128xf32, #tpu.memory_space<vmem>>, vector<256x128xf32>
    %c7 = arith.constant 7 : index
    %c0_85 = arith.constant 0 : index
    %c0_86 = arith.constant 0 : index
    %77 = vector.load %arg2[%c7, %c0_85, %c0_86] : memref<9x128x128xbf16, #tpu.memory_space<vmem>>, vector<1x128x128xbf16>
    %78 = vector.shape_cast %77 : vector<1x128x128xbf16> to vector<128x128xbf16>
    %cst_87 = arith.constant dense<0.000000e+00> : vector<256x128xf32>
    %79 = tpu.matmul %75, %78, %cst_87 {dimension_numbers = #tpu.dot_dimension_numbers<[1], [0], [0], [1], [0, 0, 1, 1], [], []>} : vector<256x128xbf16>, vector<128x128xbf16>, vector<256x128xf32> -> vector<256x128xf32>
    %80 = arith.addf %76, %79 : vector<256x128xf32>
    %c0_88 = arith.constant 0 : index
    %c0_89 = arith.constant 0 : index
    %81 = vector.load %arg8[%c0_88, %c0_89] : memref<256x128xf32, #tpu.memory_space<vmem>>, vector<256x128xf32>
    tpu.vector_store %arg8[%c0_88, %c0_89], %80 {strides = array<i32>} : memref<256x128xf32, #tpu.memory_space<vmem>>, vector<256x128xf32>,
    %c0_90 = arith.constant 0 : index
    %c2_91 = arith.constant 2 : index
    %c2_92 = arith.constant 2 : index
    %c0_93 = arith.constant 0 : index
    %82 = vector.load %arg1[%c0_90, %c2_91, %c2_92, %c0_93] : memref<1x18x18x128xf32, #tpu.memory_space<vmem>>, vector<1x16x16x128xf32>
    %83 = vector.shape_cast %82 : vector<1x16x16x128xf32> to vector<16x16x128xf32>
    %84 = arith.truncf %83 : vector<16x16x128xf32> to vector<16x16x128xbf16>
    %85 = vector.shape_cast %84 : vector<16x16x128xbf16> to vector<256x128xbf16>
    %c0_94 = arith.constant 0 : index
    %c0_95 = arith.constant 0 : index
    %86 = vector.load %arg8[%c0_94, %c0_95] : memref<256x128xf32, #tpu.memory_space<vmem>>, vector<256x128xf32>
    %c8 = arith.constant 8 : index
    %c0_96 = arith.constant 0 : index
    %c0_97 = arith.constant 0 : index
    %87 = vector.load %arg2[%c8, %c0_96, %c0_97] : memref<9x128x128xbf16, #tpu.memory_space<vmem>>, vector<1x128x128xbf16>
    %88 = vector.shape_cast %87 : vector<1x128x128xbf16> to vector<128x128xbf16>
    %cst_98 = arith.constant dense<0.000000e+00> : vector<256x128xf32>
    %89 = tpu.matmul %85, %88, %cst_98 {dimension_numbers = #tpu.dot_dimension_numbers<[1], [0], [0], [1], [0, 0, 1, 1], [], []>} : vector<256x128xbf16>, vector<128x128xbf16>, vector<256x128xf32> -> vector<256x128xf32>
    %90 = arith.addf %86, %89 : vector<256x128xf32>
    %c0_99 = arith.constant 0 : index
    %c0_100 = arith.constant 0 : index
    %91 = vector.load %arg8[%c0_99, %c0_100] : memref<256x128xf32, #tpu.memory_space<vmem>>, vector<256x128xf32>
    tpu.vector_store %arg8[%c0_99, %c0_100], %90 {strides = array<i32>} : memref<256x128xf32, #tpu.memory_space<vmem>>, vector<256x128xf32>,
    %c0_101 = arith.constant 0 : index
    %c0_102 = arith.constant 0 : index
    %92 = vector.load %arg8[%c0_101, %c0_102] : memref<256x128xf32, #tpu.memory_space<vmem>>, vector<256x128xf32>
    %c0_103 = arith.constant 0 : index
    %c0_104 = arith.constant 0 : index
    %93 = vector.load %arg3[%c0_103, %c0_104] : memref<1x128xf32, #tpu.memory_space<vmem>>, vector<1x128xf32>
    %94 = vector.broadcast %93 : vector<1x128xf32> to vector<256x128xf32>
    %95 = arith.addf %92, %94 : vector<256x128xf32>
    %96 = vector.shape_cast %95 : vector<256x128xf32> to vector<16x16x128xf32>
    %cst_105 = arith.constant 0.000000e+00 : f32
    %97 = vector.broadcast %cst_105 : f32 to vector<16x16x128xf32>
    %98 = arith.cmpf oge, %96, %97 : vector<16x16x128xf32>
    %cst_106 = arith.constant 0.00999999977 : f32
    %99 = vector.broadcast %cst_106 : f32 to vector<16x16x128xf32>
    %100 = arith.mulf %99, %96 : vector<16x16x128xf32>
    %101 = arith.select %98, %96, %100 : vector<16x16x128xi1>, vector<16x16x128xf32>
    %c1_107 = arith.constant 1 : index
    %c1_108 = arith.constant 1 : index
    %c0_109 = arith.constant 0 : index
    %102 = vector.load %arg7[%c1_107, %c1_108, %c0_109] : memref<18x18x128xf32, #tpu.memory_space<vmem>>, vector<16x16x128xf32>
    tpu.vector_store %arg7[%c1_107, %c1_108, %c0_109], %101 {strides = array<i32>} : memref<18x18x128xf32, #tpu.memory_space<vmem>>, vector<16x16x128xf32>,
    %103 = vector.extract_strided_slice %101 {offsets = [1, 0, 0], sizes = [1, 16, 128], strides = [1, 1, 1]} : vector<16x16x128xf32> to vector<1x16x128xf32>
    %c0_110 = arith.constant 0 : index
    %c1_111 = arith.constant 1 : index
    %c0_112 = arith.constant 0 : index
    %104 = vector.load %arg7[%c0_110, %c1_111, %c0_112] : memref<18x18x128xf32, #tpu.memory_space<vmem>>, vector<1x16x128xf32>
    tpu.vector_store %arg7[%c0_110, %c1_111, %c0_112], %103 {strides = array<i32>} : memref<18x18x128xf32, #tpu.memory_space<vmem>>, vector<1x16x128xf32>,
    %105 = vector.extract_strided_slice %101 {offsets = [14, 0, 0], sizes = [1, 16, 128], strides = [1, 1, 1]} : vector<16x16x128xf32> to vector<1x16x128xf32>
    %c17 = arith.constant 17 : index
    %c1_113 = arith.constant 1 : index
    %c0_114 = arith.constant 0 : index
    %106 = vector.load %arg7[%c17, %c1_113, %c0_114] : memref<18x18x128xf32, #tpu.memory_space<vmem>>, vector<1x16x128xf32>
    tpu.vector_store %arg7[%c17, %c1_113, %c0_114], %105 {strides = array<i32>} : memref<18x18x128xf32, #tpu.memory_space<vmem>>, vector<1x16x128xf32>,
    %c0_115 = arith.constant 0 : index
    %c2_116 = arith.constant 2 : index
    %c0_117 = arith.constant 0 : index
    %107 = vector.load %arg7[%c0_115, %c2_116, %c0_117] : memref<18x18x128xf32, #tpu.memory_space<vmem>>, vector<18x1x128xf32>
    %c0_118 = arith.constant 0 : index
    %c0_119 = arith.constant 0 : index
    %c0_120 = arith.constant 0 : index
    %108 = vector.load %arg7[%c0_118, %c0_119, %c0_120] : memref<18x18x128xf32, #tpu.memory_space<vmem>>, vector<18x1x128xf32>
    tpu.vector_store %arg7[%c0_118, %c0_119, %c0_120], %107 {strides = array<i32>} : memref<18x18x128xf32, #tpu.memory_space<vmem>>, vector<18x1x128xf32>,
    %c0_121 = arith.constant 0 : index
    %c15 = arith.constant 15 : index
    %c0_122 = arith.constant 0 : index
    %109 = vector.load %arg7[%c0_121, %c15, %c0_122] : memref<18x18x128xf32, #tpu.memory_space<vmem>>, vector<18x1x128xf32>
    %c0_123 = arith.constant 0 : index
    %c17_124 = arith.constant 17 : index
    %c0_125 = arith.constant 0 : index
    %110 = vector.load %arg7[%c0_123, %c17_124, %c0_125] : memref<18x18x128xf32, #tpu.memory_space<vmem>>, vector<18x1x128xf32>
    tpu.vector_store %arg7[%c0_123, %c17_124, %c0_125], %109 {strides = array<i32>} : memref<18x18x128xf32, #tpu.memory_space<vmem>>, vector<18x1x128xf32>,
    %cst_126 = arith.constant 0.000000e+00 : f32
    %111 = vector.broadcast %cst_126 : f32 to vector<256x128xf32>
    %c0_127 = arith.constant 0 : index
    %c0_128 = arith.constant 0 : index
    %112 = vector.load %arg8[%c0_127, %c0_128] : memref<256x128xf32, #tpu.memory_space<vmem>>, vector<256x128xf32>
    tpu.vector_store %arg8[%c0_127, %c0_128], %111 {strides = array<i32>} : memref<256x128xf32, #tpu.memory_space<vmem>>, vector<256x128xf32>,
    %c0_129 = arith.constant 0 : index
    %c0_130 = arith.constant 0 : index
    %c0_131 = arith.constant 0 : index
    %113 = vector.load %arg7[%c0_129, %c0_130, %c0_131] : memref<18x18x128xf32, #tpu.memory_space<vmem>>, vector<16x16x128xf32>
    %114 = arith.truncf %113 : vector<16x16x128xf32> to vector<16x16x128xbf16>
    %115 = vector.shape_cast %114 : vector<16x16x128xbf16> to vector<256x128xbf16>
    %c0_132 = arith.constant 0 : index
    %c0_133 = arith.constant 0 : index
    %116 = vector.load %arg8[%c0_132, %c0_133] : memref<256x128xf32, #tpu.memory_space<vmem>>, vector<256x128xf32>
    %c0_134 = arith.constant 0 : index
    %c0_135 = arith.constant 0 : index
    %c0_136 = arith.constant 0 : index
    %117 = vector.load %arg4[%c0_134, %c0_135, %c0_136] : memref<9x128x128xbf16, #tpu.memory_space<vmem>>, vector<1x128x128xbf16>
    %118 = vector.shape_cast %117 : vector<1x128x128xbf16> to vector<128x128xbf16>
    %cst_137 = arith.constant dense<0.000000e+00> : vector<256x128xf32>
    %119 = tpu.matmul %115, %118, %cst_137 {dimension_numbers = #tpu.dot_dimension_numbers<[1], [0], [0], [1], [0, 0, 1, 1], [], []>} : vector<256x128xbf16>, vector<128x128xbf16>, vector<256x128xf32> -> vector<256x128xf32>
    %120 = arith.addf %116, %119 : vector<256x128xf32>
    %c0_138 = arith.constant 0 : index
    %c0_139 = arith.constant 0 : index
    %121 = vector.load %arg8[%c0_138, %c0_139] : memref<256x128xf32, #tpu.memory_space<vmem>>, vector<256x128xf32>
    tpu.vector_store %arg8[%c0_138, %c0_139], %120 {strides = array<i32>} : memref<256x128xf32, #tpu.memory_space<vmem>>, vector<256x128xf32>,
    %c0_140 = arith.constant 0 : index
    %c1_141 = arith.constant 1 : index
    %c0_142 = arith.constant 0 : index
    %122 = vector.load %arg7[%c0_140, %c1_141, %c0_142] : memref<18x18x128xf32, #tpu.memory_space<vmem>>, vector<16x16x128xf32>
    %123 = arith.truncf %122 : vector<16x16x128xf32> to vector<16x16x128xbf16>
    %124 = vector.shape_cast %123 : vector<16x16x128xbf16> to vector<256x128xbf16>
    %c0_143 = arith.constant 0 : index
    %c0_144 = arith.constant 0 : index
    %125 = vector.load %arg8[%c0_143, %c0_144] : memref<256x128xf32, #tpu.memory_space<vmem>>, vector<256x128xf32>
    %c1_145 = arith.constant 1 : index
    %c0_146 = arith.constant 0 : index
    %c0_147 = arith.constant 0 : index
    %126 = vector.load %arg4[%c1_145, %c0_146, %c0_147] : memref<9x128x128xbf16, #tpu.memory_space<vmem>>, vector<1x128x128xbf16>
    %127 = vector.shape_cast %126 : vector<1x128x128xbf16> to vector<128x128xbf16>
    %cst_148 = arith.constant dense<0.000000e+00> : vector<256x128xf32>
    %128 = tpu.matmul %124, %127, %cst_148 {dimension_numbers = #tpu.dot_dimension_numbers<[1], [0], [0], [1], [0, 0, 1, 1], [], []>} : vector<256x128xbf16>, vector<128x128xbf16>, vector<256x128xf32> -> vector<256x128xf32>
    %129 = arith.addf %125, %128 : vector<256x128xf32>
    %c0_149 = arith.constant 0 : index
    %c0_150 = arith.constant 0 : index
    %130 = vector.load %arg8[%c0_149, %c0_150] : memref<256x128xf32, #tpu.memory_space<vmem>>, vector<256x128xf32>
    tpu.vector_store %arg8[%c0_149, %c0_150], %129 {strides = array<i32>} : memref<256x128xf32, #tpu.memory_space<vmem>>, vector<256x128xf32>,
    %c0_151 = arith.constant 0 : index
    %c2_152 = arith.constant 2 : index
    %c0_153 = arith.constant 0 : index
    %131 = vector.load %arg7[%c0_151, %c2_152, %c0_153] : memref<18x18x128xf32, #tpu.memory_space<vmem>>, vector<16x16x128xf32>
    %132 = arith.truncf %131 : vector<16x16x128xf32> to vector<16x16x128xbf16>
    %133 = vector.shape_cast %132 : vector<16x16x128xbf16> to vector<256x128xbf16>
    %c0_154 = arith.constant 0 : index
    %c0_155 = arith.constant 0 : index
    %134 = vector.load %arg8[%c0_154, %c0_155] : memref<256x128xf32, #tpu.memory_space<vmem>>, vector<256x128xf32>
    %c2_156 = arith.constant 2 : index
    %c0_157 = arith.constant 0 : index
    %c0_158 = arith.constant 0 : index
    %135 = vector.load %arg4[%c2_156, %c0_157, %c0_158] : memref<9x128x128xbf16, #tpu.memory_space<vmem>>, vector<1x128x128xbf16>
    %136 = vector.shape_cast %135 : vector<1x128x128xbf16> to vector<128x128xbf16>
    %cst_159 = arith.constant dense<0.000000e+00> : vector<256x128xf32>
    %137 = tpu.matmul %133, %136, %cst_159 {dimension_numbers = #tpu.dot_dimension_numbers<[1], [0], [0], [1], [0, 0, 1, 1], [], []>} : vector<256x128xbf16>, vector<128x128xbf16>, vector<256x128xf32> -> vector<256x128xf32>
    %138 = arith.addf %134, %137 : vector<256x128xf32>
    %c0_160 = arith.constant 0 : index
    %c0_161 = arith.constant 0 : index
    %139 = vector.load %arg8[%c0_160, %c0_161] : memref<256x128xf32, #tpu.memory_space<vmem>>, vector<256x128xf32>
    tpu.vector_store %arg8[%c0_160, %c0_161], %138 {strides = array<i32>} : memref<256x128xf32, #tpu.memory_space<vmem>>, vector<256x128xf32>,
    %c1_162 = arith.constant 1 : index
    %c0_163 = arith.constant 0 : index
    %c0_164 = arith.constant 0 : index
    %140 = vector.load %arg7[%c1_162, %c0_163, %c0_164] : memref<18x18x128xf32, #tpu.memory_space<vmem>>, vector<16x16x128xf32>
    %141 = arith.truncf %140 : vector<16x16x128xf32> to vector<16x16x128xbf16>
    %142 = vector.shape_cast %141 : vector<16x16x128xbf16> to vector<256x128xbf16>
    %c0_165 = arith.constant 0 : index
    %c0_166 = arith.constant 0 : index
    %143 = vector.load %arg8[%c0_165, %c0_166] : memref<256x128xf32, #tpu.memory_space<vmem>>, vector<256x128xf32>
    %c3_167 = arith.constant 3 : index
    %c0_168 = arith.constant 0 : index
    %c0_169 = arith.constant 0 : index
    %144 = vector.load %arg4[%c3_167, %c0_168, %c0_169] : memref<9x128x128xbf16, #tpu.memory_space<vmem>>, vector<1x128x128xbf16>
    %145 = vector.shape_cast %144 : vector<1x128x128xbf16> to vector<128x128xbf16>
    %cst_170 = arith.constant dense<0.000000e+00> : vector<256x128xf32>
    %146 = tpu.matmul %142, %145, %cst_170 {dimension_numbers = #tpu.dot_dimension_numbers<[1], [0], [0], [1], [0, 0, 1, 1], [], []>} : vector<256x128xbf16>, vector<128x128xbf16>, vector<256x128xf32> -> vector<256x128xf32>
    %147 = arith.addf %143, %146 : vector<256x128xf32>
    %c0_171 = arith.constant 0 : index
    %c0_172 = arith.constant 0 : index
    %148 = vector.load %arg8[%c0_171, %c0_172] : memref<256x128xf32, #tpu.memory_space<vmem>>, vector<256x128xf32>
    tpu.vector_store %arg8[%c0_171, %c0_172], %147 {strides = array<i32>} : memref<256x128xf32, #tpu.memory_space<vmem>>, vector<256x128xf32>,
    %c1_173 = arith.constant 1 : index
    %c1_174 = arith.constant 1 : index
    %c0_175 = arith.constant 0 : index
    %149 = vector.load %arg7[%c1_173, %c1_174, %c0_175] : memref<18x18x128xf32, #tpu.memory_space<vmem>>, vector<16x16x128xf32>
    %150 = arith.truncf %149 : vector<16x16x128xf32> to vector<16x16x128xbf16>
    %151 = vector.shape_cast %150 : vector<16x16x128xbf16> to vector<256x128xbf16>
    %c0_176 = arith.constant 0 : index
    %c0_177 = arith.constant 0 : index
    %152 = vector.load %arg8[%c0_176, %c0_177] : memref<256x128xf32, #tpu.memory_space<vmem>>, vector<256x128xf32>
    %c4_178 = arith.constant 4 : index
    %c0_179 = arith.constant 0 : index
    %c0_180 = arith.constant 0 : index
    %153 = vector.load %arg4[%c4_178, %c0_179, %c0_180] : memref<9x128x128xbf16, #tpu.memory_space<vmem>>, vector<1x128x128xbf16>
    %154 = vector.shape_cast %153 : vector<1x128x128xbf16> to vector<128x128xbf16>
    %cst_181 = arith.constant dense<0.000000e+00> : vector<256x128xf32>
    %155 = tpu.matmul %151, %154, %cst_181 {dimension_numbers = #tpu.dot_dimension_numbers<[1], [0], [0], [1], [0, 0, 1, 1], [], []>} : vector<256x128xbf16>, vector<128x128xbf16>, vector<256x128xf32> -> vector<256x128xf32>
    %156 = arith.addf %152, %155 : vector<256x128xf32>
    %c0_182 = arith.constant 0 : index
    %c0_183 = arith.constant 0 : index
    %157 = vector.load %arg8[%c0_182, %c0_183] : memref<256x128xf32, #tpu.memory_space<vmem>>, vector<256x128xf32>
    tpu.vector_store %arg8[%c0_182, %c0_183], %156 {strides = array<i32>} : memref<256x128xf32, #tpu.memory_space<vmem>>, vector<256x128xf32>,
    %c1_184 = arith.constant 1 : index
    %c2_185 = arith.constant 2 : index
    %c0_186 = arith.constant 0 : index
    %158 = vector.load %arg7[%c1_184, %c2_185, %c0_186] : memref<18x18x128xf32, #tpu.memory_space<vmem>>, vector<16x16x128xf32>
    %159 = arith.truncf %158 : vector<16x16x128xf32> to vector<16x16x128xbf16>
    %160 = vector.shape_cast %159 : vector<16x16x128xbf16> to vector<256x128xbf16>
    %c0_187 = arith.constant 0 : index
    %c0_188 = arith.constant 0 : index
    %161 = vector.load %arg8[%c0_187, %c0_188] : memref<256x128xf32, #tpu.memory_space<vmem>>, vector<256x128xf32>
    %c5_189 = arith.constant 5 : index
    %c0_190 = arith.constant 0 : index
    %c0_191 = arith.constant 0 : index
    %162 = vector.load %arg4[%c5_189, %c0_190, %c0_191] : memref<9x128x128xbf16, #tpu.memory_space<vmem>>, vector<1x128x128xbf16>
    %163 = vector.shape_cast %162 : vector<1x128x128xbf16> to vector<128x128xbf16>
    %cst_192 = arith.constant dense<0.000000e+00> : vector<256x128xf32>
    %164 = tpu.matmul %160, %163, %cst_192 {dimension_numbers = #tpu.dot_dimension_numbers<[1], [0], [0], [1], [0, 0, 1, 1], [], []>} : vector<256x128xbf16>, vector<128x128xbf16>, vector<256x128xf32> -> vector<256x128xf32>
    %165 = arith.addf %161, %164 : vector<256x128xf32>
    %c0_193 = arith.constant 0 : index
    %c0_194 = arith.constant 0 : index
    %166 = vector.load %arg8[%c0_193, %c0_194] : memref<256x128xf32, #tpu.memory_space<vmem>>, vector<256x128xf32>
    tpu.vector_store %arg8[%c0_193, %c0_194], %165 {strides = array<i32>} : memref<256x128xf32, #tpu.memory_space<vmem>>, vector<256x128xf32>,
    %c2_195 = arith.constant 2 : index
    %c0_196 = arith.constant 0 : index
    %c0_197 = arith.constant 0 : index
    %167 = vector.load %arg7[%c2_195, %c0_196, %c0_197] : memref<18x18x128xf32, #tpu.memory_space<vmem>>, vector<16x16x128xf32>
    %168 = arith.truncf %167 : vector<16x16x128xf32> to vector<16x16x128xbf16>
    %169 = vector.shape_cast %168 : vector<16x16x128xbf16> to vector<256x128xbf16>
    %c0_198 = arith.constant 0 : index
    %c0_199 = arith.constant 0 : index
    %170 = vector.load %arg8[%c0_198, %c0_199] : memref<256x128xf32, #tpu.memory_space<vmem>>, vector<256x128xf32>
    %c6_200 = arith.constant 6 : index
    %c0_201 = arith.constant 0 : index
    %c0_202 = arith.constant 0 : index
    %171 = vector.load %arg4[%c6_200, %c0_201, %c0_202] : memref<9x128x128xbf16, #tpu.memory_space<vmem>>, vector<1x128x128xbf16>
    %172 = vector.shape_cast %171 : vector<1x128x128xbf16> to vector<128x128xbf16>
    %cst_203 = arith.constant dense<0.000000e+00> : vector<256x128xf32>
    %173 = tpu.matmul %169, %172, %cst_203 {dimension_numbers = #tpu.dot_dimension_numbers<[1], [0], [0], [1], [0, 0, 1, 1], [], []>} : vector<256x128xbf16>, vector<128x128xbf16>, vector<256x128xf32> -> vector<256x128xf32>
    %174 = arith.addf %170, %173 : vector<256x128xf32>
    %c0_204 = arith.constant 0 : index
    %c0_205 = arith.constant 0 : index
    %175 = vector.load %arg8[%c0_204, %c0_205] : memref<256x128xf32, #tpu.memory_space<vmem>>, vector<256x128xf32>
    tpu.vector_store %arg8[%c0_204, %c0_205], %174 {strides = array<i32>} : memref<256x128xf32, #tpu.memory_space<vmem>>, vector<256x128xf32>,
    %c2_206 = arith.constant 2 : index
    %c1_207 = arith.constant 1 : index
    %c0_208 = arith.constant 0 : index
    %176 = vector.load %arg7[%c2_206, %c1_207, %c0_208] : memref<18x18x128xf32, #tpu.memory_space<vmem>>, vector<16x16x128xf32>
    %177 = arith.truncf %176 : vector<16x16x128xf32> to vector<16x16x128xbf16>
    %178 = vector.shape_cast %177 : vector<16x16x128xbf16> to vector<256x128xbf16>
    %c0_209 = arith.constant 0 : index
    %c0_210 = arith.constant 0 : index
    %179 = vector.load %arg8[%c0_209, %c0_210] : memref<256x128xf32, #tpu.memory_space<vmem>>, vector<256x128xf32>
    %c7_211 = arith.constant 7 : index
    %c0_212 = arith.constant 0 : index
    %c0_213 = arith.constant 0 : index
    %180 = vector.load %arg4[%c7_211, %c0_212, %c0_213] : memref<9x128x128xbf16, #tpu.memory_space<vmem>>, vector<1x128x128xbf16>
    %181 = vector.shape_cast %180 : vector<1x128x128xbf16> to vector<128x128xbf16>
    %cst_214 = arith.constant dense<0.000000e+00> : vector<256x128xf32>
    %182 = tpu.matmul %178, %181, %cst_214 {dimension_numbers = #tpu.dot_dimension_numbers<[1], [0], [0], [1], [0, 0, 1, 1], [], []>} : vector<256x128xbf16>, vector<128x128xbf16>, vector<256x128xf32> -> vector<256x128xf32>
    %183 = arith.addf %179, %182 : vector<256x128xf32>
    %c0_215 = arith.constant 0 : index
    %c0_216 = arith.constant 0 : index
    %184 = vector.load %arg8[%c0_215, %c0_216] : memref<256x128xf32, #tpu.memory_space<vmem>>, vector<256x128xf32>
    tpu.vector_store %arg8[%c0_215, %c0_216], %183 {strides = array<i32>} : memref<256x128xf32, #tpu.memory_space<vmem>>, vector<256x128xf32>,
    %c2_217 = arith.constant 2 : index
    %c2_218 = arith.constant 2 : index
    %c0_219 = arith.constant 0 : index
    %185 = vector.load %arg7[%c2_217, %c2_218, %c0_219] : memref<18x18x128xf32, #tpu.memory_space<vmem>>, vector<16x16x128xf32>
    %186 = arith.truncf %185 : vector<16x16x128xf32> to vector<16x16x128xbf16>
    %187 = vector.shape_cast %186 : vector<16x16x128xbf16> to vector<256x128xbf16>
    %c0_220 = arith.constant 0 : index
    %c0_221 = arith.constant 0 : index
    %188 = vector.load %arg8[%c0_220, %c0_221] : memref<256x128xf32, #tpu.memory_space<vmem>>, vector<256x128xf32>
    %c8_222 = arith.constant 8 : index
    %c0_223 = arith.constant 0 : index
    %c0_224 = arith.constant 0 : index
    %189 = vector.load %arg4[%c8_222, %c0_223, %c0_224] : memref<9x128x128xbf16, #tpu.memory_space<vmem>>, vector<1x128x128xbf16>
    %190 = vector.shape_cast %189 : vector<1x128x128xbf16> to vector<128x128xbf16>
    %cst_225 = arith.constant dense<0.000000e+00> : vector<256x128xf32>
    %191 = tpu.matmul %187, %190, %cst_225 {dimension_numbers = #tpu.dot_dimension_numbers<[1], [0], [0], [1], [0, 0, 1, 1], [], []>} : vector<256x128xbf16>, vector<128x128xbf16>, vector<256x128xf32> -> vector<256x128xf32>
    %192 = arith.addf %188, %191 : vector<256x128xf32>
    %c0_226 = arith.constant 0 : index
    %c0_227 = arith.constant 0 : index
    %193 = vector.load %arg8[%c0_226, %c0_227] : memref<256x128xf32, #tpu.memory_space<vmem>>, vector<256x128xf32>
    tpu.vector_store %arg8[%c0_226, %c0_227], %192 {strides = array<i32>} : memref<256x128xf32, #tpu.memory_space<vmem>>, vector<256x128xf32>,
    %c0_228 = arith.constant 0 : index
    %c0_229 = arith.constant 0 : index
    %194 = vector.load %arg8[%c0_228, %c0_229] : memref<256x128xf32, #tpu.memory_space<vmem>>, vector<256x128xf32>
    %c0_230 = arith.constant 0 : index
    %c0_231 = arith.constant 0 : index
    %195 = vector.load %arg5[%c0_230, %c0_231] : memref<1x128xf32, #tpu.memory_space<vmem>>, vector<1x128xf32>
    %196 = vector.broadcast %195 : vector<1x128xf32> to vector<256x128xf32>
    %197 = arith.addf %194, %196 : vector<256x128xf32>
    %198 = vector.shape_cast %197 : vector<256x128xf32> to vector<16x16x128xf32>
    %c0_232 = arith.constant 0 : index
    %c1_233 = arith.constant 1 : index
    %c1_234 = arith.constant 1 : index
    %c0_235 = arith.constant 0 : index
    %199 = vector.load %arg1[%c0_232, %c1_233, %c1_234, %c0_235] : memref<1x18x18x128xf32, #tpu.memory_space<vmem>>, vector<1x16x16x128xf32>
    %200 = vector.shape_cast %199 : vector<1x16x16x128xf32> to vector<16x16x128xf32>
    %201 = arith.addf %200, %198 : vector<16x16x128xf32>
    %c0_236 = arith.constant 0 : index
    %c0_237 = arith.constant 0 : index
    %c0_238 = arith.constant 0 : index
    %c0_239 = arith.constant 0 : index
    %202 = vector.load %arg6[%c0_236, %c0_237, %c0_238, %c0_239] : memref<1x16x16x128xf32, #tpu.memory_space<vmem>>, vector<1x16x16x128xf32>
    %203 = vector.shape_cast %202 : vector<1x16x16x128xf32> to vector<16x16x128xf32>
    %204 = vector.shape_cast %201 : vector<16x16x128xf32> to vector<1x16x16x128xf32>
    tpu.vector_store %arg6[%c0_236, %c0_237, %c0_238, %c0_239], %204 {strides = array<i32>} : memref<1x16x16x128xf32, #tpu.memory_space<vmem>>, vector<1x16x16x128xf32>,
    return
  }
  func.func @transform_0(%arg0: i32) -> (i32, i32, i32, i32) {
    %c0_i32 = arith.constant 0 : i32
    %c0_i32_0 = arith.constant 0 : i32
    %c0_i32_1 = arith.constant 0 : i32
    %c0_i32_2 = arith.constant 0 : i32
    return %arg0, %c0_i32, %c0_i32_0, %c0_i32_1 : i32, i32, i32, i32
  }
  func.func @transform_1(%arg0: i32) -> (i32, i32, i32) {
    %c0_i32 = arith.constant 0 : i32
    %c0_i32_0 = arith.constant 0 : i32
    %c0_i32_1 = arith.constant 0 : i32
    %c0_i32_2 = arith.constant 0 : i32
    return %c0_i32, %c0_i32_0, %c0_i32_1 : i32, i32, i32
  }
  func.func @transform_2(%arg0: i32) -> (i32, i32) {
    %c0_i32 = arith.constant 0 : i32
    %c0_i32_0 = arith.constant 0 : i32
    %c0_i32_1 = arith.constant 0 : i32
    return %c0_i32, %c0_i32_0 : i32, i32
  }
  func.func @transform_3(%arg0: i32) -> (i32, i32, i32) {
    %c0_i32 = arith.constant 0 : i32
    %c0_i32_0 = arith.constant 0 : i32
    %c0_i32_1 = arith.constant 0 : i32
    %c0_i32_2 = arith.constant 0 : i32
    return %c0_i32, %c0_i32_0, %c0_i32_1 : i32, i32, i32
  }
  func.func @transform_4(%arg0: i32) -> (i32, i32) {
    %c0_i32 = arith.constant 0 : i32
    %c0_i32_0 = arith.constant 0 : i32
    %c0_i32_1 = arith.constant 0 : i32
    return %c0_i32, %c0_i32_0 : i32, i32
  }
  func.func @transform_5(%arg0: i32) -> (i32, i32, i32, i32) {
    %c0_i32 = arith.constant 0 : i32
    %c0_i32_0 = arith.constant 0 : i32
    %c0_i32_1 = arith.constant 0 : i32
    %c0_i32_2 = arith.constant 0 : i32
    return %arg0, %c0_i32, %c0_i32_0, %c0_i32_1 : i32, i32, i32, i32
  }
}

</mosaic_0001>

<bundles_post_ra>
// kernel: residual_block_pallas.1
= control target key start
LH: loop header
LB: loop body
LE: loop exit
PB: predicated region body
PF: predicated region fallthrough
CT: control target
= control target key end

     0   :  { %s9440_s18 = smov 0   ;;  %s11103_s0 = inlined_call_operand.vmem [shape: f32[2,18,18,128], index: 0, kind: input, shape index: {}]   ;;  %s11104_s1 = inlined_call_operand.vmem [shape: bf16[9,128,128], index: 1, kind: input, shape index: {}]   ;;  %s11105_s2 = inlined_call_operand.vmem [shape: f32[1,128], index: 2, kind: input, shape index: {}]   ;;  %s11106_s3 = inlined_call_operand.vmem [shape: bf16[9,128,128], index: 3, kind: input, shape index: {}]   ;;  %s11107_s4 = inlined_call_operand.vmem [shape: f32[1,128], index: 4, kind: input, shape index: {}]   ;;  %s11108_s5 = inlined_call_operand.vmem [shape: f32[2,16,16,128], index: 5, kind: output, shape index: {}]  }
   0x1 LB: > { %s8163_s19 = sadd.s32 4294967295, %s9408_s18   ;;  %p8167_p0 = scmp.ge.s32.totalorder %s9408_s18, 1  ;;  %s9408_s18 = sphi %s9440_s18, %s15_s18  }
   0x2   : > { %p187_p1 = scmp.lt.s32.totalorder %s9408_s18, 3 }
   0x4   : > { %p188_p2 = pnand %p8167_p0, %p187_p1 }
   0x6   : > { %191 = sbr.rel (%p188_p2) target bundleno = 1504 (0x5e0), region = 40 }
   0xb   : > { %v9237_v0 = vld [vmem:[%s11104_s1 + $0x38] sm:$0xff]  ;;  %v9236_v2 = vld [vmem:[%s11104_s1 + $0x30] sm:$0xff]  ;;  %p215_p3 = scmp.lt.s32.totalorder %s8163_s19, 1  ;;  %v9235_v4 = vld [vmem:[%s11104_s1 + $0x28] sm:$0xff] }
   0xc   : > { %v9245_v1 = vld [vmem:[%s11104_s1 + $0x78] sm:$0xff]  ;;  %513 = vmatpush.bf16.msra.mxu0 %v9237_v0  ;;  %9374 = vmatpush.bf16.msra.mxu2 %v9237_v0  ;;  %v9244_v3 = vld [vmem:[%s11104_s1 + $0x70] sm:$0xff]  ;;  %v9243_v5 = vld [vmem:[%s11104_s1 + $0x68] sm:$0xff] }
   0xd   : > { %9382 = vmatpush.bf16.msra.mxu3 %v9245_v1  ;;  %923 = vmatpush.bf16.msra.mxu1 %v9245_v1  ;;  %s11122_s19 = smov (!%p215_p3, %s8163_s19), 1  ;;  %v9234_v6 = vld [vmem:[%s11104_s1 + $0x20] sm:$0xff]  ;;  %v9233_v8 = vld [vmem:[%s11104_s1 + $0x18] sm:$0xff]  ;;  %v9232_v10 = vld [vmem:[%s11104_s1 + $0x10] sm:$0xff] }
   0xe   : > { %s9390_s9 = smul.u32 432, %s11122_s19  ;;  %v9242_v7 = vld [vmem:[%s11104_s1 + $0x60] sm:$0xff]  ;;  %v9241_v9 = vld [vmem:[%s11104_s1 + $0x58] sm:$0xff]  ;;  %v9240_v11 = vld [vmem:[%s11104_s1 + $0x50] sm:$0xff]  ;;  %s9229_s6 = sshll.u32 %s11122_s19, 8 }
   0xf   : > { %v9231_v25 = vld [vmem:[%s11104_s1 + $0x8] sm:$0xff]  ;;  %v9230_v34 = vld [vmem:[%s11104_s1] sm:$0xff]  ;;  %v9253_v40 = vld [vmem:[%s11104_s1 + $0xb8] sm:$0xff] }
  0x10   : > { %514 = vmatpush.bf16.msra.mxu0 %v9236_v2  ;;  %9375 = vmatpush.bf16.msra.mxu2 %v9236_v2  ;;  %s9481_s16 = scalar_lea.vmem %s11103_s0, %s9390_s9  ;;  %v9239_v29 = vld [vmem:[%s11104_s1 + $0x48] sm:$0xff]  ;;  %v9238_v39 = vld [vmem:[%s11104_s1 + $0x40] sm:$0xff]  ;;  %v9261_v41 = vld [vmem:[%s11104_s1 + $0xf8] sm:$0xff]  ;;  %s10967_s9 = scalar_lea.vmem %s11108_s5, %s9229_s6 }
  0x11   : > { %9383 = vmatpush.bf16.msra.mxu3 %v9244_v3  ;;  %924 = vmatpush.bf16.msra.mxu1 %v9244_v3  ;;  %v257_v12 = vld [vmem:[%s9481_s16] sm:$0xff]  ;;  %v258_v13 = vld [vmem:[%s9481_s16 + $0x8] sm:$0xff]  ;;  %v9269_v46 = vld [vmem:[%s11104_s1 + $0x138] sm:$0xff] }
  0x12   : > { %v273_v14 = vld [vmem:[%s9481_s16 + $0xc0] sm:$0xff]  ;;  %v274_v15 = vld [vmem:[%s9481_s16 + $0xc8] sm:$0xff]  ;;  %v289_v20 = vpack.c.bf16 %v257_v12, %v257_v12  ;;  %v290_v21 = vpack.c.bf16 %v258_v13, %v258_v13  ;;  %v9252_v47 = vld [vmem:[%s11104_s1 + $0xb0] sm:$0xff] }
  0x13   : > { %v682_v16 = vld [vmem:[%s9481_s16 + $0xc1] sm:$0xff]  ;;  %v683_v17 = vld [vmem:[%s9481_s16 + $0xc9] sm:$0xff]  ;;  %v305_v22 = vpack.c.bf16 %v273_v14, %v273_v14  ;;  %v306_v23 = vpack.c.bf16 %v274_v15, %v274_v15  ;;  %v259_v49 = vld [vmem:[%s9481_s16 + $0x18] sm:$0xff] }
  0x14   : > { %515 = vmatpush.bf16.msra.mxu0 %v9235_v4  ;;  %9376 = vmatpush.bf16.msra.mxu2 %v9235_v4  ;;  %v666_v18 = vld [vmem:[%s9481_s16 + $0x1] sm:$0xff]  ;;  %v667_v19 = vld [vmem:[%s9481_s16 + $0x9] sm:$0xff]  ;;  %v714_v24 = vpack.c.bf16 %v682_v16, %v682_v16  ;;  %v715_v26 = vpack.c.bf16 %v683_v17, %v683_v17  ;;  %v401_v30 = vunpack.c.l.b16 %v289_v20  ;;  %v402_v31 = vunpack.c.l.b16 %v290_v21  ;;  %v275_v51 = vld [vmem:[%s9481_s16 + $0xd8] sm:$0xff] }
  0x15   : > { %9384 = vmatpush.bf16.msra.mxu3 %v9243_v5  ;;  %925 = vmatpush.bf16.msra.mxu1 %v9243_v5  ;;  %v698_v27 = vpack.c.bf16 %v666_v18, %v666_v18  ;;  %v699_v28 = vpack.c.bf16 %v667_v19, %v667_v19  ;;  %v417_v32 = vunpack.c.l.b16 %v305_v22  ;;  %v418_v33 = vunpack.c.l.b16 %v306_v23  ;;  %v9260_v48 = vld [vmem:[%s11104_s1 + $0xf0] sm:$0xff]  ;;  %v260_v50 = vld [vmem:[%s9481_s16 + $0x20] sm:$0xff]  ;;  %v9251_v58 = vld [vmem:[%s11104_s1 + $0xa8] sm:$0xff] }
  0x16   : > { %v827_v35 = vunpack.c.l.b16 %v714_v24  ;;  %v828_v36 = vunpack.c.l.b16 %v715_v26  ;;  %v433_v42 = vpack.c.b16 %v402_v31, %v401_v30  ;;  %v276_v52 = vld [vmem:[%s9481_s16 + $0xe0] sm:$0xff]  ;;  %v9268_v57 = vld [vmem:[%s11104_s1 + $0x130] sm:$0xff]  ;;  %v9259_v59 = vld [vmem:[%s11104_s1 + $0xe8] sm:$0xff]  ;;  %v291_v60 = vpack.c.bf16 %v259_v49, %v259_v49 }
  0x17   : > { %v811_v37 = vunpack.c.l.b16 %v698_v27  ;;  %v812_v38 = vunpack.c.l.b16 %v699_v28  ;;  %v441_v43 = vpack.c.b16 %v418_v33, %v417_v32  ;;  %v684_v53 = vld [vmem:[%s9481_s16 + $0xd9] sm:$0xff]  ;;  %v685_v54 = vld [vmem:[%s9481_s16 + $0xe1] sm:$0xff]  ;;  %v292_v61 = vpack.c.bf16 %v260_v50, %v260_v50  ;;  %v261_v17 = vld [vmem:[%s9481_s16 + $0x30] sm:$0xff] }
  0x18   : > { %516 = vmatpush.bf16.msra.mxu0 %v9234_v6  ;;  %9377 = vmatpush.bf16.msra.mxu2 %v9234_v6  ;;  %v851_v44 = vpack.c.b16 %v828_v36, %v827_v35  ;;  %v668_v55 = vld [vmem:[%s9481_s16 + $0x19] sm:$0xff]  ;;  %v669_v56 = vld [vmem:[%s9481_s16 + $0x21] sm:$0xff]  ;;  %v307_v62 = vpack.c.bf16 %v275_v51, %v275_v51  ;;  %v308_v63 = vpack.c.bf16 %v276_v52, %v276_v52  ;;  %v403_v5 = vunpack.c.l.b16 %v291_v60  ;;  %v277_v19 = vld [vmem:[%s9481_s16 + $0xf0] sm:$0xff] }
  0x19   : > { %9385 = vmatpush.bf16.msra.mxu3 %v9242_v7  ;;  %926 = vmatpush.bf16.msra.mxu1 %v9242_v7  ;;  %v843_v45 = vpack.c.b16 %v812_v38, %v811_v37  ;;  %v716_v0 = vpack.c.bf16 %v684_v53, %v684_v53  ;;  %v717_v1 = vpack.c.bf16 %v685_v54, %v685_v54  ;;  %v9267_v4 = vld [vmem:[%s11104_s1 + $0x128] sm:$0xff]  ;;  %v404_v6 = vunpack.c.l.b16 %v292_v61  ;;  %v262_v18 = vld [vmem:[%s9481_s16 + $0x38] sm:$0xff]  ;;  %v9250_v22 = vld [vmem:[%s11104_s1 + $0xa0] sm:$0xff] }
  0x1a   : > { %v700_v2 = vpack.c.bf16 %v668_v55, %v668_v55  ;;  %v701_v3 = vpack.c.bf16 %v669_v56, %v669_v56  ;;  %v419_v7 = vunpack.c.l.b16 %v307_v62  ;;  %v278_v20 = vld [vmem:[%s9481_s16 + $0xf8] sm:$0xff]  ;;  %v9258_v23 = vld [vmem:[%s11104_s1 + $0xe0] sm:$0xff]  ;;  %v293_v28 = vpack.c.bf16 %v261_v17, %v261_v17  ;;  %v264_v49 = vld [vmem:[%s9481_s16 + $0x50] sm:$0xff] }
  0x1b   : > { %v9547_v13 = vpack.c.b16 %v404_v6, %v403_v5  ;;  %v686_v21 = vld [vmem:[%s9481_s16 + $0xf1] sm:$0xff]  ;;  %v9266_v24 = vld [vmem:[%s11104_s1 + $0x120] sm:$0xff]  ;;  %v309_v30 = vpack.c.bf16 %v277_v19, %v277_v19  ;;  %v310_v31 = vpack.c.bf16 %v278_v20, %v278_v20  ;;  %v279_v50 = vld [vmem:[%s9481_s16 + $0x108] sm:$0xff]  ;;  %v296_v60 = vpack.c.bf16 %v264_v49, %v264_v49 }
  0x1c   : > { %517 = vmatpush.bf16.msra.mxu0 %v9233_v8  ;;  %9378 = vmatpush.bf16.msra.mxu2 %v9233_v8  ;;  %v420_v8 = vunpack.c.l.b16 %v308_v63  ;;  %v814_v12 = vunpack.c.l.b16 %v701_v3  ;;  %v670_v26 = vld [vmem:[%s9481_s16 + $0x31] sm:$0xff]  ;;  %v671_v27 = vld [vmem:[%s9481_s16 + $0x39] sm:$0xff]  ;;  %v718_v32 = vpack.c.bf16 %v686_v21, %v686_v21  ;;  %v405_v36 = vunpack.c.l.b16 %v293_v28  ;;  %v688_v52 = vld [vmem:[%s9481_s16 + $0x109] sm:$0xff] }
  0x1d   : > { %9386 = vmatpush.bf16.msra.mxu3 %v9241_v9  ;;  %927 = vmatpush.bf16.msra.mxu1 %v9241_v9  ;;  %v829_v9 = vunpack.c.l.b16 %v716_v0  ;;  %v703_v35 = vpack.c.bf16 %v671_v27, %v671_v27  ;;  %v421_v38 = vunpack.c.l.b16 %v309_v30  ;;  %v280_v51 = vld [vmem:[%s9481_s16 + $0x110] sm:$0xff]  ;;  %v9249_v53 = vld [vmem:[%s11104_s1 + $0x98] sm:$0xff]  ;;  %v311_v61 = vpack.c.bf16 %v279_v50, %v279_v50  ;;  %v265_v17 = vld [vmem:[%s9481_s16 + $0x60] sm:$0xff] }
  0x1e   : > { %v442_v14 = vpack.c.b16 %v420_v8, %v419_v7  ;;  %v9257_v54 = vld [vmem:[%s11104_s1 + $0xd8] sm:$0xff]  ;;  %v312_v62 = vpack.c.bf16 %v280_v51, %v280_v51  ;;  %v720_v63 = vpack.c.bf16 %v688_v52, %v688_v52  ;;  %v281_v19 = vld [vmem:[%s9481_s16 + $0x120] sm:$0xff]  ;;  %v282_v20 = vld [vmem:[%s9481_s16 + $0x128] sm:$0xff]  ;;  %v297_v28 = vpack.c.bf16 %v265_v17, %v265_v17 }
  0x1f   : > { %v9265_v55 = vld [vmem:[%s11104_s1 + $0x118] sm:$0xff]  ;;  %v423_v5 = vunpack.c.l.b16 %v311_v61  ;;  %v690_v21 = vld [vmem:[%s9481_s16 + $0x121] sm:$0xff]  ;;  %v675_v27 = vld [vmem:[%s9481_s16 + $0x69] sm:$0xff]  ;;  %v313_v30 = vpack.c.bf16 %v281_v19, %v281_v19 }
  0x20   : > { %518 = vmatpush.bf16.msra.mxu0 %v9232_v10  ;;  %9379 = vmatpush.bf16.msra.mxu2 %v9232_v10  ;;  %v830_v10 = vunpack.c.l.b16 %v717_v1  ;;  %v689_v56 = vld [vmem:[%s9481_s16 + $0x111] sm:$0xff]  ;;  %v424_v6 = vunpack.c.l.b16 %v312_v62  ;;  %v833_v7 = vunpack.c.l.b16 %v720_v63  ;;  %v268_v51 = vld [vmem:[%s9481_s16 + $0x80] sm:$0xff] }
  0x21   : > { %9387 = vmatpush.bf16.msra.mxu3 %v9240_v11  ;;  %928 = vmatpush.bf16.msra.mxu1 %v9240_v11  ;;  %v813_v11 = vunpack.c.l.b16 %v700_v2  ;;  %v721_v0 = vpack.c.bf16 %v689_v56, %v689_v56  ;;  %v267_v50 = vld [vmem:[%s9481_s16 + $0x78] sm:$0xff]  ;;  %v9247_v56 = vld [vmem:[%s11104_s1 + $0x88] sm:$0xff]  ;;  %v300_v63 = vpack.c.bf16 %v268_v51, %v268_v51 }
  0x22   : > { %v852_v15 = vpack.c.b16 %v830_v10, %v829_v9  ;;  %v283_v52 = vld [vmem:[%s9481_s16 + $0x138] sm:$0xff]  ;;  %v299_v62 = vpack.c.bf16 %v267_v50, %v267_v50 }
  0x23   : > { %v9549_v16 = vpack.c.b16 %v814_v12, %v813_v11  ;;  %v834_v8 = vunpack.c.l.b16 %v721_v0  ;;  %v444_v12 = vpack.c.b16 %v424_v6, %v423_v5  ;;  %v9277_v61 = vld [vmem:[%s11104_s1 + $0x178] sm:$0xff]  ;;  %v315_v0 = vpack.c.bf16 %v283_v52, %v283_v52 }
  0x24   : > { %519 = vmatpush.bf16.msra.mxu0 %v9231_v25  ;;  %9380 = vmatpush.bf16.msra.mxu2 %v9231_v25  ;;  %v687_v25 = vld [vmem:[%s9481_s16 + $0xf9] sm:$0xff]  ;;  %v411_v6 = vunpack.c.l.b16 %v299_v62  ;;  %v272_v62 = vld [vmem:[%s9481_s16 + $0xb0] sm:$0xff] }
  0x25   : > { %9388 = vmatpush.bf16.msra.mxu3 %v9239_v29  ;;  %929 = vmatpush.bf16.msra.mxu1 %v9239_v29  ;;  %v294_v29 = vpack.c.bf16 %v262_v18, %v262_v18  ;;  %v719_v33 = vpack.c.bf16 %v687_v25, %v687_v25  ;;  %v266_v18 = vld [vmem:[%s9481_s16 + $0x68] sm:$0xff] }
  0x26   : > { %v691_v25 = vld [vmem:[%s9481_s16 + $0x129] sm:$0xff] }
  0x27   : > { %v406_v37 = vunpack.c.l.b16 %v294_v29  ;;  %v298_v29 = vpack.c.bf16 %v266_v18, %v266_v18 }
  0x28   : > { %520 = vmatpush.bf16.msra.mxu0 %v9230_v34  ;;  %9381 = vmatpush.bf16.msra.mxu2 %v9230_v34  ;;  %v702_v34 = vpack.c.bf16 %v670_v26, %v670_v26  ;;  %v674_v26 = vld [vmem:[%s9481_s16 + $0x61] sm:$0xff] }
  0x29   : > { %9389 = vmatpush.bf16.msra.mxu3 %v9238_v39  ;;  %930 = vmatpush.bf16.msra.mxu1 %v9238_v39  ;;  %v422_v39 = vunpack.c.l.b16 %v310_v31  ;;  %v314_v31 = vpack.c.bf16 %v282_v20, %v282_v20 }
  0x2b   : > { %521 = vmatmul.bf16.vlgmr.msra.gmra.mxu0 %v433_v42  ;;  %561 = vmatmul.bf16.vlgmr.msra.gmra.mxu2 %v441_v43  ;;  %v815_v42 = vunpack.c.l.b16 %v702_v34  ;;  %v816_v43 = vunpack.c.l.b16 %v703_v35  ;;  %v706_v34 = vpack.c.bf16 %v674_v26, %v674_v26  ;;  %v707_v35 = vpack.c.bf16 %v675_v27, %v675_v27  ;;  %v694_v26 = vld [vmem:[%s9481_s16 + $0x151] sm:$0xff]  ;;  %v695_v27 = vld [vmem:[%s9481_s16 + $0x159] sm:$0xff] }
  0x2c   : > { %1333 = vmatpush.bf16.msrb.mxu2 %v9253_v40  ;;  %971 = vmatmul.bf16.vlgmr.msra.gmra.mxu3 %v851_v44  ;;  %v831_v40 = vunpack.c.l.b16 %v718_v32  ;;  %v9570_v44 = vpack.c.b16 %v406_v37, %v405_v36  ;;  %v722_v32 = vpack.c.bf16 %v690_v21, %v690_v21  ;;  %v409_v36 = vunpack.c.l.b16 %v297_v28  ;;  %v9276_v28 = vld [vmem:[%s11104_s1 + $0x170] sm:$0xff] }
  0x2d   : > { %1744 = vmatpush.bf16.msrb.mxu3 %v9261_v41  ;;  %931 = vmatmul.bf16.vlgmr.msra.gmra.mxu1 %v843_v45  ;;  %v832_v41 = vunpack.c.l.b16 %v719_v33  ;;  %v443_v45 = vpack.c.b16 %v422_v39, %v421_v38  ;;  %v723_v33 = vpack.c.bf16 %v691_v25, %v691_v25  ;;  %v410_v37 = vunpack.c.l.b16 %v298_v29  ;;  %v286_v25 = vld [vmem:[%s9481_s16 + $0x158] sm:$0xff] }
  0x2e   : > { %2154 = vmatpush.bf16.msrb.mxu0 %v9269_v46  ;;  %v425_v38 = vunpack.c.l.b16 %v313_v30  ;;  %v426_v39 = vunpack.c.l.b16 %v314_v31  ;;  %2564 = vmatpush.bf16.msrb.mxu1 %v9277_v61  ;;  %v678_v29 = vld [vmem:[%s9481_s16 + $0x91] sm:$0xff]  ;;  %v9246_v30 = vld [vmem:[%s11104_s1 + $0x80] sm:$0xff]  ;;  %v271_v61 = vld [vmem:[%s9481_s16 + $0xa8] sm:$0xff] }
  0x2f   : > { %v853_v46 = vpack.c.b16 %v832_v41, %v831_v40  ;;  %v835_v40 = vunpack.c.l.b16 %v722_v32  ;;  %v836_v41 = vunpack.c.l.b16 %v723_v33  ;;  %v9254_v31 = vld [vmem:[%s11104_s1 + $0xc0] sm:$0xff]  ;;  %v9275_v33 = vld [vmem:[%s11104_s1 + $0x168] sm:$0xff] }
  0x30   : > { %1334 = vmatpush.bf16.msrb.mxu2 %v9252_v47  ;;  %v9572_v47 = vpack.c.b16 %v816_v43, %v815_v42  ;;  %v819_v42 = vunpack.c.l.b16 %v706_v34  ;;  %v820_v43 = vunpack.c.l.b16 %v707_v35  ;;  %v679_v32 = vld [vmem:[%s9481_s16 + $0x99] sm:$0xff] }
  0x31   : > { %1745 = vmatpush.bf16.msrb.mxu3 %v9260_v48  ;;  %v263_v48 = vld [vmem:[%s9481_s16 + $0x48] sm:$0xff]  ;;  %v9262_v34 = vld [vmem:[%s11104_s1 + $0x100] sm:$0xff] }
  0x32   : > { %2155 = vmatpush.bf16.msrb.mxu0 %v9268_v57  ;;  %v672_v57 = vld [vmem:[%s9481_s16 + $0x49] sm:$0xff]  ;;  %v9618_v49 = vpack.c.b16 %v820_v43, %v819_v42  ;;  %2565 = vmatpush.bf16.msrb.mxu1 %v9276_v28  ;;  %v711_v42 = vpack.c.bf16 %v679_v32, %v679_v32  ;;  %v9274_v43 = vld [vmem:[%s11104_s1 + $0x160] sm:$0xff] }
  0x33   : > { %v704_v1 = vpack.c.bf16 %v672_v57, %v672_v57  ;;  %v9255_v57 = vld [vmem:[%s11104_s1 + $0xc8] sm:$0xff] }
  0x34   : > { %1335 = vmatpush.bf16.msrb.mxu2 %v9251_v58  ;;  %v673_v58 = vld [vmem:[%s9481_s16 + $0x51] sm:$0xff] }
  0x35   : > { %1746 = vmatpush.bf16.msrb.mxu3 %v9259_v59  ;;  %v295_v59 = vpack.c.bf16 %v263_v48, %v263_v48  ;;  %v705_v2 = vpack.c.bf16 %v673_v58, %v673_v58  ;;  %v817_v9 = vunpack.c.l.b16 %v704_v1  ;;  %v855_v48 = vpack.c.b16 %v836_v41, %v835_v40  ;;  %v9263_v58 = vld [vmem:[%s11104_s1 + $0x108] sm:$0xff] }
  0x36   : > { %2156 = vmatpush.bf16.msrb.mxu0 %v9267_v4  ;;  %v408_v4 = vunpack.c.l.b16 %v296_v60  ;;  %v677_v60 = vld [vmem:[%s9481_s16 + $0x81] sm:$0xff]  ;;  %v727_v40 = vpack.c.bf16 %v695_v27, %v695_v27  ;;  %v710_v41 = vpack.c.bf16 %v678_v29, %v678_v29  ;;  %2566 = vmatpush.bf16.msrb.mxu1 %v9275_v33 }
  0x37   : > { %v407_v3 = vunpack.c.l.b16 %v295_v59  ;;  %v818_v10 = vunpack.c.l.b16 %v705_v2  ;;  %v676_v59 = vld [vmem:[%s9481_s16 + $0x79] sm:$0xff]  ;;  %v709_v5 = vpack.c.bf16 %v677_v60, %v677_v60 }
  0x38   : > { %1336 = vmatpush.bf16.msrb.mxu2 %v9250_v22  ;;  %v9248_v22 = vld [vmem:[%s11104_s1 + $0x90] sm:$0xff] }
  0x39   : > { %1747 = vmatpush.bf16.msrb.mxu3 %v9258_v23  ;;  %v9593_v11 = vpack.c.b16 %v408_v4, %v407_v3  ;;  %v9256_v23 = vld [vmem:[%s11104_s1 + $0xd0] sm:$0xff]  ;;  %v708_v4 = vpack.c.bf16 %v676_v59, %v676_v59  ;;  %v822_v17 = vunpack.c.l.b16 %v709_v5 }
  0x3a   : > { %2157 = vmatpush.bf16.msrb.mxu0 %v9266_v24  ;;  %v9264_v24 = vld [vmem:[%s11104_s1 + $0x110] sm:$0xff]  ;;  %2567 = vmatpush.bf16.msrb.mxu1 %v9274_v43 }
  0x3b   : > { %526 = vmatmul.bf16.gmra.mxu0 %v9547_v13  ;;  %566 = vmatmul.bf16.gmra.mxu2 %v442_v14  ;;  %v854_v14 = vpack.c.b16 %v834_v8, %v833_v7  ;;  %v412_v7 = vunpack.c.l.b16 %v300_v63  ;;  %v427_v8 = vunpack.c.l.b16 %v315_v0  ;;  %v287_v63 = vld [vmem:[%s9481_s16 + $0x168] sm:$0xff]  ;;  %v288_v0 = vld [vmem:[%s9481_s16 + $0x170] sm:$0xff] }
  0x3c   : > { %976 = vmatmul.bf16.gmra.mxu3 %v852_v15  ;;  %1337 = vmatpush.bf16.msrb.mxu2 %v9249_v53  ;;  %v9595_v15 = vpack.c.b16 %v818_v10, %v817_v9  ;;  %v284_v53 = vld [vmem:[%s9481_s16 + $0x140] sm:$0xff]  ;;  %v697_v5 = vld [vmem:[%s9481_s16 + $0x171] sm:$0xff] }
  0x3d   : > { %936 = vmatmul.bf16.gmra.mxu1 %v9549_v16  ;;  %1748 = vmatpush.bf16.msrb.mxu3 %v9257_v54  ;;  %v692_v54 = vld [vmem:[%s9481_s16 + $0x139] sm:$0xff]  ;;  %v316_v1 = vpack.c.bf16 %v284_v53, %v284_v53  ;;  %v9642_v18 = vpack.c.b16 %v412_v7, %v411_v6  ;;  %v840_v53 = vunpack.c.l.b16 %v727_v40  ;;  %v680_v6 = vld [vmem:[%s9481_s16 + $0xa9] sm:$0xff]  ;;  %v681_v7 = vld [vmem:[%s9481_s16 + $0xb1] sm:$0xff] }
  0x3e   : > { %2158 = vmatpush.bf16.msrb.mxu0 %v9265_v55  ;;  %v693_v55 = vld [vmem:[%s9481_s16 + $0x141] sm:$0xff]  ;;  %v724_v2 = vpack.c.bf16 %v692_v54, %v692_v54  ;;  %v823_v54 = vunpack.c.l.b16 %v710_v41 }
  0x3f   : > { %v725_v3 = vpack.c.bf16 %v693_v55, %v693_v55  ;;  %v428_v9 = vunpack.c.l.b16 %v316_v1  ;;  %v824_v55 = vunpack.c.l.b16 %v711_v42  ;;  %v9272_v1 = vld [vmem:[%s11104_s1 + $0x150] sm:$0xff]  ;;  %v8460_v40 = vld [vmem:[%s9481_s16 + $0x22] sm:$0xff] }
  0x40   : > { %1338 = vmatpush.bf16.msrb.mxu2 %v9248_v22  ;;  %v837_v10 = vunpack.c.l.b16 %v724_v2  ;;  %v269_v22 = vld [vmem:[%s9481_s16 + $0x90] sm:$0xff] }
  0x41   : > { %1749 = vmatpush.bf16.msrb.mxu3 %v9256_v23  ;;  %v446_v19 = vpack.c.b16 %v428_v9, %v427_v8  ;;  %v270_v23 = vld [vmem:[%s9481_s16 + $0x98] sm:$0xff]  ;;  %v301_v35 = vpack.c.bf16 %v269_v22, %v269_v22  ;;  %v9679_v60 = vpack.c.b16 %v824_v55, %v823_v54  ;;  %v696_v2 = vld [vmem:[%s9481_s16 + $0x169] sm:$0xff]  ;;  %v303_v8 = vpack.c.bf16 %v271_v61, %v271_v61 }
  0x42   : > { %2159 = vmatpush.bf16.msrb.mxu0 %v9264_v24  ;;  %v285_v24 = vld [vmem:[%s9481_s16 + $0x150] sm:$0xff]  ;;  %v304_v9 = vpack.c.bf16 %v272_v62, %v272_v62  ;;  %v713_v22 = vpack.c.bf16 %v681_v7, %v681_v7 }
  0x43   : > { %v9292_v61 = vld [vmem:[%s11104_s1 + $0x1f0] sm:$0xff] }
  0x44   : > { %1339 = vmatpush.bf16.msrb.mxu2 %v9247_v56  ;;  %v826_v32 = vunpack.c.l.b16 %v713_v22  ;;  %v8461_v62 = vld [vmem:[%s9481_s16 + $0x32] sm:$0xff]  ;;  %v8463_v22 = vld [vmem:[%s9481_s16 + $0x4a] sm:$0xff] }
  0x45   : > { %1750 = vmatpush.bf16.msrb.mxu3 %v9255_v57 }
  0x46   : > { %2160 = vmatpush.bf16.msrb.mxu0 %v9263_v58  ;;  %v9273_v58 = vld [vmem:[%s11104_s1 + $0x158] sm:$0xff] }
  0x47   : > { %2568 = vmatpush.bf16.msrb.mxu1 %v9273_v58 }
  0x48   : > { %1340 = vmatpush.bf16.msrb.mxu2 %v9246_v30 }
  0x49   : > { %1751 = vmatpush.bf16.msrb.mxu3 %v9254_v31 }
  0x4a   : > { %2161 = vmatpush.bf16.msrb.mxu0 %v9262_v34 }
  0x4b   : > { %531 = vmatmul.bf16.gmra.mxu0 %v9570_v44  ;;  %571 = vmatmul.bf16.gmra.mxu2 %v443_v45  ;;  %v9616_v45 = vpack.c.b16 %v410_v37, %v409_v36  ;;  %v302_v36 = vpack.c.bf16 %v270_v23, %v270_v23  ;;  %v317_v37 = vpack.c.bf16 %v285_v24, %v285_v24  ;;  %v9270_v23 = vld [vmem:[%s11104_s1 + $0x140] sm:$0xff]  ;;  %v9301_v24 = vld [vmem:[%s11104_s1 + $0x238] sm:$0xff] }
  0x4c   : > { %981 = vmatmul.bf16.gmra.mxu3 %v853_v46  ;;  %v445_v46 = vpack.c.b16 %v426_v39, %v425_v38  ;;  %v318_v38 = vpack.c.bf16 %v286_v25, %v286_v25  ;;  %v726_v39 = vpack.c.bf16 %v694_v26, %v694_v26  ;;  %2569 = vmatpush.bf16.msrb.mxu1 %v9272_v1  ;;  %v415_v25 = vunpack.c.l.b16 %v303_v8 }
  0x4d   : > { %941 = vmatmul.bf16.gmra.mxu1 %v9572_v47  ;;  %v429_v50 = vunpack.c.l.b16 %v317_v37  ;;  %v416_v26 = vunpack.c.l.b16 %v304_v9  ;;  %v1076_v37 = vld [vmem:[%s9481_s16 + $0x2] sm:$0xff] }
  0x4e   : > { %v430_v51 = vunpack.c.l.b16 %v318_v38  ;;  %v839_v52 = vunpack.c.l.b16 %v726_v39  ;;  %3795 = vmatpush.bf16.msra.mxu0 %v9301_v24  ;;  %v1077_v38 = vld [vmem:[%s9481_s16 + $0xa] sm:$0xff]  ;;  %v8459_v39 = vld [vmem:[%s9481_s16 + $0x1a] sm:$0xff]  ;;  %v1108_v41 = vpack.c.bf16 %v1076_v37, %v1076_v37 }
  0x4f   : > { %v9709_v33 = vpack.c.b16 %v416_v26, %v415_v25  ;;  %v1109_v42 = vpack.c.bf16 %v1077_v38, %v1077_v38  ;;  %v2339_v43 = vpack.c.bf16 %v8459_v39, %v8459_v39 }
  0x50   : > { %v447_v57 = vpack.c.b16 %v430_v51, %v429_v50  ;;  %v857_v59 = vpack.c.b16 %v840_v53, %v839_v52 }
  0x51   : > { %v1222_v50 = vunpack.c.l.b16 %v1109_v42  ;;  %v2452_v51 = vunpack.c.l.b16 %v2339_v43  ;;  %v9291_v42 = vld [vmem:[%s11104_s1 + $0x1e8] sm:$0xff] }
  0x52   : > { %v8465_v43 = vld [vmem:[%s9481_s16 + $0x62] sm:$0xff] }
  0x5b   : > { %536 = vmatmul.bf16.gmra.mxu0 %v9593_v11  ;;  %576 = vmatmul.bf16.gmra.mxu2 %v444_v12  ;;  %v838_v12 = vunpack.c.l.b16 %v725_v3  ;;  %v9285_v3 = vld [vmem:[%s11104_s1 + $0x1b8] sm:$0xff] }
  0x5c   : > { %986 = vmatmul.bf16.gmra.mxu3 %v854_v14  ;;  %v821_v14 = vunpack.c.l.b16 %v708_v4  ;;  %v9293_v4 = vld [vmem:[%s11104_s1 + $0x1f8] sm:$0xff]  ;;  %2975 = vmatpush.bf16.msra.mxu2 %v9285_v3  ;;  %v2341_v3 = vpack.c.bf16 %v8461_v62, %v8461_v62 }
  0x5d   : > { %946 = vmatmul.bf16.gmra.mxu1 %v9595_v15  ;;  %v856_v20 = vpack.c.b16 %v838_v12, %v837_v10  ;;  %3385 = vmatpush.bf16.msra.mxu3 %v9293_v4  ;;  %v319_v10 = vpack.c.bf16 %v287_v63, %v287_v63  ;;  %v320_v12 = vpack.c.bf16 %v288_v0, %v288_v0  ;;  %v8462_v63 = vld [vmem:[%s9481_s16 + $0x3a] sm:$0xff] }
  0x5e   : > { %v9644_v21 = vpack.c.b16 %v822_v17, %v821_v14  ;;  %v9271_v14 = vld [vmem:[%s11104_s1 + $0x148] sm:$0xff]  ;;  %v728_v17 = vpack.c.bf16 %v696_v2, %v696_v2  ;;  %v2454_v7 = vunpack.c.l.b16 %v2341_v3 }
  0x5f   : > { %2570 = vmatpush.bf16.msrb.mxu1 %v9271_v14  ;;  %v431_v27 = vunpack.c.l.b16 %v319_v10  ;;  %v432_v28 = vunpack.c.l.b16 %v320_v12 }
  0x60   : > { %v841_v29 = vunpack.c.l.b16 %v728_v17 }
  0x61   : > { %v448_v34 = vpack.c.b16 %v432_v28, %v431_v27  ;;  %3386 = vmatpush.bf16.msra.mxu3 %v9292_v61  ;;  %v2343_v28 = vpack.c.bf16 %v8463_v22, %v8463_v22 }
  0x63   : > { %2571 = vmatpush.bf16.msrb.mxu1 %v9270_v23  ;;  %v8464_v23 = vld [vmem:[%s9481_s16 + $0x52] sm:$0xff] }
  0x65   : > { %3387 = vmatpush.bf16.msra.mxu3 %v9291_v42 }
  0x6b   : > { %541 = vmatmul.bf16.gmra.mxu0 %v9616_v45  ;;  %581 = vmatmul.bf16.gmra.mxu2 %v445_v46  ;;  %v413_v46 = vunpack.c.l.b16 %v301_v35 }
  0x6c   : > { %991 = vmatmul.bf16.gmra.mxu3 %v855_v48  ;;  %v414_v48 = vunpack.c.l.b16 %v302_v36 }
  0x6d   : > { %951 = vmatmul.bf16.gmra.mxu1 %v9618_v49 }
  0x6e   : > { %v9674_v56 = vpack.c.b16 %v414_v48, %v413_v46  ;;  %v2340_v46 = vpack.c.bf16 %v8460_v40, %v8460_v40  ;;  %v1221_v48 = vunpack.c.l.b16 %v1108_v41  ;;  %v9283_v41 = vld [vmem:[%s11104_s1 + $0x1a8] sm:$0xff] }
  0x70   : > { %v2453_v52 = vunpack.c.l.b16 %v2340_v46  ;;  %v1253_v53 = vpack.c.b16 %v1222_v50, %v1221_v48  ;;  %v8466_v46 = vld [vmem:[%s9481_s16 + $0x6a] sm:$0xff] }
  0x72   : > { %v2484_v55 = vpack.c.b16 %v2453_v52, %v2452_v51  ;;  %v2345_v52 = vpack.c.bf16 %v8465_v43, %v8465_v43  ;;  %v9298_v43 = vld [vmem:[%s11104_s1 + $0x220] sm:$0xff] }
  0x7b   : > { %546 = vmatmul.bf16.gmra.mxu0 %v9642_v18  ;;  %586 = vmatmul.bf16.gmra.mxu2 %v446_v19  ;;  %v729_v19 = vpack.c.bf16 %v697_v5, %v697_v5 }
  0x7c   : > { %996 = vmatmul.bf16.gmra.mxu3 %v856_v20  ;;  %v712_v20 = vpack.c.bf16 %v680_v6, %v680_v6  ;;  %v9300_v6 = vld [vmem:[%s11104_s1 + $0x230] sm:$0xff] }
  0x7d   : > { %956 = vmatmul.bf16.gmra.mxu1 %v9644_v21  ;;  %v842_v30 = vunpack.c.l.b16 %v729_v19  ;;  %3796 = vmatpush.bf16.msra.mxu0 %v9300_v6 }
  0x7e   : > { %v825_v31 = vunpack.c.l.b16 %v712_v20 }
  0x7f   : > { %v858_v35 = vpack.c.b16 %v842_v30, %v841_v29  ;;  %v2344_v29 = vpack.c.bf16 %v8464_v23, %v8464_v23 }
  0x80   : > { %v9711_v36 = vpack.c.b16 %v826_v32, %v825_v31  ;;  %v2456_v32 = vunpack.c.l.b16 %v2343_v28 }
  0x8b   : > { %551 = vmatmul.bf16.gmra.mxu0 %v9674_v56  ;;  %591 = vmatmul.bf16.gmra.mxu2 %v447_v57 }
  0x8c   : > { %1001 = vmatmul.bf16.gmra.mxu3 %v857_v59  ;;  %v9284_v59 = vld [vmem:[%s11104_s1 + $0x1b0] sm:$0xff] }
  0x8d   : > { %961 = vmatmul.bf16.gmra.mxu1 %v9679_v60  ;;  %2976 = vmatpush.bf16.msra.mxu2 %v9284_v59 }
  0x91   : > { %2977 = vmatpush.bf16.msra.mxu2 %v9283_v41 }
  0x9b   : > { %556 = vmatmul.bf16.gmra.mxu0 %v9709_v33  ;;  %596 = vmatmul.bf16.gmra.mxu2 %v448_v34  ;;  %v2457_v34 = vunpack.c.l.b16 %v2344_v29 }
  0x9c   : > { %1006 = vmatmul.bf16.gmra.mxu3 %v858_v35 }
  0x9d   : > { %966 = vmatmul.bf16.gmra.mxu1 %v9711_v36  ;;  %v2486_v38 = vpack.c.b16 %v2457_v34, %v2456_v32  ;;  %v9290_v32 = vld [vmem:[%s11104_s1 + $0x1e0] sm:$0xff]  ;;  %v8469_v34 = vld [vmem:[%s9481_s16 + $0x92] sm:$0xff] }
  0x9e   : > { %3388 = vmatpush.bf16.msra.mxu3 %v9290_v32  ;;  %v8314_v32 = vld [vmem:[%s9481_s16 + $0xc8] sm:$0xff] }
  0xa8   : > { %v522_v54 = vpop.f32.mrf.mxu0 }
  0xaa   : > { %v932_v57 = vpop.f32.mrf.mxu1 }
  0xab   : > { %v9719_v58 = vadd.f32 %v932_v57, %v522_v54  ;;  %1341 = vmatmul.bf16.vlgmr.msrb.gmra.mxu2 %v1253_v53  ;;  %2162 = vmatmul.bf16.vlgmr.msrb.gmra.mxu0 %v9549_v16  ;;  %v2458_v57 = vunpack.c.l.b16 %v2345_v52 }
  0xac   : > { %1752 = vmatmul.bf16.vlgmr.msrb.gmra.mxu3 %v9547_v13  ;;  %v2342_v13 = vpack.c.bf16 %v8462_v63, %v8462_v63 }
  0xad   : > { %2572 = vmatmul.bf16.vlgmr.msrb.gmra.mxu1 %v2484_v55 }
  0xae   : > { %v562_v0 = vpop.f32.mrf.mxu2  ;;  %v2455_v8 = vunpack.c.l.b16 %v2342_v13  ;;  %v8467_v13 = vld [vmem:[%s9481_s16 + $0x7a] sm:$0xff] }
  0xaf   : > { %v972_v1 = vpop.f32.mrf.mxu3 }
  0xb0   : > { %v9731_v2 = vadd.f32 %v972_v1, %v562_v0  ;;  %v524_v16 = vpop.f32.mrf.mxu0  ;;  %v2485_v17 = vpack.c.b16 %v2455_v8, %v2454_v7 }
  0xb2   : > { %v934_v4 = vpop.f32.mrf.mxu1 }
  0xb3   : > { %v9733_v5 = vadd.f32 %v934_v4, %v524_v16  ;;  %v8468_v4 = vld [vmem:[%s9481_s16 + $0x82] sm:$0xff] }
  0xb6   : > { %v564_v9 = vpop.f32.mrf.mxu2 }
  0xb7   : > { %v974_v10 = vpop.f32.mrf.mxu3 }
  0xb8   : > { %v9738_v12 = vadd.f32 %v974_v10, %v564_v9  ;;  %v527_v14 = vpop.f32.mrf.mxu0  ;;  %v2347_v10 = vpack.c.bf16 %v8467_v13, %v8467_v13 }
  0xba   : > { %v937_v19 = vpop.f32.mrf.mxu1  ;;  %v2460_v22 = vunpack.c.l.b16 %v2347_v10 }
  0xbb   : > { %v9740_v20 = vadd.f32 %v937_v19, %v527_v14  ;;  %1346 = vmatmul.bf16.gmra.mxu2 %v2484_v55  ;;  %2167 = vmatmul.bf16.gmra.mxu0 %v9572_v47  ;;  %v9299_v55 = vld [vmem:[%s11104_s1 + $0x228] sm:$0xff]  ;;  %v2348_v14 = vpack.c.bf16 %v8468_v4, %v8468_v4 }
  0xbc   : > { %1757 = vmatmul.bf16.gmra.mxu3 %v9570_v44  ;;  %3797 = vmatpush.bf16.msra.mxu0 %v9299_v55 }
  0xbd   : > { %2577 = vmatmul.bf16.gmra.mxu1 %v2485_v17  ;;  %v2461_v23 = vunpack.c.l.b16 %v2348_v14 }
  0xbe   : > { %v567_v24 = vpop.f32.mrf.mxu2 }
  0xbf   : > { %v977_v25 = vpop.f32.mrf.mxu3 }
  0xc0   : > { %v9746_v26 = vadd.f32 %v977_v25, %v567_v24  ;;  %v529_v27 = vpop.f32.mrf.mxu0  ;;  %3798 = vmatpush.bf16.msra.mxu0 %v9298_v43 }
  0xc2   : > { %v939_v30 = vpop.f32.mrf.mxu1 }
  0xc3   : > { %v9748_v31 = vadd.f32 %v939_v30, %v529_v27  ;;  %v2488_v27 = vpack.c.b16 %v2461_v23, %v2460_v22  ;;  %v9282_v30 = vld [vmem:[%s11104_s1 + $0x1a0] sm:$0xff] }
  0xc4   : > { %2978 = vmatpush.bf16.msra.mxu2 %v9282_v30  ;;  %v9289_v30 = vld [vmem:[%s11104_s1 + $0x1d8] sm:$0xff] }
  0xc5   : > { %3389 = vmatpush.bf16.msra.mxu3 %v9289_v30 }
  0xc6   : > { %v569_v47 = vpop.f32.mrf.mxu2 }
  0xc7   : > { %v979_v35 = vpop.f32.mrf.mxu3 }
  0xc8   : > { %v9750_v44 = vadd.f32 %v979_v35, %v569_v47  ;;  %v532_v37 = vpop.f32.mrf.mxu0  ;;  %v8470_v47 = vld [vmem:[%s9481_s16 + $0x9a] sm:$0xff] }
  0xca   : > { %v942_v39 = vpop.f32.mrf.mxu1 }
  0xcb   : > { %v9752_v40 = vadd.f32 %v942_v39, %v532_v37  ;;  %1351 = vmatmul.bf16.gmra.mxu2 %v2485_v17  ;;  %2172 = vmatmul.bf16.gmra.mxu0 %v9595_v15  ;;  %v2349_v39 = vpack.c.bf16 %v8469_v34, %v8469_v34  ;;  %v8473_v34 = vld [vmem:[%s9481_s16 + $0xc2] sm:$0xff] }
  0xcc   : > { %1762 = vmatmul.bf16.gmra.mxu3 %v9593_v11  ;;  %v2346_v11 = vpack.c.bf16 %v8466_v46, %v8466_v46  ;;  %v2353_v43 = vpack.c.bf16 %v8473_v34, %v8473_v34 }
  0xcd   : > { %2582 = vmatmul.bf16.gmra.mxu1 %v2486_v38  ;;  %v2462_v46 = vunpack.c.l.b16 %v2349_v39 }
  0xce   : > { %v572_v48 = vpop.f32.mrf.mxu2  ;;  %v2459_v59 = vunpack.c.l.b16 %v2346_v11 }
  0xcf   : > { %v982_v50 = vpop.f32.mrf.mxu3 }
  0xd0   : > { %v9764_v51 = vadd.f32 %v982_v50, %v572_v48  ;;  %v534_v15 = vpop.f32.mrf.mxu0  ;;  %v2487_v1 = vpack.c.b16 %v2459_v59, %v2458_v57  ;;  %v8471_v59 = vld [vmem:[%s9481_s16 + $0xaa] sm:$0xff] }
  0xd1   : > { %v2351_v13 = vpack.c.bf16 %v8471_v59, %v8471_v59  ;;  %v2466_v59 = vunpack.c.l.b16 %v2353_v43 }
  0xd2   : > { %v944_v53 = vpop.f32.mrf.mxu1 }
  0xd3   : > { %v9766_v54 = vadd.f32 %v944_v53, %v534_v15 }
  0xd6   : > { %v574_v61 = vpop.f32.mrf.mxu2 }
  0xd7   : > { %v984_v62 = vpop.f32.mrf.mxu3 }
  0xd8   : > { %v9771_v63 = vadd.f32 %v984_v62, %v574_v61  ;;  %v537_v0 = vpop.f32.mrf.mxu0  ;;  %v8472_v61 = vld [vmem:[%s9481_s16 + $0xb2] sm:$0xff] }
  0xd9   : > { %v2352_v4 = vpack.c.bf16 %v8472_v61, %v8472_v61 }
  0xda   : > { %v947_v16 = vpop.f32.mrf.mxu1 }
  0xdb   : > { %v9773_v3 = vadd.f32 %v947_v16, %v537_v0  ;;  %1356 = vmatmul.bf16.gmra.mxu2 %v2486_v38  ;;  %2177 = vmatmul.bf16.gmra.mxu0 %v9618_v49 }
  0xdc   : > { %1767 = vmatmul.bf16.gmra.mxu3 %v9616_v45 }
  0xdd   : > { %2587 = vmatmul.bf16.gmra.mxu1 %v2487_v1 }
  0xde   : > { %v577_v6 = vpop.f32.mrf.mxu2 }
  0xdf   : > { %v987_v7 = vpop.f32.mrf.mxu3 }
  0xe0   : > { %v9779_v8 = vadd.f32 %v987_v7, %v577_v6  ;;  %v539_v9 = vpop.f32.mrf.mxu0 }
  0xe2   : > { %v949_v17 = vpop.f32.mrf.mxu1 }
  0xe3   : > { %v9781_v19 = vadd.f32 %v949_v17, %v539_v9  ;;  %v2464_v9 = vunpack.c.l.b16 %v2351_v13 }
  0xe6   : > { %v579_v49 = vpop.f32.mrf.mxu2 }
  0xe7   : > { %v989_v24 = vpop.f32.mrf.mxu3 }
  0xe8   : > { %v9783_v45 = vadd.f32 %v989_v24, %v579_v49  ;;  %v542_v25 = vpop.f32.mrf.mxu0  ;;  %v8313_v24 = vld [vmem:[%s9481_s16 + $0xc0] sm:$0xff] }
  0xea   : > { %v952_v28 = vpop.f32.mrf.mxu1 }
  0xeb   : > { %v9785_v29 = vadd.f32 %v952_v28, %v542_v25  ;;  %1361 = vmatmul.bf16.gmra.mxu2 %v2487_v1  ;;  %2182 = vmatmul.bf16.gmra.mxu0 %v9644_v21  ;;  %v8393_v25 = vld [vmem:[%s9481_s16 + $0xc1] sm:$0xff]  ;;  %v9281_v28 = vld [vmem:[%s11104_s1 + $0x198] sm:$0xff] }
  0xec   : > { %1772 = vmatmul.bf16.gmra.mxu3 %v9642_v18  ;;  %v2350_v18 = vpack.c.bf16 %v8470_v47, %v8470_v47  ;;  %v8474_v47 = vld [vmem:[%s9481_s16 + $0xca] sm:$0xff]  ;;  %2979 = vmatpush.bf16.msra.mxu2 %v9281_v28  ;;  %v8476_v28 = vld [vmem:[%s9481_s16 + $0xe2] sm:$0xff] }
  0xed   : > { %2592 = vmatmul.bf16.gmra.mxu1 %v2488_v27 }
  0xee   : > { %v582_v35 = vpop.f32.mrf.mxu2  ;;  %v2463_v48 = vunpack.c.l.b16 %v2350_v18 }
  0xef   : > { %v992_v37 = vpop.f32.mrf.mxu3 }
  0xf0   : > { %v9797_v38 = vadd.f32 %v992_v37, %v582_v35  ;;  %v544_v21 = vpop.f32.mrf.mxu0  ;;  %v2489_v53 = vpack.c.b16 %v2463_v48, %v2462_v46  ;;  %v1533_v37 = vpack.c.bf16 %v8313_v24, %v8313_v24  ;;  %v2354_v46 = vpack.c.bf16 %v8474_v47, %v8474_v47  ;;  %v8396_v24 = vld [vmem:[%s9481_s16 + $0xe1] sm:$0xff] }
  0xf2   : > { %v954_v41 = vpop.f32.mrf.mxu1  ;;  %v2467_v61 = vunpack.c.l.b16 %v2354_v46 }
  0xf3   : > { %v9799_v42 = vadd.f32 %v954_v41, %v544_v21  ;;  %v1943_v21 = vpack.c.bf16 %v8393_v25, %v8393_v25  ;;  %v1534_v41 = vpack.c.bf16 %v8314_v32, %v8314_v32  ;;  %v8316_v25 = vld [vmem:[%s9481_s16 + $0xe0] sm:$0xff] }
  0xf6   : > { %v584_v50 = vpop.f32.mrf.mxu2 }
  0xf7   : > { %v994_v15 = vpop.f32.mrf.mxu3 }
  0xf8   : > { %v9804_v52 = vadd.f32 %v994_v15, %v584_v50  ;;  %v547_v11 = vpop.f32.mrf.mxu0  ;;  %v2056_v15 = vunpack.c.l.b16 %v1943_v21  ;;  %v1536_v21 = vpack.c.bf16 %v8316_v25, %v8316_v25  ;;  %v8477_v25 = vld [vmem:[%s9481_s16 + $0xf2] sm:$0xff] }
  0xfa   : > { %v957_v55 = vpop.f32.mrf.mxu1 }
  0xfb   : > { %v9806_v57 = vadd.f32 %v957_v55, %v547_v11  ;;  %1366 = vmatmul.bf16.gmra.mxu2 %v2488_v27  ;;  %2187 = vmatmul.bf16.gmra.mxu0 %v9679_v60  ;;  %v2465_v60 = vunpack.c.l.b16 %v2352_v4  ;;  %v8394_v27 = vld [vmem:[%s9481_s16 + $0xc9] sm:$0xff]  ;;  %v1647_v55 = vunpack.c.l.b16 %v1534_v41 }
  0xfc   : > { %1777 = vmatmul.bf16.gmra.mxu3 %v9674_v56 }
  0xfd   : > { %2597 = vmatmul.bf16.gmra.mxu1 %v2489_v53  ;;  %v2490_v22 = vpack.c.b16 %v2465_v60, %v2464_v9  ;;  %v2491_v60 = vpack.c.b16 %v2467_v61, %v2466_v59 }
  0xfe   : > { %v587_v62 = vpop.f32.mrf.mxu2 }
  0xff   : > { %v997_v0 = vpop.f32.mrf.mxu3 }
 0x100   : > { %v9812_v1 = vadd.f32 %v997_v0, %v587_v62  ;;  %v549_v16 = vpop.f32.mrf.mxu0  ;;  %v9297_v62 = vld [vmem:[%s11104_s1 + $0x218] sm:$0xff] }
 0x101   : > { %3799 = vmatpush.bf16.msra.mxu0 %v9297_v62 }
 0x102   : > { %v959_v6 = vpop.f32.mrf.mxu1 }
 0x103   : > { %v9814_v7 = vadd.f32 %v959_v6, %v549_v16 }
 0x106   : > { %v589_v10 = vpop.f32.mrf.mxu2 }
 0x107   : > { %v999_v56 = vpop.f32.mrf.mxu3 }
 0x108   : > { %v9816_v14 = vadd.f32 %v999_v56, %v589_v10  ;;  %v552_v17 = vpop.f32.mrf.mxu0 }
 0x10a   : > { %v962_v23 = vpop.f32.mrf.mxu1 }
 0x10b   : > { %v9818_v49 = vadd.f32 %v962_v23, %v552_v17  ;;  %1371 = vmatmul.bf16.gmra.mxu2 %v2489_v53  ;;  %2192 = vmatmul.bf16.gmra.mxu0 %v9711_v36  ;;  %v1646_v53 = vunpack.c.l.b16 %v1533_v37  ;;  %v8315_v17 = vld [vmem:[%s9481_s16 + $0xd8] sm:$0xff] }
 0x10c   : > { %1782 = vmatmul.bf16.gmra.mxu3 %v9709_v33  ;;  %v1944_v33 = vpack.c.bf16 %v8394_v27, %v8394_v27  ;;  %v8395_v23 = vld [vmem:[%s9481_s16 + $0xd9] sm:$0xff]  ;;  %v1535_v34 = vpack.c.bf16 %v8315_v17, %v8315_v17  ;;  %v8397_v17 = vld [vmem:[%s9481_s16 + $0xf1] sm:$0xff] }
 0x10d   : > { %2602 = vmatmul.bf16.gmra.mxu1 %v2490_v22  ;;  %v1671_v9 = vpack.c.b16 %v1647_v55, %v1646_v53  ;;  %v8475_v27 = vld [vmem:[%s9481_s16 + $0xda] sm:$0xff]  ;;  %v1945_v47 = vpack.c.bf16 %v8395_v23, %v8395_v23 }
 0x10e   : > { %v592_v35 = vpop.f32.mrf.mxu2  ;;  %v2057_v11 = vunpack.c.l.b16 %v1944_v33  ;;  %v2355_v33 = vpack.c.bf16 %v8475_v27, %v8475_v27  ;;  %v8398_v23 = vld [vmem:[%s9481_s16 + $0xf9] sm:$0xff] }
 0x10f   : > { %v1002_v36 = vpop.f32.mrf.mxu3  ;;  %v2058_v43 = vunpack.c.l.b16 %v1945_v47  ;;  %v8478_v27 = vld [vmem:[%s9481_s16 + $0xfa] sm:$0xff]  ;;  %v1948_v47 = vpack.c.bf16 %v8398_v23, %v8398_v23 }
 0x110   : > { %v9834_v39 = vadd.f32 %v1002_v36, %v592_v35  ;;  %v554_v18 = vpop.f32.mrf.mxu0  ;;  %v2081_v13 = vpack.c.b16 %v2057_v11, %v2056_v15  ;;  %v1946_v35 = vpack.c.bf16 %v8396_v24, %v8396_v24  ;;  %v1649_v15 = vunpack.c.l.b16 %v1536_v21  ;;  %v9280_v24 = vld [vmem:[%s11104_s1 + $0x190] sm:$0xff] }
 0x111   : > { %v2468_v11 = vunpack.c.l.b16 %v2355_v33  ;;  %2980 = vmatpush.bf16.msra.mxu2 %v9280_v24  ;;  %v2357_v33 = vpack.c.bf16 %v8477_v25, %v8477_v25 }
 0x112   : > { %v964_v48 = vpop.f32.mrf.mxu1  ;;  %v2059_v46 = vunpack.c.l.b16 %v1946_v35 }
 0x113   : > { %v9836_v50 = vadd.f32 %v964_v48, %v554_v18  ;;  %v1648_v48 = vunpack.c.l.b16 %v1535_v34  ;;  %v1947_v34 = vpack.c.bf16 %v8397_v17, %v8397_v17 }
 0x114   : > { %v2082_v61 = vpack.c.b16 %v2059_v46, %v2058_v43 }
 0x116   : > { %v594_v0 = vpop.f32.mrf.mxu2 }
 0x117   : > { %v1004_v16 = vpop.f32.mrf.mxu3 }
 0x118   : > { %v9841_v4 = vadd.f32 %v1004_v16, %v594_v0  ;;  %v557_v6 = vpop.f32.mrf.mxu0  ;;  %v1672_v16 = vpack.c.b16 %v1649_v15, %v1648_v48  ;;  %v2060_v48 = vunpack.c.l.b16 %v1947_v34  ;;  %v2061_v15 = vunpack.c.l.b16 %v1948_v47  ;;  %v8479_v34 = vld [vmem:[%s9481_s16 + $0x10a] sm:$0xff]  ;;  %v8480_v47 = vld [vmem:[%s9481_s16 + $0x112] sm:$0xff] }
 0x11a   : > { %v967_v10 = vpop.f32.mrf.mxu1 }
 0x11b   : > { %v9843_v56 = vadd.f32 %v967_v10, %v557_v6  ;;  %1376 = vmatmul.bf16.gmra.mxu2 %v2490_v22  ;;  %2197 = vmatmul.bf16.gmra.mxu0 %v2081_v13  ;;  %v2356_v22 = vpack.c.bf16 %v8476_v28, %v8476_v28  ;;  %v8318_v10 = vld [vmem:[%s9481_s16 + $0xf8] sm:$0xff]  ;;  %v9288_v28 = vld [vmem:[%s11104_s1 + $0x1d0] sm:$0xff] }
 0x11c   : > { %1787 = vmatmul.bf16.gmra.mxu3 %v1671_v9  ;;  %v8317_v9 = vld [vmem:[%s9481_s16 + $0xf0] sm:$0xff]  ;;  %v1538_v21 = vpack.c.bf16 %v8318_v10, %v8318_v10 }
 0x11d   : > { %2607 = vmatmul.bf16.gmra.mxu1 %v2491_v60  ;;  %v2469_v53 = vunpack.c.l.b16 %v2356_v22  ;;  %3390 = vmatpush.bf16.msra.mxu3 %v9288_v28  ;;  %v2358_v22 = vpack.c.bf16 %v8478_v27, %v8478_v27  ;;  %v8319_v28 = vld [vmem:[%s9481_s16 + $0x108] sm:$0xff] }
 0x11e   : > { %v597_v30 = vpop.f32.mrf.mxu2 }
 0x11f   : > { %v1007_v32 = vpop.f32.mrf.mxu3  ;;  %v2492_v13 = vpack.c.b16 %v2469_v53, %v2468_v11  ;;  %v1651_v53 = vunpack.c.l.b16 %v1538_v21 }
 0x120   : > { %v9851_v36 = vadd.f32 %v1007_v32, %v597_v30  ;;  %v559_v37 = vpop.f32.mrf.mxu0 }
 0x122   : > { %v969_v18 = vpop.f32.mrf.mxu1 }
 0x123   : > { %v9853_v41 = vadd.f32 %v969_v18, %v559_v37  ;;  %v1537_v37 = vpack.c.bf16 %v8317_v9, %v8317_v9 }
 0x125   : > { %v1650_v11 = vunpack.c.l.b16 %v1537_v37 }
 0x126   : > { %v599_v55 = vpop.f32.mrf.mxu2 }
 0x127   : > { %v1009_v59 = vpop.f32.mrf.mxu3  ;;  %v1673_v23 = vpack.c.b16 %v1651_v53, %v1650_v11 }
 0x128   : > { %v9855_v62 = vadd.f32 %v1009_v59, %v599_v55  ;;  %v2163_v0 = vpop.f32.mrf.mxu0  ;;  %v2470_v55 = vunpack.c.l.b16 %v2357_v33  ;;  %v2471_v59 = vunpack.c.l.b16 %v2358_v22 }
 0x12a   : > { %v2573_v6 = vpop.f32.mrf.mxu1 }
 0x12b   : > { %1381 = vmatmul.bf16.gmra.mxu2 %v2491_v60  ;;  %2202 = vmatmul.bf16.gmra.mxu0 %v2082_v61 }
 0x12c   : > { %1792 = vmatmul.bf16.gmra.mxu3 %v1672_v16 }
 0x12d   : > { %2612 = vmatmul.bf16.gmra.mxu1 %v2492_v13 }
 0x12e   : > { %v1342_v30 = vpop.f32.mrf.mxu2 }
 0x12f   : > { %v1422_v60 = vadd.f32 %v1342_v30, %v9719_v58  ;;  %v1753_v32 = vpop.f32.mrf.mxu3  ;;  %v9296_v58 = vld [vmem:[%s11104_s1 + $0x210] sm:$0xff] }
 0x130   : > { %v2165_v35 = vpop.f32.mrf.mxu0  ;;  %3800 = vmatpush.bf16.msra.mxu0 %v9296_v58  ;;  %v8399_v30 = vld [vmem:[%s9481_s16 + $0x109] sm:$0xff] }
 0x131   : > { %v1833_v18 = vadd.f32 %v1753_v32, %v1422_v60  ;;  %v8320_v32 = vld [vmem:[%s9481_s16 + $0x110] sm:$0xff]  ;;  %v1949_v22 = vpack.c.bf16 %v8399_v30, %v8399_v30 }
 0x132   : > { %v2575_v43 = vpop.f32.mrf.mxu1 }
 0x133   : > { %v2243_v46 = vadd.f32 %v2163_v0, %v1833_v18  ;;  %v2083_v0 = vpack.c.b16 %v2061_v15, %v2060_v48  ;;  %v1540_v48 = vpack.c.bf16 %v8320_v32, %v8320_v32  ;;  %v2360_v15 = vpack.c.bf16 %v8480_v47, %v8480_v47 }
 0x135   : > { %v9870_v61 = vadd.f32 %v2573_v6, %v2243_v46  ;;  %v2493_v6 = vpack.c.b16 %v2471_v59, %v2470_v55  ;;  %v2062_v59 = vunpack.c.l.b16 %v1949_v22 }
 0x136   : > { %v1344_v16 = vpop.f32.mrf.mxu2 }
 0x137   : > { %v1423_v9 = vadd.f32 %v1344_v16, %v9733_v5  ;;  %v1755_v10 = vpop.f32.mrf.mxu3  ;;  %v8400_v5 = vld [vmem:[%s9481_s16 + $0x111] sm:$0xff] }
 0x138   : > { %v2168_v17 = vpop.f32.mrf.mxu0  ;;  %v1950_v18 = vpack.c.bf16 %v8400_v5, %v8400_v5 }
 0x139   : > { %v1834_v24 = vadd.f32 %v1755_v10, %v1423_v9  ;;  %v2473_v10 = vunpack.c.l.b16 %v2360_v15 }
 0x13a   : > { %v2578_v25 = vpop.f32.mrf.mxu1  ;;  %v2063_v58 = vunpack.c.l.b16 %v1950_v18  ;;  %v8481_v18 = vld [vmem:[%s9481_s16 + $0x122] sm:$0xff] }
 0x13b   : > { %1386 = vmatmul.bf16.gmra.mxu2 %v2492_v13  ;;  %2207 = vmatmul.bf16.gmra.mxu0 %v2083_v0  ;;  %v2244_v27 = vadd.f32 %v2165_v35, %v1834_v24  ;;  %v1539_v13 = vpack.c.bf16 %v8319_v28, %v8319_v28  ;;  %v2359_v35 = vpack.c.bf16 %v8479_v34, %v8479_v34 }
 0x13c   : > { %1797 = vmatmul.bf16.gmra.mxu3 %v1673_v23  ;;  %v2084_v28 = vpack.c.b16 %v2063_v58, %v2062_v59  ;;  %v2361_v58 = vpack.c.bf16 %v8481_v18, %v8481_v18 }
 0x13d   : > { %2617 = vmatmul.bf16.gmra.mxu1 %v2493_v6  ;;  %v9879_v60 = vadd.f32 %v2575_v43, %v2244_v27  ;;  %v9309_v43 = vld [vmem:[%s11106_s3 + $0x38] sm:$0xff]  ;;  %v1652_v16 = vunpack.c.l.b16 %v1539_v13  ;;  %v2472_v9 = vunpack.c.l.b16 %v2359_v35  ;;  %v8482_v13 = vld [vmem:[%s9481_s16 + $0x12a] sm:$0xff] }
 0x13e   : > { %v1347_v37 = vpop.f32.mrf.mxu2  ;;  %4510 = vmatpush.bf16.msra.mxu1 %v9309_v43 }
 0x13f   : > { %v1424_v21 = vadd.f32 %v1347_v37, %v9740_v20  ;;  %v1758_v33 = vpop.f32.mrf.mxu3  ;;  %v1653_v20 = vunpack.c.l.b16 %v1540_v48  ;;  %v2494_v5 = vpack.c.b16 %v2473_v10, %v2472_v9  ;;  %v8321_v37 = vld [vmem:[%s9481_s16 + $0x120] sm:$0xff] }
 0x140   : > { %v2170_v46 = vpop.f32.mrf.mxu0 }
 0x141   : > { %v1835_v11 = vadd.f32 %v1758_v33, %v1424_v21  ;;  %v8401_v21 = vld [vmem:[%s9481_s16 + $0x121] sm:$0xff]  ;;  %v8402_v33 = vld [vmem:[%s9481_s16 + $0x129] sm:$0xff] }
 0x142   : > { %v2580_v53 = vpop.f32.mrf.mxu1  ;;  %v1951_v15 = vpack.c.bf16 %v8401_v21, %v8401_v21 }
 0x143   : > { %v2245_v55 = vadd.f32 %v2168_v17, %v1835_v11  ;;  %v1674_v17 = vpack.c.b16 %v1653_v20, %v1652_v16  ;;  %v1952_v11 = vpack.c.bf16 %v8402_v33, %v8402_v33 }
 0x144   : > { %v2064_v10 = vunpack.c.l.b16 %v1951_v15  ;;  %v8483_v15 = vld [vmem:[%s9481_s16 + $0x13a] sm:$0xff] }
 0x145   : > { %v9888_v0 = vadd.f32 %v2578_v25, %v2245_v55  ;;  %v8322_v25 = vld [vmem:[%s9481_s16 + $0x128] sm:$0xff]  ;;  %v1541_v55 = vpack.c.bf16 %v8321_v37, %v8321_v37 }
 0x146   : > { %v1349_v23 = vpop.f32.mrf.mxu2  ;;  %v1542_v59 = vpack.c.bf16 %v8322_v25, %v8322_v25 }
 0x147   : > { %v1425_v24 = vadd.f32 %v1349_v23, %v9748_v31  ;;  %v1760_v27 = vpop.f32.mrf.mxu3  ;;  %v9279_v31 = vld [vmem:[%s11104_s1 + $0x188] sm:$0xff]  ;;  %v2065_v23 = vunpack.c.l.b16 %v1952_v11 }
 0x148   : > { %v2173_v30 = vpop.f32.mrf.mxu0  ;;  %2981 = vmatpush.bf16.msra.mxu2 %v9279_v31  ;;  %v8484_v11 = vld [vmem:[%s9481_s16 + $0x142] sm:$0xff] }
 0x149   : > { %v1836_v32 = vadd.f32 %v1760_v27, %v1425_v24  ;;  %v1654_v24 = vunpack.c.l.b16 %v1541_v55  ;;  %v1655_v27 = vunpack.c.l.b16 %v1542_v59 }
 0x14a   : > { %v2583_v34 = vpop.f32.mrf.mxu1 }
 0x14b   : > { %1391 = vmatmul.bf16.gmra.mxu2 %v2493_v6  ;;  %2212 = vmatmul.bf16.gmra.mxu0 %v2084_v28  ;;  %v2246_v47 = vadd.f32 %v2170_v46, %v1836_v32  ;;  %v9287_v6 = vld [vmem:[%s11104_s1 + $0x1c8] sm:$0xff]  ;;  %v2474_v28 = vunpack.c.l.b16 %v2361_v58  ;;  %v1675_v33 = vpack.c.b16 %v1655_v27, %v1654_v24 }
 0x14c   : > { %1802 = vmatmul.bf16.gmra.mxu3 %v1674_v17 }
 0x14d   : > { %2622 = vmatmul.bf16.gmra.mxu1 %v2494_v5  ;;  %v9898_v22 = vadd.f32 %v2580_v53, %v2246_v47  ;;  %3391 = vmatpush.bf16.msra.mxu3 %v9287_v6  ;;  %v2362_v53 = vpack.c.bf16 %v8482_v13, %v8482_v13  ;;  %v8323_v6 = vld [vmem:[%s9481_s16 + $0x138] sm:$0xff] }
 0x14e   : > { %v1352_v48 = vpop.f32.mrf.mxu2 }
 0x14f   : > { %v1426_v46 = vadd.f32 %v1352_v48, %v9752_v40  ;;  %v1763_v35 = vpop.f32.mrf.mxu3  ;;  %v2475_v17 = vunpack.c.l.b16 %v2362_v53  ;;  %v9295_v40 = vld [vmem:[%s11104_s1 + $0x208] sm:$0xff]  ;;  %v8403_v48 = vld [vmem:[%s9481_s16 + $0x139] sm:$0xff] }
 0x150   : > { %v2175_v43 = vpop.f32.mrf.mxu0  ;;  %3801 = vmatpush.bf16.msra.mxu0 %v9295_v40  ;;  %v1953_v53 = vpack.c.bf16 %v8403_v48, %v8403_v48 }
 0x151   : > { %v1837_v16 = vadd.f32 %v1763_v35, %v1426_v46  ;;  %v8324_v35 = vld [vmem:[%s9481_s16 + $0x140] sm:$0xff] }
 0x152   : > { %v2585_v20 = vpop.f32.mrf.mxu1 }
 0x153   : > { %v2247_v9 = vadd.f32 %v2173_v30, %v1837_v16  ;;  %v2085_v30 = vpack.c.b16 %v2065_v23, %v2064_v10  ;;  %v1544_v10 = vpack.c.bf16 %v8324_v35, %v8324_v35  ;;  %v2364_v23 = vpack.c.bf16 %v8484_v11, %v8484_v11 }
 0x155   : > { %v9906_v32 = vadd.f32 %v2583_v34, %v2247_v9  ;;  %v2495_v34 = vpack.c.b16 %v2475_v17, %v2474_v28  ;;  %v2066_v17 = vunpack.c.l.b16 %v1953_v53 }
 0x156   : > { %v1354_v47 = vpop.f32.mrf.mxu2 }
 0x157   : > { %v1427_v37 = vadd.f32 %v1354_v47, %v9766_v54  ;;  %v1765_v25 = vpop.f32.mrf.mxu3  ;;  %v8404_v54 = vld [vmem:[%s9481_s16 + $0x141] sm:$0xff] }
 0x158   : > { %v2178_v21 = vpop.f32.mrf.mxu0  ;;  %v1954_v16 = vpack.c.bf16 %v8404_v54, %v8404_v54 }
 0x159   : > { %v1838_v31 = vadd.f32 %v1765_v25, %v1427_v37  ;;  %v2477_v25 = vunpack.c.l.b16 %v2364_v23 }
 0x15a   : > { %v2588_v18 = vpop.f32.mrf.mxu1  ;;  %v2067_v40 = vunpack.c.l.b16 %v1954_v16  ;;  %v8485_v16 = vld [vmem:[%s9481_s16 + $0x152] sm:$0xff] }
 0x15b   : > { %1396 = vmatmul.bf16.gmra.mxu2 %v2494_v5  ;;  %2217 = vmatmul.bf16.gmra.mxu0 %v2085_v30  ;;  %v2248_v13 = vadd.f32 %v2175_v43, %v1838_v31  ;;  %v1543_v5 = vpack.c.bf16 %v8323_v6, %v8323_v6  ;;  %v2363_v43 = vpack.c.bf16 %v8483_v15, %v8483_v15 }
 0x15c   : > { %1807 = vmatmul.bf16.gmra.mxu3 %v1675_v33  ;;  %v2086_v6 = vpack.c.b16 %v2067_v40, %v2066_v17  ;;  %v2365_v40 = vpack.c.bf16 %v8485_v16, %v8485_v16 }
 0x15d   : > { %2627 = vmatmul.bf16.gmra.mxu1 %v2495_v34  ;;  %v9915_v46 = vadd.f32 %v2585_v20, %v2248_v13  ;;  %v9308_v20 = vld [vmem:[%s11106_s3 + $0x30] sm:$0xff]  ;;  %v1656_v47 = vunpack.c.l.b16 %v1543_v5  ;;  %v2476_v37 = vunpack.c.l.b16 %v2363_v43  ;;  %v8486_v5 = vld [vmem:[%s9481_s16 + $0x15a] sm:$0xff] }
 0x15e   : > { %v1357_v55 = vpop.f32.mrf.mxu2  ;;  %4511 = vmatpush.bf16.msra.mxu1 %v9308_v20 }
 0x15f   : > { %v1428_v59 = vadd.f32 %v1357_v55, %v9773_v3  ;;  %v1768_v58 = vpop.f32.mrf.mxu3  ;;  %v1657_v3 = vunpack.c.l.b16 %v1544_v10  ;;  %v2496_v54 = vpack.c.b16 %v2477_v25, %v2476_v37  ;;  %v8325_v55 = vld [vmem:[%s9481_s16 + $0x150] sm:$0xff] }
 0x160   : > { %v2180_v9 = vpop.f32.mrf.mxu0 }
 0x161   : > { %v1839_v24 = vadd.f32 %v1768_v58, %v1428_v59  ;;  %v8405_v59 = vld [vmem:[%s9481_s16 + $0x151] sm:$0xff]  ;;  %v8406_v58 = vld [vmem:[%s9481_s16 + $0x159] sm:$0xff] }
 0x162   : > { %v2590_v27 = vpop.f32.mrf.mxu1  ;;  %v1955_v23 = vpack.c.bf16 %v8405_v59, %v8405_v59 }
 0x163   : > { %v2249_v28 = vadd.f32 %v2178_v21, %v1839_v24  ;;  %v1676_v21 = vpack.c.b16 %v1657_v3, %v1656_v47  ;;  %v1956_v24 = vpack.c.bf16 %v8406_v58, %v8406_v58 }
 0x164   : > { %v2068_v25 = vunpack.c.l.b16 %v1955_v23  ;;  %v8488_v23 = vld [vmem:[%s9481_s16 + $0x172] sm:$0xff] }
 0x165   : > { %v9924_v30 = vadd.f32 %v2588_v18, %v2249_v28  ;;  %v8326_v18 = vld [vmem:[%s9481_s16 + $0x158] sm:$0xff]  ;;  %v1545_v28 = vpack.c.bf16 %v8325_v55, %v8325_v55 }
 0x166   : > { %v1359_v33 = vpop.f32.mrf.mxu2  ;;  %v1546_v17 = vpack.c.bf16 %v8326_v18, %v8326_v18 }
 0x167   : > { %v1429_v31 = vadd.f32 %v1359_v33, %v9781_v19  ;;  %v1770_v13 = vpop.f32.mrf.mxu3  ;;  %v9278_v19 = vld [vmem:[%s11104_s1 + $0x180] sm:$0xff]  ;;  %v2069_v33 = vunpack.c.l.b16 %v1956_v24 }
 0x168   : > { %v2183_v48 = vpop.f32.mrf.mxu0  ;;  %2982 = vmatpush.bf16.msra.mxu2 %v9278_v19 }
 0x169   : > { %v1840_v35 = vadd.f32 %v1770_v13, %v1429_v31  ;;  %v1658_v31 = vunpack.c.l.b16 %v1545_v28  ;;  %v1659_v13 = vunpack.c.l.b16 %v1546_v17 }
 0x16a   : > { %v2593_v15 = vpop.f32.mrf.mxu1 }
 0x16b   : > { %1401 = vmatmul.bf16.gmra.mxu2 %v2495_v34  ;;  %2222 = vmatmul.bf16.gmra.mxu0 %v2086_v6  ;;  %v2250_v11 = vadd.f32 %v2180_v9, %v1840_v35  ;;  %v9286_v34 = vld [vmem:[%s11104_s1 + $0x1c0] sm:$0xff]  ;;  %v2478_v6 = vunpack.c.l.b16 %v2365_v40  ;;  %v1677_v58 = vpack.c.b16 %v1659_v13, %v1658_v31  ;;  %v9307_v13 = vld [vmem:[%s11106_s3 + $0x28] sm:$0xff] }
 0x16c   : > { %1812 = vmatmul.bf16.gmra.mxu3 %v1676_v21  ;;  %v9294_v35 = vld [vmem:[%s11104_s1 + $0x200] sm:$0xff]  ;;  %4512 = vmatpush.bf16.msra.mxu1 %v9307_v13 }
 0x16d   : > { %2632 = vmatmul.bf16.gmra.mxu1 %v2496_v54  ;;  %v9934_v53 = vadd.f32 %v2590_v27, %v2250_v11  ;;  %3392 = vmatpush.bf16.msra.mxu3 %v9286_v34  ;;  %v2366_v27 = vpack.c.bf16 %v8486_v5, %v8486_v5  ;;  %v8327_v34 = vld [vmem:[%s9481_s16 + $0x168] sm:$0xff] }
 0x16e   : > { %v1362_v10 = vpop.f32.mrf.mxu2  ;;  %3802 = vmatpush.bf16.msra.mxu0 %v9294_v35 }
 0x16f   : > { %v1430_v9 = vadd.f32 %v1362_v10, %v9785_v29  ;;  %v1773_v43 = vpop.f32.mrf.mxu3  ;;  %v2479_v21 = vunpack.c.l.b16 %v2366_v27  ;;  %v8408_v10 = vld [vmem:[%s9481_s16 + $0x171] sm:$0xff] }
 0x170   : > { %v2185_v20 = vpop.f32.mrf.mxu0  ;;  %v1958_v27 = vpack.c.bf16 %v8408_v10, %v8408_v10 }
 0x171   : > { %v1841_v47 = vadd.f32 %v1773_v43, %v1430_v9  ;;  %v8328_v9 = vld [vmem:[%s9481_s16 + $0x170] sm:$0xff] }
 0x172   : > { %v9942_v3 = vpop.f32.mrf.mxu1  ;;  %v8487_v43 = vld [vmem:[%s9481_s16 + $0x16a] sm:$0xff]  ;;  %v2071_v35 = vunpack.c.l.b16 %v1958_v27 }
 0x173   : > { %v2251_v37 = vadd.f32 %v2183_v48, %v1841_v47  ;;  %v2087_v48 = vpack.c.b16 %v2069_v33, %v2068_v25  ;;  %v2367_v25 = vpack.c.bf16 %v8487_v43, %v8487_v43  ;;  %v8490_v27 = vld [vmem:[%s9481_s16 + $0x18a] sm:$0xff] }
 0x175   : > { %v9944_v29 = vadd.f32 %v2593_v15, %v2251_v37  ;;  %v2497_v15 = vpack.c.b16 %v2479_v21, %v2478_v6  ;;  %v1547_v37 = vpack.c.bf16 %v8327_v34, %v8327_v34 }
 0x176   : > { %v1364_v11 = vpop.f32.mrf.mxu2 }
 0x177   : > { %v1431_v55 = vadd.f32 %v1364_v11, %v9799_v42  ;;  %v1775_v18 = vpop.f32.mrf.mxu3  ;;  %v8407_v42 = vld [vmem:[%s9481_s16 + $0x169] sm:$0xff] }
 0x178   : > { %v2188_v59 = vpop.f32.mrf.mxu0  ;;  %v1957_v40 = vpack.c.bf16 %v8407_v42, %v8407_v42 }
 0x179   : > { %v1842_v19 = vadd.f32 %v1775_v18, %v1431_v55  ;;  %v2480_v55 = vunpack.c.l.b16 %v2367_v25 }
 0x17a   : > { %v2598_v16 = vpop.f32.mrf.mxu1  ;;  %v2070_v21 = vunpack.c.l.b16 %v1957_v40  ;;  %v8489_v40 = vld [vmem:[%s9481_s16 + $0x182] sm:$0xff] }
 0x17b   : > { %1406 = vmatmul.bf16.gmra.mxu2 %v2496_v54  ;;  %2227 = vmatmul.bf16.gmra.mxu0 %v2087_v48  ;;  %v9950_v5 = vadd.f32 %v2185_v20, %v1842_v19  ;;  %v1548_v54 = vpack.c.bf16 %v8328_v9, %v8328_v9  ;;  %v2368_v20 = vpack.c.bf16 %v8488_v23, %v8488_v23 }
 0x17c   : > { %1817 = vmatmul.bf16.gmra.mxu3 %v1677_v58  ;;  %v2088_v42 = vpack.c.b16 %v2071_v35, %v2070_v21  ;;  %v2369_v21 = vpack.c.bf16 %v8489_v40, %v8489_v40 }
 0x17d   : > { %2637 = vmatmul.bf16.gmra.mxu1 %v2497_v15  ;;  %v1661_v11 = vunpack.c.l.b16 %v1548_v54  ;;  %v2481_v18 = vunpack.c.l.b16 %v2368_v20 }
 0x17e   : > { %v1367_v24 = vpop.f32.mrf.mxu2 }
 0x17f   : > { %v1432_v28 = vadd.f32 %v1367_v24, %v9806_v57  ;;  %v1778_v17 = vpop.f32.mrf.mxu3  ;;  %v1660_v57 = vunpack.c.l.b16 %v1547_v37  ;;  %v2498_v9 = vpack.c.b16 %v2481_v18, %v2480_v55 }
 0x180   : > { %v2190_v47 = vpop.f32.mrf.mxu0 }
 0x181   : > { %v1843_v33 = vadd.f32 %v1778_v17, %v1432_v28  ;;  %v1678_v10 = vpack.c.b16 %v1661_v11, %v1660_v57  ;;  %v8409_v28 = vld [vmem:[%s9481_s16 + $0x181] sm:$0xff]  ;;  %v8410_v17 = vld [vmem:[%s9481_s16 + $0x189] sm:$0xff] }
 0x182   : > { %v9959_v31 = vpop.f32.mrf.mxu1  ;;  %v1959_v20 = vpack.c.bf16 %v8409_v28, %v8409_v28 }
 0x183   : > { %v2253_v6 = vadd.f32 %v2188_v59, %v1843_v33  ;;  %v1960_v33 = vpack.c.bf16 %v8410_v17, %v8410_v17 }
 0x184   : > { %v2072_v55 = vunpack.c.l.b16 %v1959_v20  ;;  %v8619_v20 = vld [vmem:[%s9481_s16 + $0x31] sm:$0xff] }
 0x185   : > { %v9964_v48 = vadd.f32 %v2598_v16, %v2253_v6  ;;  %v8329_v16 = vld [vmem:[%s9481_s16 + $0x180] sm:$0xff]  ;;  %v2073_v18 = vunpack.c.l.b16 %v1960_v33 }
 0x186   : > { %v1369_v58 = vpop.f32.mrf.mxu2  ;;  %v1549_v6 = vpack.c.bf16 %v8329_v16, %v8329_v16  ;;  %v8620_v33 = vld [vmem:[%s9481_s16 + $0x39] sm:$0xff] }
 0x187   : > { %v1433_v19 = vadd.f32 %v1369_v58, %v9814_v7  ;;  %v1780_v34 = vpop.f32.mrf.mxu3  ;;  %v8330_v7 = vld [vmem:[%s9481_s16 + $0x188] sm:$0xff]  ;;  %v2089_v28 = vpack.c.b16 %v2073_v18, %v2072_v55  ;;  %v3160_v18 = vpack.c.bf16 %v8619_v20, %v8619_v20 }
 0x188   : > { %v2193_v59 = vpop.f32.mrf.mxu0  ;;  %v1662_v58 = vunpack.c.l.b16 %v1549_v6 }
 0x189   : > { %v1844_v43 = vadd.f32 %v1780_v34, %v1433_v19  ;;  %v2482_v34 = vunpack.c.l.b16 %v2369_v21 }
 0x18a   : > { %v2603_v23 = vpop.f32.mrf.mxu1 }
 0x18b   : > { %1411 = vmatmul.bf16.gmra.mxu2 %v2497_v15  ;;  %2232 = vmatmul.bf16.gmra.mxu0 %v2088_v42  ;;  %v9967_v24 = vadd.f32 %v2190_v47, %v1844_v43  ;;  %v1550_v15 = vpack.c.bf16 %v8330_v7, %v8330_v7  ;;  %v2370_v47 = vpack.c.bf16 %v8490_v27, %v8490_v27 }
 0x18c   : > { %1822 = vmatmul.bf16.gmra.mxu3 %v1678_v10 }
 0x18d   : > { %2642 = vmatmul.bf16.gmra.mxu1 %v2498_v9  ;;  %v1663_v19 = vunpack.c.l.b16 %v1550_v15  ;;  %v2483_v42 = vunpack.c.l.b16 %v2370_v47 }
 0x18e   : > { %v1372_v37 = vpop.f32.mrf.mxu2 }
 0x18f   : > { %v1434_v54 = vadd.f32 %v1372_v37, %v9818_v49  ;;  %v1783_v25 = vpop.f32.mrf.mxu3  ;;  %v1679_v17 = vpack.c.b16 %v1663_v19, %v1662_v58  ;;  %v2499_v7 = vpack.c.b16 %v2483_v42, %v2482_v34  ;;  %v9306_v34 = vld [vmem:[%s11106_s3 + $0x20] sm:$0xff] }
 0x190   : > { %v2195_v13 = vpop.f32.mrf.mxu0  ;;  %4513 = vmatpush.bf16.msra.mxu1 %v9306_v34 }
 0x191   : > { %v1845_v35 = vadd.f32 %v1783_v25, %v1434_v54  ;;  %v8540_v54 = vld [vmem:[%s9481_s16 + $0x38] sm:$0xff] }
 0x192   : > { %v9976_v57 = vpop.f32.mrf.mxu1  ;;  %v8699_v25 = vld [vmem:[%s9481_s16 + $0x32] sm:$0xff] }
 0x193   : > { %v2255_v11 = vadd.f32 %v2193_v59, %v1845_v35  ;;  %v2751_v35 = vpack.c.bf16 %v8540_v54, %v8540_v54 }
 0x195   : > { %v9978_v49 = vadd.f32 %v2603_v23, %v2255_v11  ;;  %v8539_v23 = vld [vmem:[%s9481_s16 + $0x30] sm:$0xff]  ;;  %v3570_v11 = vpack.c.bf16 %v8699_v25, %v8699_v25 }
 0x196   : > { %v1374_v10 = vpop.f32.mrf.mxu2  ;;  %v2750_v15 = vpack.c.bf16 %v8539_v23, %v8539_v23 }
 0x197   : > { %v1435_v43 = vadd.f32 %v1374_v10, %v9836_v50  ;;  %v1785_v16 = vpop.f32.mrf.mxu3  ;;  %v8700_v50 = vld [vmem:[%s9481_s16 + $0x3a] sm:$0xff] }
 0x198   : > { %v2198_v59 = vpop.f32.mrf.mxu0  ;;  %v3571_v55 = vpack.c.bf16 %v8700_v50, %v8700_v50  ;;  %v2863_v42 = vunpack.c.l.b16 %v2750_v15 }
 0x199   : > { %v1846_v40 = vadd.f32 %v1785_v16, %v1435_v43  ;;  %v2864_v43 = vunpack.c.l.b16 %v2751_v35  ;;  %v3683_v16 = vunpack.c.l.b16 %v3570_v11  ;;  %v8702_v35 = vld [vmem:[%s9481_s16 + $0x52] sm:$0xff]  ;;  %v8621_v11 = vld [vmem:[%s9481_s16 + $0x49] sm:$0xff] }
 0x19a   : > { %v2608_v27 = vpop.f32.mrf.mxu1 }
 0x19b   : > { %1416 = vmatmul.bf16.gmra.mxu2 %v2498_v9  ;;  %2237 = vmatmul.bf16.gmra.mxu0 %v2089_v28  ;;  %v9981_v37 = vadd.f32 %v2195_v13, %v1846_v40  ;;  %v3161_v13 = vpack.c.bf16 %v8620_v33, %v8620_v33  ;;  %v3684_v28 = vunpack.c.l.b16 %v3571_v55  ;;  %v2895_v25 = vpack.c.b16 %v2864_v43, %v2863_v42 }
 0x19c   : > { %1827 = vmatmul.bf16.gmra.mxu3 %v1679_v17 }
 0x19d   : > { %2647 = vmatmul.bf16.gmra.mxu1 %v2499_v7  ;;  %v3274_v17 = vunpack.c.l.b16 %v3161_v13 }
 0x19e   : > { %v1377_v6 = vpop.f32.mrf.mxu2 }
 0x19f   : > { %v1436_v21 = vadd.f32 %v1377_v6, %v9843_v56  ;;  %v1788_v47 = vpop.f32.mrf.mxu3  ;;  %v3273_v56 = vunpack.c.l.b16 %v3160_v18 }
 0x1a0   : > { %v2200_v9 = vpop.f32.mrf.mxu0 }
 0x1a1   : > { %v1847_v58 = vadd.f32 %v1788_v47, %v1436_v21  ;;  %v3305_v20 = vpack.c.b16 %v3274_v17, %v3273_v56  ;;  %v8542_v21 = vld [vmem:[%s9481_s16 + $0x50] sm:$0xff] }
 0x1a2   : > { %v9990_v19 = vpop.f32.mrf.mxu1  ;;  %v8701_v47 = vld [vmem:[%s9481_s16 + $0x4a] sm:$0xff]  ;;  %v2753_v34 = vpack.c.bf16 %v8542_v21, %v8542_v21 }
 0x1a3   : > { %v2257_v10 = vadd.f32 %v2198_v59, %v1847_v58  ;;  %v3715_v59 = vpack.c.b16 %v3684_v28, %v3683_v16  ;;  %v3572_v42 = vpack.c.bf16 %v8701_v47, %v8701_v47  ;;  %v3162_v16 = vpack.c.bf16 %v8621_v11, %v8621_v11 }
 0x1a5   : > { %v9995_v7 = vadd.f32 %v2608_v27, %v2257_v10  ;;  %v8541_v27 = vld [vmem:[%s9481_s16 + $0x48] sm:$0xff]  ;;  %v3573_v10 = vpack.c.bf16 %v8702_v35, %v8702_v35 }
 0x1a6   : > { %v1379_v40 = vpop.f32.mrf.mxu2  ;;  %v2752_v18 = vpack.c.bf16 %v8541_v27, %v8541_v27 }
 0x1a7   : > { %v1437_v23 = vadd.f32 %v1379_v40, %v9853_v41  ;;  %v1790_v54 = vpop.f32.mrf.mxu3  ;;  %v8622_v41 = vld [vmem:[%s9481_s16 + $0x51] sm:$0xff] }
 0x1a8   : > { %v2203_v50 = vpop.f32.mrf.mxu0  ;;  %v3163_v28 = vpack.c.bf16 %v8622_v41, %v8622_v41  ;;  %v2865_v17 = vunpack.c.l.b16 %v2752_v18 }
 0x1a9   : > { %v1848_v33 = vadd.f32 %v1790_v54, %v1437_v23  ;;  %v2866_v23 = vunpack.c.l.b16 %v2753_v34  ;;  %v3685_v54 = vunpack.c.l.b16 %v3572_v42  ;;  %v8704_v34 = vld [vmem:[%s9481_s16 + $0x6a] sm:$0xff]  ;;  %v8623_v42 = vld [vmem:[%s9481_s16 + $0x61] sm:$0xff] }
 0x1aa   : > { %v2613_v6 = vpop.f32.mrf.mxu1 }
 0x1ab   : > { %2983 = vmatmul.bf16.vlgmr.msra.gmra.mxu2 %v2895_v25  ;;  %3803 = vmatmul.bf16.vlgmr.msra.gmra.mxu0 %v3715_v59  ;;  %v9998_v15 = vadd.f32 %v2200_v9, %v1848_v33  ;;  %v3686_v25 = vunpack.c.l.b16 %v3573_v10  ;;  %v3275_v59 = vunpack.c.l.b16 %v3162_v16  ;;  %v2896_v47 = vpack.c.b16 %v2866_v23, %v2865_v17 }
 0x1ac   : > { %3393 = vmatmul.bf16.vlgmr.msra.gmra.mxu3 %v3305_v20  ;;  %v3276_v20 = vunpack.c.l.b16 %v3163_v28  ;;  %v3575_v23 = vpack.c.bf16 %v8704_v34, %v8704_v34 }
 0x1ad   : > { %v3716_v35 = vpack.c.b16 %v3686_v25, %v3685_v54  ;;  %v3164_v25 = vpack.c.bf16 %v8623_v42, %v8623_v42 }
 0x1ae   : > { %v1382_v55 = vpop.f32.mrf.mxu2  ;;  %v3306_v11 = vpack.c.b16 %v3276_v20, %v3275_v59 }
 0x1af   : > { %v1438_v13 = vadd.f32 %v1382_v55, %v9731_v2  ;;  %v1793_v58 = vpop.f32.mrf.mxu3 }
 0x1b0   : > { %v2205_v43 = vpop.f32.mrf.mxu0 }
 0x1b1   : > { %v1849_v9 = vadd.f32 %v1793_v58, %v1438_v13  ;;  %v8544_v13 = vld [vmem:[%s9481_s16 + $0x68] sm:$0xff] }
 0x1b2   : > { %v10007_v56 = vpop.f32.mrf.mxu1  ;;  %v8703_v58 = vld [vmem:[%s9481_s16 + $0x62] sm:$0xff]  ;;  %v2755_v17 = vpack.c.bf16 %v8544_v13, %v8544_v13 }
 0x1b3   : > { %v2259_v40 = vadd.f32 %v2203_v50, %v1849_v9 }
 0x1b5   : > { %v10009_v2 = vadd.f32 %v2613_v6, %v2259_v40  ;;  %v8543_v6 = vld [vmem:[%s9481_s16 + $0x60] sm:$0xff]  ;;  %v3574_v40 = vpack.c.bf16 %v8703_v58, %v8703_v58 }
 0x1b6   : > { %v1384_v33 = vpop.f32.mrf.mxu2  ;;  %v2754_v16 = vpack.c.bf16 %v8543_v6, %v8543_v6 }
 0x1b7   : > { %v1439_v27 = vadd.f32 %v1384_v33, %v9738_v12  ;;  %v1795_v21 = vpop.f32.mrf.mxu3  ;;  %v8624_v12 = vld [vmem:[%s9481_s16 + $0x69] sm:$0xff]  ;;  %v9305_v33 = vld [vmem:[%s11106_s3 + $0x18] sm:$0xff] }
 0x1b8   : > { %v2208_v50 = vpop.f32.mrf.mxu0  ;;  %v3165_v59 = vpack.c.bf16 %v8624_v12, %v8624_v12  ;;  %4514 = vmatpush.bf16.msra.mxu1 %v9305_v33 }
 0x1b9   : > { %v1850_v41 = vadd.f32 %v1795_v21, %v1439_v27  ;;  %v2867_v27 = vunpack.c.l.b16 %v2754_v16 }
 0x1ba   : > { %v2618_v55 = vpop.f32.mrf.mxu1 }
 0x1bb   : > { %2988 = vmatmul.bf16.gmra.mxu2 %v2896_v47  ;;  %3808 = vmatmul.bf16.gmra.mxu0 %v3716_v35  ;;  %v10012_v18 = vadd.f32 %v2205_v43, %v1850_v41  ;;  %v2868_v47 = vunpack.c.l.b16 %v2755_v17  ;;  %v3687_v35 = vunpack.c.l.b16 %v3574_v40  ;;  %v3278_v41 = vunpack.c.l.b16 %v3165_v59  ;;  %v8546_v17 = vld [vmem:[%s9481_s16 + $0x80] sm:$0xff] }
 0x1bc   : > { %3398 = vmatmul.bf16.gmra.mxu3 %v3306_v11  ;;  %v3688_v11 = vunpack.c.l.b16 %v3575_v23  ;;  %v8705_v40 = vld [vmem:[%s9481_s16 + $0x7a] sm:$0xff]  ;;  %v8706_v23 = vld [vmem:[%s9481_s16 + $0x82] sm:$0xff] }
 0x1bd   : > { %v2897_v42 = vpack.c.b16 %v2868_v47, %v2867_v27  ;;  %v3576_v47 = vpack.c.bf16 %v8705_v40, %v8705_v40 }
 0x1be   : > { %v1387_v10 = vpop.f32.mrf.mxu2 }
 0x1bf   : > { %v1440_v28 = vadd.f32 %v1387_v10, %v9746_v26  ;;  %v1798_v9 = vpop.f32.mrf.mxu3  ;;  %v3277_v26 = vunpack.c.l.b16 %v3164_v25  ;;  %v8625_v25 = vld [vmem:[%s9481_s16 + $0x79] sm:$0xff] }
 0x1c0   : > { %v2210_v54 = vpop.f32.mrf.mxu0 }
 0x1c1   : > { %v1851_v43 = vadd.f32 %v1798_v9, %v1440_v28  ;;  %v3307_v10 = vpack.c.b16 %v3278_v41, %v3277_v26  ;;  %v3166_v26 = vpack.c.bf16 %v8625_v25, %v8625_v25 }
 0x1c2   : > { %v10021_v20 = vpop.f32.mrf.mxu1 }
 0x1c3   : > { %v2261_v21 = vadd.f32 %v2208_v50, %v1851_v43  ;;  %v3717_v50 = vpack.c.b16 %v3688_v11, %v3687_v35  ;;  %v3577_v35 = vpack.c.bf16 %v8706_v23, %v8706_v23 }
 0x1c5   : > { %v10026_v6 = vadd.f32 %v2618_v55, %v2261_v21  ;;  %v8545_v55 = vld [vmem:[%s9481_s16 + $0x78] sm:$0xff]  ;;  %v2757_v21 = vpack.c.bf16 %v8546_v17, %v8546_v17 }
 0x1c6   : > { %v1389_v13 = vpop.f32.mrf.mxu2  ;;  %v2756_v43 = vpack.c.bf16 %v8545_v55, %v8545_v55 }
 0x1c7   : > { %v1441_v58 = vadd.f32 %v1389_v13, %v9750_v44  ;;  %v1800_v34 = vpop.f32.mrf.mxu3  ;;  %v8626_v44 = vld [vmem:[%s9481_s16 + $0x81] sm:$0xff] }
 0x1c8   : > { %v2213_v12 = vpop.f32.mrf.mxu0  ;;  %v3167_v41 = vpack.c.bf16 %v8626_v44, %v8626_v44 }
 0x1c9   : > { %v1852_v16 = vadd.f32 %v1800_v34, %v1441_v58  ;;  %v2869_v58 = vunpack.c.l.b16 %v2756_v43 }
 0x1ca   : > { %v2623_v28 = vpop.f32.mrf.mxu1  ;;  %v3280_v55 = vunpack.c.l.b16 %v3167_v41 }
 0x1cb   : > { %2993 = vmatmul.bf16.gmra.mxu2 %v2897_v42  ;;  %3813 = vmatmul.bf16.gmra.mxu0 %v3717_v50  ;;  %v10029_v9 = vadd.f32 %v2210_v54, %v1852_v16  ;;  %v2870_v42 = vunpack.c.l.b16 %v2757_v21  ;;  %v3689_v50 = vunpack.c.l.b16 %v3576_v47  ;;  %v3279_v16 = vunpack.c.l.b16 %v3166_v26  ;;  %v8548_v21 = vld [vmem:[%s9481_s16 + $0x98] sm:$0xff] }
 0x1cc   : > { %3403 = vmatmul.bf16.gmra.mxu3 %v3307_v10  ;;  %v3690_v10 = vunpack.c.l.b16 %v3577_v35  ;;  %v8707_v47 = vld [vmem:[%s9481_s16 + $0x92] sm:$0xff]  ;;  %v8708_v35 = vld [vmem:[%s9481_s16 + $0x9a] sm:$0xff] }
 0x1cd   : > { %v2898_v25 = vpack.c.b16 %v2870_v42, %v2869_v58  ;;  %v8627_v26 = vld [vmem:[%s9481_s16 + $0x91] sm:$0xff]  ;;  %v2759_v42 = vpack.c.bf16 %v8548_v21, %v8548_v21 }
 0x1ce   : > { %v1392_v59 = vpop.f32.mrf.mxu2  ;;  %v3718_v44 = vpack.c.b16 %v3690_v10, %v3689_v50  ;;  %v3578_v50 = vpack.c.bf16 %v8707_v47, %v8707_v47  ;;  %v3579_v10 = vpack.c.bf16 %v8708_v35, %v8708_v35 }
 0x1cf   : > { %v1442_v33 = vadd.f32 %v1392_v59, %v9764_v51  ;;  %v1803_v27 = vpop.f32.mrf.mxu3  ;;  %v3308_v59 = vpack.c.b16 %v3280_v55, %v3279_v16  ;;  %v3168_v55 = vpack.c.bf16 %v8627_v26, %v8627_v26 }
 0x1d0   : > { %v2215_v11 = vpop.f32.mrf.mxu0 }
 0x1d1   : > { %v1853_v54 = vadd.f32 %v1803_v27, %v1442_v33 }
 0x1d2   : > { %v10038_v13 = vpop.f32.mrf.mxu1 }
 0x1d3   : > { %v2263_v34 = vadd.f32 %v2213_v12, %v1853_v54 }
 0x1d5   : > { %v10040_v51 = vadd.f32 %v2623_v28, %v2263_v34  ;;  %v8547_v28 = vld [vmem:[%s9481_s16 + $0x90] sm:$0xff] }
 0x1d6   : > { %v1394_v17 = vpop.f32.mrf.mxu2  ;;  %v2758_v54 = vpack.c.bf16 %v8547_v28, %v8547_v28  ;;  %v3692_v28 = vunpack.c.l.b16 %v3579_v10  ;;  %v8550_v10 = vld [vmem:[%s9481_s16 + $0xb0] sm:$0xff] }
 0x1d7   : > { %v1443_v40 = vadd.f32 %v1394_v17, %v9771_v63  ;;  %v1805_v23 = vpop.f32.mrf.mxu3  ;;  %v8628_v63 = vld [vmem:[%s9481_s16 + $0x99] sm:$0xff] }
 0x1d8   : > { %v2218_v12 = vpop.f32.mrf.mxu0  ;;  %v3169_v17 = vpack.c.bf16 %v8628_v63, %v8628_v63 }
 0x1d9   : > { %v1854_v43 = vadd.f32 %v1805_v23, %v1443_v40  ;;  %v9304_v23 = vld [vmem:[%s11106_s3 + $0x10] sm:$0xff] }
 0x1da   : > { %v2628_v33 = vpop.f32.mrf.mxu1  ;;  %4515 = vmatpush.bf16.msra.mxu1 %v9304_v23  ;;  %v3282_v21 = vunpack.c.l.b16 %v3169_v17  ;;  %v8710_v17 = vld [vmem:[%s9481_s16 + $0xb2] sm:$0xff] }
 0x1db   : > { %2998 = vmatmul.bf16.gmra.mxu2 %v2898_v25  ;;  %3818 = vmatmul.bf16.gmra.mxu0 %v3718_v44  ;;  %v10043_v27 = vadd.f32 %v2215_v11, %v1854_v43  ;;  %v2871_v25 = vunpack.c.l.b16 %v2758_v54  ;;  %v3691_v43 = vunpack.c.l.b16 %v3578_v50 }
 0x1dc   : > { %3408 = vmatmul.bf16.gmra.mxu3 %v3308_v59  ;;  %v2872_v59 = vunpack.c.l.b16 %v2759_v42 }
 0x1de   : > { %v1397_v41 = vpop.f32.mrf.mxu2 }
 0x1df   : > { %v1444_v58 = vadd.f32 %v1397_v41, %v9779_v8  ;;  %v1808_v34 = vpop.f32.mrf.mxu3  ;;  %v3281_v8 = vunpack.c.l.b16 %v3168_v55  ;;  %v2899_v41 = vpack.c.b16 %v2872_v59, %v2871_v25  ;;  %v8709_v55 = vld [vmem:[%s9481_s16 + $0xaa] sm:$0xff] }
 0x1e0   : > { %v2220_v16 = vpop.f32.mrf.mxu0 }
 0x1e1   : > { %v1855_v11 = vadd.f32 %v1808_v34, %v1444_v58  ;;  %v3309_v58 = vpack.c.b16 %v3282_v21, %v3281_v8  ;;  %v3581_v8 = vpack.c.bf16 %v8710_v17, %v8710_v17 }
 0x1e2   : > { %v10052_v40 = vpop.f32.mrf.mxu1 }
 0x1e3   : > { %11109 = vst [vmem:[#allocation4_spill] sm:$0xff] %v10052_v40  ;;  %v2265_v44 = vadd.f32 %v2218_v12, %v1855_v11  ;;  %v3719_v12 = vpack.c.b16 %v3692_v28, %v3691_v43  ;;  %v8629_v11 = vld [vmem:[%s9481_s16 + $0xa9] sm:$0xff]  ;;  %v2761_v43 = vpack.c.bf16 %v8550_v10, %v8550_v10  ;;  %v3580_v28 = vpack.c.bf16 %v8709_v55, %v8709_v55 }
 0x1e4   : > { %v3694_v40 = vunpack.c.l.b16 %v3581_v8  ;;  %v8712_v8 = vld [vmem:[%s9481_s16 + $0xca] sm:$0xff] }
 0x1e5   : > { %v10057_v47 = vadd.f32 %v2628_v33, %v2265_v44  ;;  %v8549_v33 = vld [vmem:[%s9481_s16 + $0xa8] sm:$0xff] }
 0x1e6   : > { %v1399_v35 = vpop.f32.mrf.mxu2  ;;  %v2760_v44 = vpack.c.bf16 %v8549_v33, %v8549_v33 }
 0x1e7   : > { %v1445_v26 = vadd.f32 %v1399_v35, %v9783_v45  ;;  %v1810_v63 = vpop.f32.mrf.mxu3  ;;  %v8630_v45 = vld [vmem:[%s9481_s16 + $0xb1] sm:$0xff]  ;;  %v3170_v35 = vpack.c.bf16 %v8629_v11, %v8629_v11 }
 0x1e8   : > { %v2223_v54 = vpop.f32.mrf.mxu0 }
 0x1e9   : > { %v1856_v34 = vadd.f32 %v1810_v63, %v1445_v26  ;;  %v3171_v26 = vpack.c.bf16 %v8630_v45, %v8630_v45 }
 0x1ea   : > { %v2633_v42 = vpop.f32.mrf.mxu1 }
 0x1eb   : > { %3003 = vmatmul.bf16.gmra.mxu2 %v2899_v41  ;;  %3823 = vmatmul.bf16.gmra.mxu0 %v3719_v12  ;;  %v10060_v50 = vadd.f32 %v2220_v16, %v1856_v34  ;;  %v2873_v41 = vunpack.c.l.b16 %v2760_v44  ;;  %v3693_v34 = vunpack.c.l.b16 %v3580_v28  ;;  %v3284_v33 = vunpack.c.l.b16 %v3171_v26  ;;  %v8711_v28 = vld [vmem:[%s9481_s16 + $0xc2] sm:$0xff] }
 0x1ec   : > { %3413 = vmatmul.bf16.gmra.mxu3 %v3309_v58  ;;  %v2874_v58 = vunpack.c.l.b16 %v2761_v43  ;;  %v8552_v43 = vld [vmem:[%s9481_s16 + $0xc8] sm:$0xff] }
 0x1ed   : > { %11110 = vst [vmem:[#allocation5_spill] sm:$0xff] %v10060_v50  ;;  %v3283_v50 = vunpack.c.l.b16 %v3170_v35  ;;  %v3720_v45 = vpack.c.b16 %v3694_v40, %v3693_v34  ;;  %v8631_v35 = vld [vmem:[%s9481_s16 + $0xc1] sm:$0xff] }
 0x1ee   : > { %v1402_v23 = vpop.f32.mrf.mxu2  ;;  %v2900_v11 = vpack.c.b16 %v2874_v58, %v2873_v41  ;;  %v3583_v58 = vpack.c.bf16 %v8712_v8, %v8712_v8 }
 0x1ef   : > { %v1446_v25 = vadd.f32 %v1402_v23, %v9797_v38  ;;  %v1813_v59 = vpop.f32.mrf.mxu3  ;;  %v3310_v23 = vpack.c.b16 %v3284_v33, %v3283_v50  ;;  %v3582_v50 = vpack.c.bf16 %v8711_v28, %v8711_v28  ;;  %v3172_v33 = vpack.c.bf16 %v8631_v35, %v8631_v35 }
 0x1f0   : > { %v2225_v21 = vpop.f32.mrf.mxu0 }
 0x1f1   : > { %v1857_v16 = vadd.f32 %v1813_v59, %v1446_v25 }
 0x1f2   : > { %v10069_v63 = vpop.f32.mrf.mxu1 }
 0x1f3   : > { %v2267_v12 = vadd.f32 %v2223_v54, %v1857_v16 }
 0x1f5   : > { %v10071_v38 = vadd.f32 %v2633_v42, %v2267_v12  ;;  %v8551_v42 = vld [vmem:[%s9481_s16 + $0xc0] sm:$0xff]  ;;  %v2763_v12 = vpack.c.bf16 %v8552_v43, %v8552_v43 }
 0x1f6   : > { %v1404_v10 = vpop.f32.mrf.mxu2  ;;  %v2762_v16 = vpack.c.bf16 %v8551_v42, %v8551_v42 }
 0x1f7   : > { %v1447_v55 = vadd.f32 %v1404_v10, %v9804_v52  ;;  %v1815_v17 = vpop.f32.mrf.mxu3  ;;  %v8632_v52 = vld [vmem:[%s9481_s16 + $0xc9] sm:$0xff] }
 0x1f8   : > { %v2228_v54 = vpop.f32.mrf.mxu0  ;;  %v3173_v10 = vpack.c.bf16 %v8632_v52, %v8632_v52 }
 0x1f9   : > { %v1858_v44 = vadd.f32 %v1815_v17, %v1447_v55  ;;  %v9303_v55 = vld [vmem:[%s11106_s3 + $0x8] sm:$0xff]  ;;  %v2875_v17 = vunpack.c.l.b16 %v2762_v16 }
 0x1fa   : > { %v2638_v25 = vpop.f32.mrf.mxu1  ;;  %4516 = vmatpush.bf16.msra.mxu1 %v9303_v55  ;;  %v3286_v42 = vunpack.c.l.b16 %v3173_v10  ;;  %v8633_v10 = vld [vmem:[%s9481_s16 + $0xd9] sm:$0xff] }
 0x1fb   : > { %3008 = vmatmul.bf16.gmra.mxu2 %v2900_v11  ;;  %3828 = vmatmul.bf16.gmra.mxu0 %v3720_v45  ;;  %v10074_v59 = vadd.f32 %v2225_v21, %v1858_v44  ;;  %v2876_v45 = vunpack.c.l.b16 %v2763_v12  ;;  %v3696_v44 = vunpack.c.l.b16 %v3583_v58  ;;  %v8713_v58 = vld [vmem:[%s9481_s16 + $0xda] sm:$0xff] }
 0x1fc   : > { %3418 = vmatmul.bf16.gmra.mxu3 %v3310_v23  ;;  %v3695_v23 = vunpack.c.l.b16 %v3582_v50  ;;  %v8553_v50 = vld [vmem:[%s9481_s16 + $0xd8] sm:$0xff] }
 0x1fd   : > { %v2901_v52 = vpack.c.b16 %v2876_v45, %v2875_v17 }
 0x1fe   : > { %v1407_v26 = vpop.f32.mrf.mxu2 }
 0x1ff   : > { %v1448_v41 = vadd.f32 %v1407_v26, %v9812_v1  ;;  %v1818_v40 = vpop.f32.mrf.mxu3  ;;  %v3285_v1 = vunpack.c.l.b16 %v3172_v33  ;;  %v3721_v26 = vpack.c.b16 %v3696_v44, %v3695_v23  ;;  %v8714_v33 = vld [vmem:[%s9481_s16 + $0xe2] sm:$0xff]  ;;  %v3584_v44 = vpack.c.bf16 %v8713_v58, %v8713_v58 }
 0x200   : > { %v2230_v34 = vpop.f32.mrf.mxu0 }
 0x201   : > { %v1859_v21 = vadd.f32 %v1818_v40, %v1448_v41  ;;  %v3311_v41 = vpack.c.b16 %v3286_v42, %v3285_v1  ;;  %v3585_v1 = vpack.c.bf16 %v8714_v33, %v8714_v33 }
 0x202   : > { %v10086_v43 = vpop.f32.mrf.mxu1 }
 0x203   : > { %v2269_v11 = vadd.f32 %v2228_v54, %v1859_v21  ;;  %11111 = vst [vmem:[#allocation6_spill] sm:$0xff] %v10086_v43  ;;  %v8634_v21 = vld [vmem:[%s9481_s16 + $0xe1] sm:$0xff] }
 0x205   : > { %v10088_v28 = vadd.f32 %v2638_v25, %v2269_v11  ;;  %v8554_v25 = vld [vmem:[%s9481_s16 + $0xe0] sm:$0xff]  ;;  %v2764_v11 = vpack.c.bf16 %v8553_v50, %v8553_v50 }
 0x206   : > { %v1409_v8 = vpop.f32.mrf.mxu2  ;;  %v2765_v23 = vpack.c.bf16 %v8554_v25, %v8554_v25 }
 0x207   : > { %v1449_v35 = vadd.f32 %v1409_v8, %v9816_v14  ;;  %v1820_v54 = vpop.f32.mrf.mxu3  ;;  %v3174_v8 = vpack.c.bf16 %v8633_v10, %v8633_v10 }
 0x208   : > { %v2233_v16 = vpop.f32.mrf.mxu0 }
 0x209   : > { %v1860_v40 = vadd.f32 %v1820_v54, %v1449_v35  ;;  %v2877_v54 = vunpack.c.l.b16 %v2764_v11  ;;  %v3287_v43 = vunpack.c.l.b16 %v3174_v8 }
 0x20a   : > { %v2643_v14 = vpop.f32.mrf.mxu1 }
 0x20b   : > { %3013 = vmatmul.bf16.gmra.mxu2 %v2901_v52  ;;  %3833 = vmatmul.bf16.gmra.mxu0 %v3721_v26  ;;  %v10091_v12 = vadd.f32 %v2230_v34, %v1860_v40  ;;  %v3175_v34 = vpack.c.bf16 %v8634_v21, %v8634_v21  ;;  %v2878_v26 = vunpack.c.l.b16 %v2765_v23  ;;  %v3698_v40 = vunpack.c.l.b16 %v3585_v1  ;;  %v8715_v23 = vld [vmem:[%s9481_s16 + $0xf2] sm:$0xff] }
 0x20c   : > { %3423 = vmatmul.bf16.gmra.mxu3 %v3311_v41  ;;  %v3697_v41 = vunpack.c.l.b16 %v3584_v44  ;;  %v8716_v44 = vld [vmem:[%s9481_s16 + $0xfa] sm:$0xff] }
 0x20d   : > { %11112 = vst [vmem:[#allocation7_spill] sm:$0xff] %v10091_v12  ;;  %v3288_v12 = vunpack.c.l.b16 %v3175_v34  ;;  %v2902_v33 = vpack.c.b16 %v2878_v26, %v2877_v54  ;;  %v8636_v1 = vld [vmem:[%s9481_s16 + $0xf9] sm:$0xff] }
 0x20e   : > { %v1412_v55 = vpop.f32.mrf.mxu2  ;;  %v3722_v10 = vpack.c.b16 %v3698_v40, %v3697_v41  ;;  %v3177_v40 = vpack.c.bf16 %v8636_v1, %v8636_v1 }
 0x20f   : > { %v1450_v17 = vadd.f32 %v1412_v55, %v9834_v39  ;;  %v1823_v45 = vpop.f32.mrf.mxu3  ;;  %v3312_v21 = vpack.c.b16 %v3288_v12, %v3287_v43  ;;  %v3586_v12 = vpack.c.bf16 %v8715_v23, %v8715_v23 }
 0x210   : > { %v2235_v42 = vpop.f32.mrf.mxu0 }
 0x211   : > { %v1861_v35 = vadd.f32 %v1823_v45, %v1450_v17  ;;  %v8556_v45 = vld [vmem:[%s9481_s16 + $0xf8] sm:$0xff] }
 0x212   : > { %v10103_v55 = vpop.f32.mrf.mxu1  ;;  %v2767_v43 = vpack.c.bf16 %v8556_v45, %v8556_v45 }
 0x213   : > { %v2271_v52 = vadd.f32 %v2233_v16, %v1861_v35 }
 0x215   : > { %v10100_v50 = vadd.f32 %v2643_v14, %v2271_v52  ;;  %v8555_v14 = vld [vmem:[%s9481_s16 + $0xf0] sm:$0xff]  ;;  %v3587_v52 = vpack.c.bf16 %v8716_v44, %v8716_v44 }
 0x216   : > { %v1414_v39 = vpop.f32.mrf.mxu2  ;;  %v2766_v34 = vpack.c.bf16 %v8555_v14, %v8555_v14  ;;  %v3290_v14 = vunpack.c.l.b16 %v3177_v40  ;;  %v8638_v40 = vld [vmem:[%s9481_s16 + $0x111] sm:$0xff] }
 0x217   : > { %v1451_v25 = vadd.f32 %v1414_v39, %v9841_v4  ;;  %v1825_v58 = vpop.f32.mrf.mxu3  ;;  %v8635_v4 = vld [vmem:[%s9481_s16 + $0xf1] sm:$0xff] }
 0x218   : > { %v2238_v16 = vpop.f32.mrf.mxu0  ;;  %v3176_v41 = vpack.c.bf16 %v8635_v4, %v8635_v4 }
 0x219   : > { %v1862_v11 = vadd.f32 %v1825_v58, %v1451_v25  ;;  %v2879_v25 = vunpack.c.l.b16 %v2766_v34 }
 0x21a   : > { %v2648_v39 = vpop.f32.mrf.mxu1 }
 0x21b   : > { %3018 = vmatmul.bf16.gmra.mxu2 %v2902_v33  ;;  %3838 = vmatmul.bf16.gmra.mxu0 %v3722_v10  ;;  %v10105_v17 = vadd.f32 %v2235_v42, %v1862_v11  ;;  %v2880_v33 = vunpack.c.l.b16 %v2767_v43  ;;  %v3699_v10 = vunpack.c.l.b16 %v3586_v12  ;;  %v3289_v11 = vunpack.c.l.b16 %v3176_v41  ;;  %v8558_v43 = vld [vmem:[%s9481_s16 + $0x110] sm:$0xff] }
 0x21c   : > { %3428 = vmatmul.bf16.gmra.mxu3 %v3312_v21  ;;  %v3700_v21 = vunpack.c.l.b16 %v3587_v52  ;;  %v8717_v12 = vld [vmem:[%s9481_s16 + $0x10a] sm:$0xff]  ;;  %v8718_v52 = vld [vmem:[%s9481_s16 + $0x112] sm:$0xff] }
 0x21d   : > { %v2903_v4 = vpack.c.b16 %v2880_v33, %v2879_v25  ;;  %v8637_v41 = vld [vmem:[%s9481_s16 + $0x109] sm:$0xff]  ;;  %v3588_v33 = vpack.c.bf16 %v8717_v12, %v8717_v12 }
 0x21e   : > { %v1417_v8 = vpop.f32.mrf.mxu2  ;;  %v3723_v1 = vpack.c.b16 %v3700_v21, %v3699_v10  ;;  %v3589_v10 = vpack.c.bf16 %v8718_v52, %v8718_v52 }
 0x21f   : > { %v1452_v35 = vadd.f32 %v1417_v8, %v9851_v36  ;;  %v1828_v54 = vpop.f32.mrf.mxu3  ;;  %v3313_v8 = vpack.c.b16 %v3290_v14, %v3289_v11  ;;  %v3178_v11 = vpack.c.bf16 %v8637_v41, %v8637_v41  ;;  %v3179_v14 = vpack.c.bf16 %v8638_v40, %v8638_v40 }
 0x220   : > { %v2240_v26 = vpop.f32.mrf.mxu0 }
 0x221   : > { %v1863_v42 = vadd.f32 %v1828_v54, %v1452_v35  ;;  %v8557_v54 = vld [vmem:[%s9481_s16 + $0x108] sm:$0xff] }
 0x223   : > { %v2273_v58 = vadd.f32 %v2238_v16, %v1863_v42 }
 0x225   : > { %v10114_v36 = vadd.f32 %v2648_v39, %v2273_v58  ;;  %v2769_v39 = vpack.c.bf16 %v8558_v43, %v8558_v43 }
 0x226   : > { %v1419_v45 = vpop.f32.mrf.mxu2 }
 0x227   : > { %v1453_v23 = vadd.f32 %v1419_v45, %v9855_v62  ;;  %v1830_v44 = vpop.f32.mrf.mxu3  ;;  %v2768_v62 = vpack.c.bf16 %v8557_v54, %v8557_v54  ;;  %v10129_v45 = vld [vmem:[%s11105_s2] ss:$0 sm:$0xff]  ;;  %v3292_v54 = vunpack.c.l.b16 %v3179_v14  ;;  %v8719_v14 = vld [vmem:[%s9481_s16 + $0x122] sm:$0xff] }
 0x228   : > { %v3804_v16 = vpop.f32.mrf.mxu0 }
 0x229   : > { %v1864_v34 = vadd.f32 %v1830_v44, %v1453_v23  ;;  %v2881_v23 = vunpack.c.l.b16 %v2768_v62  ;;  %v2882_v44 = vunpack.c.l.b16 %v2769_v39 }
 0x22b   : > { %3023 = vmatmul.bf16.gmra.mxu2 %v2903_v4  ;;  %3843 = vmatmul.bf16.gmra.mxu0 %v3723_v1  ;;  %v10117_v35 = vadd.f32 %v2240_v26, %v1864_v34  ;;  %v3701_v1 = vunpack.c.l.b16 %v3588_v33  ;;  %v3291_v34 = vunpack.c.l.b16 %v3178_v11  ;;  %v2904_v52 = vpack.c.b16 %v2882_v44, %v2881_v23  ;;  %v8560_v11 = vld [vmem:[%s9481_s16 + $0x128] sm:$0xff] }
 0x22c   : > { %3433 = vmatmul.bf16.gmra.mxu3 %v3313_v8  ;;  %v3702_v8 = vunpack.c.l.b16 %v3589_v10  ;;  %v8559_v10 = vld [vmem:[%s9481_s16 + $0x120] sm:$0xff] }
 0x22d   : > { %v3314_v39 = vpack.c.b16 %v3292_v54, %v3291_v34  ;;  %v8639_v44 = vld [vmem:[%s9481_s16 + $0x121] sm:$0xff]  ;;  %v3590_v34 = vpack.c.bf16 %v8719_v14, %v8719_v14 }
 0x22e   : > { %v2984_v42 = vpop.f32.mrf.mxu2 }
 0x22f   : > { %v3064_v25 = vadd.f32 %v2984_v42, %v9870_v61  ;;  %v3394_v58 = vpop.f32.mrf.mxu3  ;;  %v9302_v61 = vld [vmem:[%s11106_s3] sm:$0xff]  ;;  %v3724_v42 = vpack.c.b16 %v3702_v8, %v3701_v1  ;;  %v2770_v8 = vpack.c.bf16 %v8559_v10, %v8559_v10 }
 0x230   : > { %v3806_v21 = vpop.f32.mrf.mxu0  ;;  %4517 = vmatpush.bf16.msra.mxu1 %v9302_v61  ;;  %v2771_v61 = vpack.c.bf16 %v8560_v11, %v8560_v11  ;;  %v3703_v11 = vunpack.c.l.b16 %v3590_v34 }
 0x231   : > { %v3474_v26 = vadd.f32 %v3394_v58, %v3064_v25 }
 0x233   : > { %v3884_v4 = vadd.f32 %v3804_v16, %v3474_v26  ;;  %v8720_v26 = vld [vmem:[%s9481_s16 + $0x12a] sm:$0xff] }
 0x235   : > { %v3984_v43 = vadd.f32 %v10129_v45, %v3884_v4  ;;  %v8640_v4 = vld [vmem:[%s9481_s16 + $0x129] sm:$0xff] }
 0x236   : > { %v2986_v12 = vpop.f32.mrf.mxu2 }
 0x237   : > { %vm4016_vm0 = vcmp.ge.f32.partialorder %v3984_v43, 0.0  ;;  %v4048_v41 = vmul.f32 0.01, %v3984_v43  ;;  %v3065_v16 = vadd.f32 %v2986_v12, %v9879_v60  ;;  %v3396_v40 = vpop.f32.mrf.mxu3  ;;  %v9317_v60 = vld [vmem:[%s11106_s3 + $0x78] sm:$0xff]  ;;  %v3591_v12 = vpack.c.bf16 %v8720_v26, %v8720_v26 }
 0x238   : > { %v3809_v62 = vpop.f32.mrf.mxu0  ;;  %4920 = vmatpush.bf16.msrb.mxu2 %v9317_v60 }
 0x239   : > { %v4080_v25 = vsel %vm4016_vm0, %v3984_v43, %v4048_v41  ;;  %v3475_v58 = vadd.f32 %v3396_v40, %v3065_v16  ;;  %v3180_v41 = vpack.c.bf16 %v8639_v44, %v8639_v44  ;;  %v3181_v16 = vpack.c.bf16 %v8640_v4, %v8640_v4 }
 0x23a   : > { %4113 = vst [vmem:[#allocation2 + $0x19] sm:$0xff] %v4080_v25  ;;  %v2883_v25 = vunpack.c.l.b16 %v2770_v8  ;;  %v3704_v14 = vunpack.c.l.b16 %v3591_v12  ;;  %v9333_v12 = vld [vmem:[%s11106_s3 + $0xf8] sm:$0xff] }
 0x23b   : > { %v3885_v33 = vadd.f32 %v3806_v21, %v3475_v58  ;;  %3028 = vmatmul.bf16.gmra.mxu2 %v2904_v52  ;;  %3848 = vmatmul.bf16.gmra.mxu0 %v3724_v42  ;;  %v2884_v58 = vunpack.c.l.b16 %v2771_v61  ;;  %v3294_v60 = vunpack.c.l.b16 %v3181_v16  ;;  %v8561_v16 = vld [vmem:[%s9481_s16 + $0x138] sm:$0xff] }
 0x23c   : > { %3438 = vmatmul.bf16.gmra.mxu3 %v3314_v39  ;;  %v3725_v61 = vpack.c.b16 %v3704_v14, %v3703_v11  ;;  %5740 = vmatpush.bf16.msrb.mxu0 %v9333_v12  ;;  %v2772_v11 = vpack.c.bf16 %v8561_v16, %v8561_v16 }
 0x23d   : > { %v3985_v23 = vadd.f32 %v10129_v45, %v3885_v33  ;;  %v9325_v33 = vld [vmem:[%s11106_s3 + $0xb8] sm:$0xff] }
 0x23e   : > { %v2989_v1 = vpop.f32.mrf.mxu2  ;;  %5330 = vmatpush.bf16.msrb.mxu3 %v9325_v33  ;;  %v8642_v33 = vld [vmem:[%s9481_s16 + $0x141] sm:$0xff] }
 0x23f   : > { %vm4017_vm1 = vcmp.ge.f32.partialorder %v3985_v23, 0.0  ;;  %v4049_v21 = vmul.f32 0.01, %v3985_v23  ;;  %v3066_v54 = vadd.f32 %v2989_v1, %v9888_v0  ;;  %v3399_v43 = vpop.f32.mrf.mxu3  ;;  %v3293_v0 = vunpack.c.l.b16 %v3180_v41 }
 0x240   : > { %v3811_v52 = vpop.f32.mrf.mxu0 }
 0x241   : > { %v4081_v40 = vsel %vm4017_vm1, %v3985_v23, %v4049_v21  ;;  %v3476_v42 = vadd.f32 %v3399_v43, %v3066_v54  ;;  %v4151_v39 = vld [vmem:[#allocation2 + $0x1a] sm:$0x1]  ;;  %v2905_v23 = vpack.c.b16 %v2884_v58, %v2883_v25  ;;  %v3315_v34 = vpack.c.b16 %v3294_v60, %v3293_v0 }
 0x242   : > { %4114 = vst [vmem:[#allocation2 + $0x21] sm:$0xff] %v4081_v40  ;;  %v8562_v40 = vld [vmem:[%s9481_s16 + $0x140] sm:$0xff] }
 0x243   : > { %v3886_v10 = vadd.f32 %v3809_v62, %v3476_v42  ;;  %4169 = vst [vmem:[#allocation2 + $0x18] sm:$0x1] %v4151_v39  ;;  %v8721_v42 = vld [vmem:[%s9481_s16 + $0x13a] sm:$0xff]  ;;  %v8722_v39 = vld [vmem:[%s9481_s16 + $0x142] sm:$0xff]  ;;  %v2773_v14 = vpack.c.bf16 %v8562_v40, %v8562_v40 }
 0x244   : > { %v8641_v58 = vld [vmem:[%s9481_s16 + $0x139] sm:$0xff]  ;;  %v3592_v0 = vpack.c.bf16 %v8721_v42, %v8721_v42 }
 0x245   : > { %v3986_v26 = vadd.f32 %v10129_v45, %v3886_v10  ;;  %v2886_v12 = vunpack.c.l.b16 %v2773_v14 }
 0x246   : > { %v2991_v44 = vpop.f32.mrf.mxu2  ;;  %v3705_v40 = vunpack.c.l.b16 %v3592_v0 }
 0x247   : > { %vm4018_vm2 = vcmp.ge.f32.partialorder %v3986_v26, 0.0  ;;  %v4050_v4 = vmul.f32 0.01, %v3986_v26  ;;  %v3067_v1 = vadd.f32 %v2991_v44, %v9898_v22  ;;  %v3401_v8 = vpop.f32.mrf.mxu3  ;;  %v9341_v22 = vld [vmem:[%s11106_s3 + $0x138] sm:$0xff]  ;;  %v3593_v44 = vpack.c.bf16 %v8722_v39, %v8722_v39 }
 0x248   : > { %v3814_v62 = vpop.f32.mrf.mxu0  ;;  %6150 = vmatpush.bf16.msrb.mxu1 %v9341_v22 }
 0x249   : > { %v4082_v21 = vsel %vm4018_vm2, %v3986_v26, %v4050_v4  ;;  %v3477_v54 = vadd.f32 %v3401_v8, %v3067_v1  ;;  %v4187_v43 = vld [vmem:[#allocation2 + $0x27] sm:$0x1]  ;;  %v3182_v4 = vpack.c.bf16 %v8641_v58, %v8641_v58  ;;  %v3183_v1 = vpack.c.bf16 %v8642_v33, %v8642_v33 }
 0x24a   : > { %4115 = vst [vmem:[#allocation2 + $0x31] sm:$0xff] %v4082_v21  ;;  %v4695_v8 = vpack.c.bf16 %v4082_v21, %v4082_v21  ;;  %v3706_v42 = vunpack.c.l.b16 %v3593_v44 }
 0x24b   : > { %4145 = vst [vmem:[#allocation2 + $0x1] sm:$0xff] %v4082_v21  ;;  %v3887_v41 = vadd.f32 %v3811_v52, %v3477_v54  ;;  %3033 = vmatmul.bf16.gmra.mxu2 %v2905_v23  ;;  %3853 = vmatmul.bf16.gmra.mxu0 %v3725_v61 }
 0x24c   : > { %3443 = vmatmul.bf16.gmra.mxu3 %v3315_v34  ;;  %4205 = vst [vmem:[#allocation2 + $0x29] sm:$0x1] %v4187_v43  ;;  %v2885_v43 = vunpack.c.l.b16 %v2772_v11  ;;  %v10166_v39 = vunpack.c.l.b16 %v4695_v8  ;;  %v8564_v8 = vld [vmem:[%s9481_s16 + $0x158] sm:$0xff] }
 0x24d   : > { %v3987_v25 = vadd.f32 %v10129_v45, %v3887_v41 }
 0x24e   : > { %v2994_v10 = vpop.f32.mrf.mxu2  ;;  %v2906_v33 = vpack.c.b16 %v2886_v12, %v2885_v43 }
 0x24f   : > { %vm4019_vm3 = vcmp.ge.f32.partialorder %v3987_v25, 0.0  ;;  %v4051_v52 = vmul.f32 0.01, %v3987_v25  ;;  %v3068_v60 = vadd.f32 %v2994_v10, %v9906_v32  ;;  %v3404_v26 = vpop.f32.mrf.mxu3  ;;  %v3295_v32 = vunpack.c.l.b16 %v3182_v4 }
 0x250   : > { %v3816_v23 = vpop.f32.mrf.mxu0  ;;  %v3296_v10 = vunpack.c.l.b16 %v3183_v1  ;;  %v8563_v1 = vld [vmem:[%s9481_s16 + $0x150] sm:$0xff] }
 0x251   : > { %v4083_v61 = vsel %vm4019_vm3, %v3987_v25, %v4051_v52  ;;  %v3478_v34 = vadd.f32 %v3404_v26, %v3068_v60  ;;  %v4152_v22 = vld [vmem:[#allocation2 + $0x32] sm:$0x1]  ;;  %v3726_v52 = vpack.c.b16 %v3706_v42, %v3705_v40  ;;  %v8724_v40 = vld [vmem:[%s9481_s16 + $0x15a] sm:$0xff] }
 0x252   : > { %v4150_v54 = vld [vmem:[#allocation2 + $0x2] sm:$0x1]  ;;  %4116 = vst [vmem:[#allocation2 + $0x39] sm:$0xff] %v4083_v61  ;;  %v4696_v41 = vpack.c.bf16 %v4083_v61, %v4083_v61  ;;  %v3316_v26 = vpack.c.b16 %v3296_v10, %v3295_v32  ;;  %v8643_v10 = vld [vmem:[%s9481_s16 + $0x151] sm:$0xff] }
 0x253   : > { %4168 = vst [vmem:[#allocation2] sm:$0x1] %v4150_v54  ;;  %v3888_v16 = vadd.f32 %v3814_v62, %v3478_v34  ;;  %v9316_v34 = vld [vmem:[%s11106_s3 + $0x70] sm:$0xff] }
 0x254   : > { %4146 = vst [vmem:[#allocation2 + $0x9] sm:$0xff] %v4083_v61  ;;  %v10168_v58 = vunpack.c.l.b16 %v4696_v41  ;;  %v8723_v41 = vld [vmem:[%s9481_s16 + $0x152] sm:$0xff]  ;;  %4921 = vmatpush.bf16.msrb.mxu2 %v9316_v34  ;;  %v3184_v34 = vpack.c.bf16 %v8643_v10, %v8643_v10  ;;  %v4257_v10 = vld [vmem:[#allocation2 + $0x20] sm:$0xff] }
 0x255   : > { %v3988_v21 = vadd.f32 %v10129_v45, %v3888_v16  ;;  %4170 = vst [vmem:[#allocation2 + $0x30] sm:$0x1] %v4152_v22 }
 0x256   : > { %v2996_v25 = vpop.f32.mrf.mxu2  ;;  %v4840_v11 = vpack.c.b16 %v10168_v58, %v10166_v39  ;;  %v4665_v58 = vld [vmem:[#allocation2 + $0x19] sm:$0xff] }
 0x257   : > { %vm4020_vm4 = vcmp.ge.f32.partialorder %v3988_v21, 0.0  ;;  %v4052_v62 = vmul.f32 0.01, %v3988_v21  ;;  %v3069_v14 = vadd.f32 %v2996_v25, %v9915_v46  ;;  %v3406_v0 = vpop.f32.mrf.mxu3 }
 0x258   : > { %v3819_v60 = vpop.f32.mrf.mxu0 }
 0x259   : > { %v4084_v44 = vsel %vm4020_vm4, %v3988_v21, %v4052_v62  ;;  %v3479_v4 = vadd.f32 %v3406_v0, %v3069_v14  ;;  %v4188_v54 = vld [vmem:[#allocation2 + $0x3f] sm:$0x1]  ;;  %v2774_v14 = vpack.c.bf16 %v8563_v1, %v8563_v1  ;;  %v9324_v1 = vld [vmem:[%s11106_s3 + $0xb0] sm:$0xff] }
 0x25a   : > { %4117 = vst [vmem:[#allocation2 + $0x49] sm:$0xff] %v4084_v44  ;;  %v4254_v61 = vld [vmem:[#allocation2] sm:$0xff]  ;;  %5331 = vmatpush.bf16.msrb.mxu3 %v9324_v1 }
 0x25b   : > { %v4186_v46 = vld [vmem:[#allocation2 + $0xf] sm:$0x1]  ;;  %v3889_v43 = vadd.f32 %v3816_v23, %v3479_v4  ;;  %3038 = vmatmul.bf16.gmra.mxu2 %v2906_v33  ;;  %3858 = vmatmul.bf16.gmra.mxu0 %v3726_v52  ;;  %v4286_v22 = vpack.c.bf16 %v4254_v61, %v4254_v61  ;;  %v8644_v21 = vld [vmem:[%s9481_s16 + $0x159] sm:$0xff]  ;;  %4206 = vst [vmem:[#allocation2 + $0x41] sm:$0x1] %v4188_v54  ;;  %v2887_v54 = vunpack.c.l.b16 %v2774_v14 }
 0x25c   : > { %v4255_v12 = vld [vmem:[#allocation2 + $0x8] sm:$0xff]  ;;  %4204 = vst [vmem:[#allocation2 + $0x11] sm:$0x1] %v4186_v46  ;;  %3448 = vmatmul.bf16.gmra.mxu3 %v3316_v26  ;;  %v2775_v23 = vpack.c.bf16 %v8564_v8, %v8564_v8  ;;  %v3594_v33 = vpack.c.bf16 %v8723_v41, %v8723_v41  ;;  %v3595_v26 = vpack.c.bf16 %v8724_v40, %v8724_v40  ;;  %v3297_v40 = vunpack.c.l.b16 %v3184_v34 }
 0x25d   : > { %v4287_v16 = vpack.c.bf16 %v4255_v12, %v4255_v12  ;;  %v3989_v42 = vadd.f32 %v10129_v45, %v3889_v43  ;;  %v4398_v32 = vunpack.c.l.b16 %v4286_v22  ;;  %v3185_v46 = vpack.c.bf16 %v8644_v21, %v8644_v21 }
 0x25e   : > { %v2999_v25 = vpop.f32.mrf.mxu2  ;;  %v3707_v41 = vunpack.c.l.b16 %v3594_v33 }
 0x25f   : > { %v4399_v62 = vunpack.c.l.b16 %v4287_v16  ;;  %vm4021_vm5 = vcmp.ge.f32.partialorder %v3989_v42, 0.0  ;;  %v4053_v0 = vmul.f32 0.01, %v3989_v42  ;;  %v3070_v52 = vadd.f32 %v2999_v25, %v9924_v30  ;;  %v3409_v44 = vpop.f32.mrf.mxu3 }
 0x260   : > { %v3821_v4 = vpop.f32.mrf.mxu0  ;;  %v2888_v16 = vunpack.c.l.b16 %v2775_v23  ;;  %v3708_v30 = vunpack.c.l.b16 %v3595_v26  ;;  %v3298_v25 = vunpack.c.l.b16 %v3185_v46  ;;  %v4289_v26 = vpack.c.bf16 %v4257_v10, %v4257_v10 }
 0x261   : > { %v4430_v61 = vpack.c.b16 %v4399_v62, %v4398_v32  ;;  %v4085_v43 = vsel %vm4021_vm5, %v3989_v42, %v4053_v0  ;;  %v3480_v12 = vadd.f32 %v3409_v44, %v3070_v52  ;;  %v4153_v22 = vld [vmem:[#allocation2 + $0x4a] sm:$0x1]  ;;  %v4256_v42 = vld [vmem:[#allocation2 + $0x18] sm:$0xff] }
 0x262   : > { %4118 = vst [vmem:[#allocation2 + $0x51] sm:$0xff] %v4085_v43  ;;  %v2907_v62 = vpack.c.b16 %v2888_v16, %v2887_v54  ;;  %v3317_v52 = vpack.c.b16 %v3298_v25, %v3297_v40  ;;  %v4288_v44 = vpack.c.bf16 %v4256_v42, %v4256_v42  ;;  %v9332_v43 = vld [vmem:[%s11106_s3 + $0xf0] sm:$0xff] }
 0x263   : > { %4518 = vmatmul.bf16.vlgmr.msra.gmra.mxu1 %v4430_v61  ;;  %v3890_v8 = vadd.f32 %v3819_v60, %v3480_v12  ;;  %4171 = vst [vmem:[#allocation2 + $0x48] sm:$0x1] %v4153_v22  ;;  %v3727_v60 = vpack.c.b16 %v3708_v30, %v3707_v41  ;;  %v8565_v22 = vld [vmem:[%s9481_s16 + $0x168] sm:$0xff]  ;;  %v8566_v54 = vld [vmem:[%s9481_s16 + $0x170] sm:$0xff]  ;;  %5741 = vmatpush.bf16.msrb.mxu0 %v9332_v43 }
 0x264   : > { %v8725_v16 = vld [vmem:[%s9481_s16 + $0x16a] sm:$0xff]  ;;  %v4400_v1 = vunpack.c.l.b16 %v4288_v44  ;;  %v8726_v41 = vld [vmem:[%s9481_s16 + $0x172] sm:$0xff]  ;;  %v2776_v42 = vpack.c.bf16 %v8565_v22, %v8565_v22  ;;  %v2777_v10 = vpack.c.bf16 %v8566_v54, %v8566_v54 }
 0x265   : > { %v3990_v32 = vadd.f32 %v10129_v45, %v3890_v8  ;;  %v4401_v8 = vunpack.c.l.b16 %v4289_v26  ;;  %v8645_v40 = vld [vmem:[%s9481_s16 + $0x169] sm:$0xff]  ;;  %v8646_v25 = vld [vmem:[%s9481_s16 + $0x171] sm:$0xff] }
 0x266   : > { %v3001_v21 = vpop.f32.mrf.mxu2  ;;  %v3187_v44 = vpack.c.bf16 %v8646_v25, %v8646_v25  ;;  %v2890_v43 = vunpack.c.l.b16 %v2777_v10 }
 0x267   : > { %vm4022_vm6 = vcmp.ge.f32.partialorder %v3990_v32, 0.0  ;;  %v4054_v14 = vmul.f32 0.01, %v3990_v32  ;;  %v3071_v23 = vadd.f32 %v3001_v21, %v9934_v53  ;;  %v3411_v0 = vpop.f32.mrf.mxu3  ;;  %v9340_v53 = vld [vmem:[%s11106_s3 + $0x130] sm:$0xff] }
 0x268   : > { %v3824_v33 = vpop.f32.mrf.mxu0  ;;  %6151 = vmatpush.bf16.msrb.mxu1 %v9340_v53  ;;  %v3300_v54 = vunpack.c.l.b16 %v3187_v44  ;;  %v9314_v44 = vld [vmem:[%s11106_s3 + $0x60] sm:$0xff] }
 0x269   : > { %v4086_v61 = vsel %vm4022_vm6, %v3990_v32, %v4054_v14  ;;  %v3481_v34 = vadd.f32 %v3411_v0, %v3071_v23  ;;  %v4189_v46 = vld [vmem:[#allocation2 + $0x57] sm:$0x1]  ;;  %v3597_v23 = vpack.c.bf16 %v8726_v41, %v8726_v41  ;;  %v4259_v41 = vld [vmem:[#allocation2 + $0x38] sm:$0xff] }
 0x26a   : > { %4119 = vst [vmem:[#allocation2 + $0x61] sm:$0xff] %v4086_v61 }
 0x26b   : > { %v3891_v12 = vadd.f32 %v3821_v4, %v3481_v34  ;;  %3043 = vmatmul.bf16.gmra.mxu2 %v2907_v62  ;;  %3863 = vmatmul.bf16.gmra.mxu0 %v3727_v60  ;;  %4207 = vst [vmem:[#allocation2 + $0x59] sm:$0x1] %v4189_v46  ;;  %v3596_v4 = vpack.c.bf16 %v8725_v16, %v8725_v16  ;;  %v2889_v46 = vunpack.c.l.b16 %v2776_v42  ;;  %v3710_v22 = vunpack.c.l.b16 %v3597_v23  ;;  %v4258_v16 = vld [vmem:[#allocation2 + $0x30] sm:$0xff] }
 0x26c   : > { %3453 = vmatmul.bf16.gmra.mxu3 %v3317_v52  ;;  %v10204_v60 = vpack.c.b16 %v4401_v8, %v4400_v1  ;;  %v3186_v52 = vpack.c.bf16 %v8645_v40, %v8645_v40  ;;  %v2662_v1 = vadd.f32 %v9942_v3, %v9950_v5  ;;  %v9331_v40 = vld [vmem:[%s11106_s3 + $0xe8] sm:$0xff] }
 0x26d   : > { %v3991_v30 = vadd.f32 %v10129_v45, %v3891_v12  ;;  %v3709_v12 = vunpack.c.l.b16 %v3596_v4  ;;  %5742 = vmatpush.bf16.msrb.mxu0 %v9331_v40 }
 0x26e   : > { %v3004_v32 = vpop.f32.mrf.mxu2 }
 0x26f   : > { %vm4023_vm7 = vcmp.ge.f32.partialorder %v3991_v30, 0.0  ;;  %v4055_v21 = vmul.f32 0.01, %v3991_v30  ;;  %v3072_v62 = vadd.f32 %v3004_v32, %v9944_v29  ;;  %v3414_v14 = vpop.f32.mrf.mxu3  ;;  %v3299_v29 = vunpack.c.l.b16 %v3186_v52 }
 0x270   : > { %v3826_v0 = vpop.f32.mrf.mxu0  ;;  %v2908_v32 = vpack.c.b16 %v2890_v43, %v2889_v46  ;;  %v3728_v5 = vpack.c.b16 %v3710_v22, %v3709_v12  ;;  %v8568_v43 = vld [vmem:[%s9481_s16 + $0x188] sm:$0xff] }
 0x271   : > { %v4087_v26 = vsel %vm4023_vm7, %v3991_v30, %v4055_v21  ;;  %v3482_v61 = vadd.f32 %v3414_v14, %v3072_v62  ;;  %v4154_v34 = vld [vmem:[#allocation2 + $0x62] sm:$0x1]  ;;  %v9315_v30 = vld [vmem:[%s11106_s3 + $0x68] sm:$0xff]  ;;  %v3318_v21 = vpack.c.b16 %v3300_v54, %v3299_v29  ;;  %v4290_v62 = vpack.c.bf16 %v4258_v16, %v4258_v16 }
 0x272   : > { %4120 = vst [vmem:[#allocation2 + $0x69] sm:$0xff] %v4087_v26  ;;  %4922 = vmatpush.bf16.msrb.mxu2 %v9315_v30  ;;  %v4291_v14 = vpack.c.bf16 %v4259_v41, %v4259_v41  ;;  %v9322_v26 = vld [vmem:[%s11106_s3 + $0xa0] sm:$0xff]  ;;  %v8648_v16 = vld [vmem:[%s9481_s16 + $0x189] sm:$0xff]  ;;  %v9329_v30 = vld [vmem:[%s11106_s3 + $0xd8] sm:$0xff] }
 0x273   : > { %4523 = vmatmul.bf16.gmra.mxu1 %v10204_v60  ;;  %v3892_v53 = vadd.f32 %v3824_v33, %v3482_v61  ;;  %4172 = vst [vmem:[#allocation2 + $0x60] sm:$0x1] %v4154_v34  ;;  %v9323_v33 = vld [vmem:[%s11106_s3 + $0xa8] sm:$0xff]  ;;  %v9330_v61 = vld [vmem:[%s11106_s3 + $0xe0] sm:$0xff]  ;;  %v4402_v22 = vunpack.c.l.b16 %v4290_v62 }
 0x274   : > { %5332 = vmatpush.bf16.msrb.mxu3 %v9323_v33  ;;  %v8567_v34 = vld [vmem:[%s9481_s16 + $0x180] sm:$0xff]  ;;  %v4403_v29 = vunpack.c.l.b16 %v4291_v14  ;;  %v8728_v41 = vld [vmem:[%s9481_s16 + $0x18a] sm:$0xff]  ;;  %5743 = vmatpush.bf16.msrb.mxu0 %v9330_v61 }
 0x275   : > { %v3992_v8 = vadd.f32 %v10129_v45, %v3892_v53  ;;  %v8727_v53 = vld [vmem:[%s9481_s16 + $0x182] sm:$0xff]  ;;  %v2778_v40 = vpack.c.bf16 %v8567_v34, %v8567_v34  ;;  %v9328_v61 = vld [vmem:[%s11106_s3 + $0xd0] sm:$0xff] }
 0x276   : > { %v3006_v25 = vpop.f32.mrf.mxu2  ;;  %v8647_v54 = vld [vmem:[%s9481_s16 + $0x181] sm:$0xff]  ;;  %4923 = vmatpush.bf16.msrb.mxu2 %v9314_v44  ;;  %v10245_v62 = vpack.c.b16 %v4403_v29, %v4402_v22 }
 0x277   : > { %vm4024_vm8 = vcmp.ge.f32.partialorder %v3992_v8, 0.0  ;;  %v4056_v42 = vmul.f32 0.01, %v3992_v8  ;;  %v3073_v10 = vadd.f32 %v3006_v25, %v2662_v1  ;;  %v3416_v3 = vpop.f32.mrf.mxu3  ;;  %v2779_v25 = vpack.c.bf16 %v8568_v43, %v8568_v43 }
 0x278   : > { %v3829_v4 = vpop.f32.mrf.mxu0  ;;  %5333 = vmatpush.bf16.msrb.mxu3 %v9322_v26  ;;  %v3188_v14 = vpack.c.bf16 %v8647_v54, %v8647_v54  ;;  %5744 = vmatpush.bf16.msrb.mxu0 %v9329_v30  ;;  %v9312_v26 = vld [vmem:[%s11106_s3 + $0x50] sm:$0xff]  ;;  %v2891_v34 = vunpack.c.l.b16 %v2778_v40  ;;  %v9327_v30 = vld [vmem:[%s11106_s3 + $0xc8] sm:$0xff] }
 0x279   : > { %v4088_v23 = vsel %vm4024_vm8, %v3992_v8, %v4056_v42  ;;  %v3483_v52 = vadd.f32 %v3416_v3, %v3073_v10  ;;  %v4190_v12 = vld [vmem:[#allocation2 + $0x6f] sm:$0x1]  ;;  %v9321_v8 = vld [vmem:[%s11106_s3 + $0x98] sm:$0xff] }
 0x27a   : > { %4121 = vst [vmem:[#allocation2 + $0x79] sm:$0xff] %v4088_v23  ;;  %v3189_v23 = vpack.c.bf16 %v8648_v16, %v8648_v16  ;;  %v3301_v29 = vunpack.c.l.b16 %v3188_v14  ;;  %v4260_v16 = vld [vmem:[#allocation2 + $0x48] sm:$0xff] }
 0x27b   : > { %v3893_v46 = vadd.f32 %v3826_v0, %v3483_v52  ;;  %3048 = vmatmul.bf16.gmra.mxu2 %v2908_v32  ;;  %3868 = vmatmul.bf16.gmra.mxu0 %v3728_v5  ;;  %v9313_v0 = vld [vmem:[%s11106_s3 + $0x58] sm:$0xff]  ;;  %4208 = vst [vmem:[#allocation2 + $0x71] sm:$0x1] %v4190_v12  ;;  %v3598_v32 = vpack.c.bf16 %v8727_v53, %v8727_v53 }
 0x27c   : > { %3458 = vmatmul.bf16.gmra.mxu3 %v3318_v21  ;;  %v3599_v5 = vpack.c.bf16 %v8728_v41, %v8728_v41  ;;  %4924 = vmatpush.bf16.msrb.mxu2 %v9313_v0  ;;  %v3302_v54 = vunpack.c.l.b16 %v3189_v23  ;;  %v4261_v41 = vld [vmem:[#allocation2 + $0x50] sm:$0xff] }
 0x27d   : > { %v3993_v1 = vadd.f32 %v10129_v45, %v3893_v46  ;;  %5334 = vmatpush.bf16.msrb.mxu3 %v9321_v8  ;;  %v2892_v46 = vunpack.c.l.b16 %v2779_v25  ;;  %v3711_v12 = vunpack.c.l.b16 %v3598_v32  ;;  %5745 = vmatpush.bf16.msrb.mxu0 %v9328_v61  ;;  %v9311_v8 = vld [vmem:[%s11106_s3 + $0x48] sm:$0xff]  ;;  %v9326_v61 = vld [vmem:[%s11106_s3 + $0xc0] sm:$0xff] }
 0x27e   : > { %v3009_v33 = vpop.f32.mrf.mxu2  ;;  %v3712_v22 = vunpack.c.l.b16 %v3599_v5  ;;  %v4293_v5 = vpack.c.bf16 %v4261_v41, %v4261_v41  ;;  %v8650_v41 = vld [vmem:[%s9481_s16 + $0x1a1] sm:$0xff] }
 0x27f   : > { %vm4025_vm9 = vcmp.ge.f32.partialorder %v3993_v1, 0.0  ;;  %v4057_v42 = vmul.f32 0.01, %v3993_v1  ;;  %v3074_v10 = vadd.f32 %v3009_v33, %v9964_v48  ;;  %v3419_v3 = vpop.f32.mrf.mxu3  ;;  %v9320_v48 = vld [vmem:[%s11106_s3 + $0x90] sm:$0xff]  ;;  %v2909_v40 = vpack.c.b16 %v2892_v46, %v2891_v34  ;;  %v8570_v46 = vld [vmem:[%s9481_s16 + $0x1a0] sm:$0xff] }
 0x280   : > { %v3831_v21 = vpop.f32.mrf.mxu0  ;;  %4925 = vmatpush.bf16.msrb.mxu2 %v9312_v26  ;;  %v3729_v32 = vpack.c.b16 %v3712_v22, %v3711_v12  ;;  %v8569_v26 = vld [vmem:[%s9481_s16 + $0x198] sm:$0xff]  ;;  %v4405_v22 = vunpack.c.l.b16 %v4293_v5 }
 0x281   : > { %v4089_v52 = vsel %vm4025_vm9, %v3993_v1, %v4057_v42  ;;  %v3484_v44 = vadd.f32 %v3419_v3, %v3074_v10  ;;  %v4155_v43 = vld [vmem:[#allocation2 + $0x7a] sm:$0x1]  ;;  %v2664_v1 = vadd.f32 %v9959_v31, %v9967_v24  ;;  %5335 = vmatpush.bf16.msrb.mxu3 %v9320_v48  ;;  %v3319_v10 = vpack.c.b16 %v3302_v54, %v3301_v29  ;;  %v9339_v48 = vld [vmem:[%s11106_s3 + $0x128] sm:$0xff] }
 0x282   : > { %4122 = vst [vmem:[#allocation2 + $0x81] sm:$0xff] %v4089_v52  ;;  %v4292_v3 = vpack.c.bf16 %v4260_v16, %v4260_v16  ;;  %5746 = vmatpush.bf16.msrb.mxu0 %v9327_v30  ;;  %v9310_v52 = vld [vmem:[%s11106_s3 + $0x40] sm:$0xff]  ;;  %6152 = vmatpush.bf16.msrb.mxu1 %v9339_v48 }
 0x283   : > { %4528 = vmatmul.bf16.gmra.mxu1 %v10245_v62  ;;  %v3894_v53 = vadd.f32 %v3829_v4, %v3484_v44  ;;  %4173 = vst [vmem:[#allocation2 + $0x78] sm:$0x1] %v4155_v43  ;;  %v9319_v4 = vld [vmem:[%s11106_s3 + $0x88] sm:$0xff]  ;;  %v9318_v44 = vld [vmem:[%s11106_s3 + $0x80] sm:$0xff] }
 0x284   : > { %4926 = vmatpush.bf16.msrb.mxu2 %v9311_v8  ;;  %v8729_v43 = vld [vmem:[%s9481_s16 + $0x19a] sm:$0xff]  ;;  %v4404_v12 = vunpack.c.l.b16 %v4292_v3  ;;  %v8730_v29 = vld [vmem:[%s9481_s16 + $0x1a2] sm:$0xff] }
 0x285   : > { %v3994_v0 = vadd.f32 %v10129_v45, %v3894_v53  ;;  %5336 = vmatpush.bf16.msrb.mxu3 %v9319_v4  ;;  %v8649_v16 = vld [vmem:[%s9481_s16 + $0x199] sm:$0xff]  ;;  %v3600_v8 = vpack.c.bf16 %v8729_v43, %v8729_v43  ;;  %v4263_v43 = vld [vmem:[#allocation2 + $0x68] sm:$0xff] }
 0x286   : > { %v3011_v33 = vpop.f32.mrf.mxu2  ;;  %5747 = vmatpush.bf16.msrb.mxu0 %v9326_v61  ;;  %v2666_v61 = vadd.f32 %v9976_v57, %v9981_v37 }
 0x287   : > { %vm4026_vm10 = vcmp.ge.f32.partialorder %v3994_v0, 0.0  ;;  %v4058_v31 = vmul.f32 0.01, %v3994_v0  ;;  %v3075_v24 = vadd.f32 %v3011_v33, %v2664_v1  ;;  %v3421_v25 = vpop.f32.mrf.mxu3 }
 0x288   : > { %v3834_v42 = vpop.f32.mrf.mxu0  ;;  %4927 = vmatpush.bf16.msrb.mxu2 %v9310_v52 }
 0x289   : > { %v4090_v14 = vsel %vm4026_vm10, %v3994_v0, %v4058_v31  ;;  %v3485_v23 = vadd.f32 %v3421_v25, %v3075_v24  ;;  %v4191_v53 = vld [vmem:[#allocation2 + $0x87] sm:$0x1]  ;;  %5337 = vmatpush.bf16.msrb.mxu3 %v9318_v44  ;;  %v2780_v0 = vpack.c.bf16 %v8569_v26, %v8569_v26  ;;  %v10289_v24 = vpack.c.b16 %v4405_v22, %v4404_v12 }
 0x28a   : > { %4123 = vst [vmem:[#allocation2 + $0x91] sm:$0xff] %v4090_v14  ;;  %v3190_v25 = vpack.c.bf16 %v8649_v16, %v8649_v16  ;;  %v3713_v44 = vunpack.c.l.b16 %v3600_v8 }
 0x28b   : > { %v3895_v34 = vadd.f32 %v3831_v21, %v3485_v23  ;;  %3053 = vmatmul.bf16.gmra.mxu2 %v2909_v40  ;;  %3873 = vmatmul.bf16.gmra.mxu0 %v3729_v32  ;;  %4209 = vst [vmem:[#allocation2 + $0x89] sm:$0x1] %v4191_v53  ;;  %v2781_v21 = vpack.c.bf16 %v8570_v46, %v8570_v46  ;;  %v2893_v14 = vunpack.c.l.b16 %v2780_v0  ;;  %v4262_v46 = vld [vmem:[#allocation2 + $0x60] sm:$0xff] }
 0x28c   : > { %3463 = vmatmul.bf16.gmra.mxu3 %v3319_v10  ;;  %v3601_v40 = vpack.c.bf16 %v8730_v29, %v8730_v29  ;;  %v3191_v32 = vpack.c.bf16 %v8650_v41, %v8650_v41  ;;  %v4295_v0 = vpack.c.bf16 %v4263_v43, %v4263_v43 }
 0x28d   : > { %v3995_v54 = vadd.f32 %v10129_v45, %v3895_v34  ;;  %v2894_v23 = vunpack.c.l.b16 %v2781_v21 }
 0x28e   : > { %v3014_v1 = vpop.f32.mrf.mxu2  ;;  %v3714_v26 = vunpack.c.l.b16 %v3601_v40  ;;  %v3304_v48 = vunpack.c.l.b16 %v3191_v32 }
 0x28f   : > { %vm4027_vm11 = vcmp.ge.f32.partialorder %v3995_v54, 0.0  ;;  %v4059_v4 = vmul.f32 0.01, %v3995_v54  ;;  %v3076_v30 = vadd.f32 %v3014_v1, %v9978_v49  ;;  %v3424_v33 = vpop.f32.mrf.mxu3  ;;  %v3303_v49 = vunpack.c.l.b16 %v3190_v25 }
 0x290   : > { %v3836_v31 = vpop.f32.mrf.mxu0  ;;  %v2910_v12 = vpack.c.b16 %v2894_v23, %v2893_v14  ;;  %v3730_v16 = vpack.c.b16 %v3714_v26, %v3713_v44  ;;  %v4294_v1 = vpack.c.bf16 %v4262_v46, %v4262_v46  ;;  %v4265_v46 = vld [vmem:[#allocation2 + $0x80] sm:$0xff] }
 0x291   : > { %v4091_v10 = vsel %vm4027_vm11, %v3995_v54, %v4059_v4  ;;  %v3486_v3 = vadd.f32 %v3424_v33, %v3076_v30  ;;  %v4156_v5 = vld [vmem:[#allocation2 + $0x92] sm:$0x1]  ;;  %v3320_v41 = vpack.c.b16 %v3304_v48, %v3303_v49  ;;  %v4407_v30 = vunpack.c.l.b16 %v4295_v0 }
 0x292   : > { %4124 = vst [vmem:[#allocation2 + $0x99] sm:$0xff] %v4091_v10  ;;  %v4406_v37 = vunpack.c.l.b16 %v4294_v1  ;;  %v4297_v1 = vpack.c.bf16 %v4265_v46, %v4265_v46 }
 0x293   : > { %4533 = vmatmul.bf16.gmra.mxu1 %v10289_v24  ;;  %v3896_v52 = vadd.f32 %v3834_v42, %v3486_v3  ;;  %4174 = vst [vmem:[#allocation2 + $0x90] sm:$0x1] %v4156_v5  ;;  %v5074_v3 = vld [vmem:[#allocation2 + $0xa] sm:$0xff] }
 0x294   : > { %v10297_v14 = vpack.c.b16 %v4407_v30, %v4406_v37  ;;  %v5106_v26 = vpack.c.bf16 %v5074_v3, %v5074_v3 }
 0x295   : > { %v3996_v34 = vadd.f32 %v10129_v45, %v3896_v52  ;;  %v5073_v52 = vld [vmem:[#allocation2 + $0x2] sm:$0xff] }
 0x296   : > { %v3016_v53 = vpop.f32.mrf.mxu2  ;;  %v5105_v48 = vpack.c.bf16 %v5073_v52, %v5073_v52 }
 0x297   : > { %vm4028_vm12 = vcmp.ge.f32.partialorder %v3996_v34, 0.0  ;;  %v4060_v22 = vmul.f32 0.01, %v3996_v34  ;;  %v3077_v29 = vadd.f32 %v3016_v53, %v2666_v61  ;;  %v3426_v54 = vpop.f32.mrf.mxu3  ;;  %v2668_v61 = vadd.f32 %v9990_v19, %v9998_v15  ;;  %v9338_v19 = vld [vmem:[%s11106_s3 + $0x120] sm:$0xff] }
 0x298   : > { %v3839_v42 = vpop.f32.mrf.mxu0  ;;  %v5219_v53 = vunpack.c.l.b16 %v5106_v26  ;;  %6153 = vmatpush.bf16.msrb.mxu1 %v9338_v19  ;;  %v4697_v26 = vpack.c.bf16 %v4665_v58, %v4665_v58 }
 0x299   : > { %v4092_v21 = vsel %vm4028_vm12, %v3996_v34, %v4060_v22  ;;  %v3487_v8 = vadd.f32 %v3426_v54, %v3077_v29  ;;  %v4192_v4 = vld [vmem:[#allocation2 + $0x9f] sm:$0x1] }
 0x29a   : > { %4125 = vst [vmem:[#allocation2 + $0xa9] sm:$0xff] %v4092_v21  ;;  %v4264_v34 = vld [vmem:[#allocation2 + $0x78] sm:$0xff] }
 0x29b   : > { %v3897_v57 = vadd.f32 %v3836_v31, %v3487_v8  ;;  %3058 = vmatmul.bf16.gmra.mxu2 %v2910_v12  ;;  %3878 = vmatmul.bf16.gmra.mxu0 %v3730_v16  ;;  %4210 = vst [vmem:[#allocation2 + $0xa1] sm:$0x1] %v4192_v4  ;;  %v5218_v16 = vunpack.c.l.b16 %v5105_v48 }
 0x29c   : > { %3468 = vmatmul.bf16.gmra.mxu3 %v3320_v41  ;;  %v4296_v41 = vpack.c.bf16 %v4264_v34, %v4264_v34  ;;  %v4267_v34 = vld [vmem:[#allocation2 + $0x98] sm:$0xff] }
 0x29d   : > { %v3997_v33 = vadd.f32 %v10129_v45, %v3897_v57  ;;  %v5250_v8 = vpack.c.b16 %v5219_v53, %v5218_v16  ;;  %v4409_v57 = vunpack.c.l.b16 %v4297_v1  ;;  %v4299_v1 = vpack.c.bf16 %v4267_v34, %v4267_v34 }
 0x29e   : > { %v3019_v40 = vpop.f32.mrf.mxu2  ;;  %v4408_v4 = vunpack.c.l.b16 %v4296_v41 }
 0x29f   : > { %vm4029_vm13 = vcmp.ge.f32.partialorder %v3997_v33, 0.0  ;;  %v4061_v25 = vmul.f32 0.01, %v3997_v33  ;;  %v3078_v32 = vadd.f32 %v3019_v40, %v9995_v7  ;;  %v3429_v10 = vpop.f32.mrf.mxu3  ;;  %v4411_v19 = vunpack.c.l.b16 %v4299_v1 }
 0x2a0   : > { %v3841_v5 = vpop.f32.mrf.mxu0  ;;  %v10312_v39 = vpack.c.b16 %v4409_v57, %v4408_v4 }
 0x2a1   : > { %v4093_v23 = vsel %vm4029_vm13, %v3997_v33, %v4061_v25  ;;  %v3488_v31 = vadd.f32 %v3429_v10, %v3078_v32  ;;  %v4157_v44 = vld [vmem:[#allocation2 + $0xaa] sm:$0x1]  ;;  %v4666_v33 = vld [vmem:[#allocation2 + $0x21] sm:$0xff] }
 0x2a2   : > { %4126 = vst [vmem:[#allocation2 + $0xb1] sm:$0xff] %v4093_v23  ;;  %v5076_v10 = vld [vmem:[#allocation2 + $0x22] sm:$0xff]  ;;  %v5075_v23 = vld [vmem:[#allocation2 + $0x1a] sm:$0xff] }
 0x2a3   : > { %4538 = vmatmul.bf16.gmra.mxu1 %v10297_v14  ;;  %v3898_v49 = vadd.f32 %v3839_v42, %v3488_v31  ;;  %4175 = vst [vmem:[#allocation2 + $0xa8] sm:$0x1] %v4157_v44  ;;  %v5108_v52 = vpack.c.bf16 %v5076_v10, %v5076_v10  ;;  %v4667_v10 = vld [vmem:[#allocation2 + $0x31] sm:$0xff] }
 0x2a5   : > { %v3998_v7 = vadd.f32 %v10129_v45, %v3898_v49  ;;  %v2670_v49 = vadd.f32 %v10007_v56, %v10012_v18 }
 0x2a6   : > { %v3021_v43 = vpop.f32.mrf.mxu2 }
 0x2a7   : > { %vm4030_vm14 = vcmp.ge.f32.partialorder %v3998_v7, 0.0  ;;  %v4062_v12 = vmul.f32 0.01, %v3998_v7  ;;  %v3079_v22 = vadd.f32 %v3021_v43, %v2668_v61  ;;  %v3431_v29 = vpop.f32.mrf.mxu3  ;;  %v5221_v43 = vunpack.c.l.b16 %v5108_v52 }
 0x2a8   : > { %v3844_v54 = vpop.f32.mrf.mxu0 }
 0x2a9   : > { %v4094_v42 = vsel %vm4030_vm14, %v3998_v7, %v4062_v12  ;;  %v3489_v0 = vadd.f32 %v3431_v29, %v3079_v22  ;;  %v4193_v21 = vld [vmem:[#allocation2 + $0xb7] sm:$0x1]  ;;  %v4810_v29 = vunpack.c.l.b16 %v4697_v26 }
 0x2aa   : > { %4127 = vst [vmem:[#allocation2 + $0xc1] sm:$0xff] %v4094_v42  ;;  %v4266_v7 = vld [vmem:[#allocation2 + $0x90] sm:$0xff] }
 0x2ab   : > { %v3899_v15 = vadd.f32 %v3841_v5, %v3489_v0  ;;  %4928 = vmatmul.bf16.vlgmr.msrb.gmra.mxu2 %v4840_v11  ;;  %5748 = vmatmul.bf16.vlgmr.msrb.gmra.mxu0 %v10204_v60  ;;  %4211 = vst [vmem:[#allocation2 + $0xb9] sm:$0x1] %v4193_v21  ;;  %v4698_v5 = vpack.c.bf16 %v4666_v33, %v4666_v33 }
 0x2ac   : > { %5338 = vmatmul.bf16.vlgmr.msrb.gmra.mxu3 %v5250_v8  ;;  %v4298_v41 = vpack.c.bf16 %v4266_v7, %v4266_v7 }
 0x2ad   : > { %v3999_v37 = vadd.f32 %v10129_v45, %v3899_v15  ;;  %v4811_v61 = vunpack.c.l.b16 %v4698_v5  ;;  %v10325_v15 = vld [vmem:[%s11105_s2] ss:$0 sm:$0xff] }
 0x2ae   : > { %v3024_v30 = vpop.f32.mrf.mxu2  ;;  %v4410_v8 = vunpack.c.l.b16 %v4298_v41 }
 0x2af   : > { %vm4031_vm15 = vcmp.ge.f32.partialorder %v3999_v37, 0.0  ;;  %v4063_v40 = vmul.f32 0.01, %v3999_v37  ;;  %v3080_v25 = vadd.f32 %v3024_v30, %v10009_v2  ;;  %v3434_v32 = vpop.f32.mrf.mxu3  ;;  %v5107_v2 = vpack.c.bf16 %v5075_v23, %v5075_v23  ;;  %v5077_v23 = vld [vmem:[#allocation2 + $0x32] sm:$0xff] }
 0x2b0   : > { %v3846_v3 = vpop.f32.mrf.mxu0  ;;  %v4841_v21 = vpack.c.b16 %v4811_v61, %v4810_v29  ;;  %v2672_v61 = vadd.f32 %v10021_v20, %v10029_v9 }
 0x2b1   : > { %v10314_v11 = vsel %vm4031_vm15, %v3999_v37, %v4063_v40  ;;  %v3490_v60 = vadd.f32 %v3434_v32, %v3080_v25  ;;  %v4158_v31 = vld [vmem:[#allocation2 + $0xc2] sm:$0x1]  ;;  %v4668_v37 = vld [vmem:[#allocation2 + $0x39] sm:$0xff]  ;;  %v10329_v32 = vpack.c.b16 %v4411_v19, %v4410_v8 }
 0x2b2   : > { %4128 = vst [vmem:[#allocation2 + $0xc9] sm:$0xff] %v10314_v11  ;;  %v5078_v25 = vld [vmem:[#allocation2 + $0x3a] sm:$0xff]  ;;  %v4700_v5 = vpack.c.bf16 %v4668_v37, %v4668_v37 }
 0x2b3   : > { %4543 = vmatmul.bf16.gmra.mxu1 %v10312_v39  ;;  %v3900_v44 = vadd.f32 %v3844_v54, %v3490_v60  ;;  %4176 = vst [vmem:[#allocation2 + $0xc0] sm:$0x1] %v4158_v31  ;;  %v5220_v54 = vunpack.c.l.b16 %v5107_v2  ;;  %v5110_v52 = vpack.c.bf16 %v5078_v25, %v5078_v25  ;;  %v4699_v2 = vpack.c.bf16 %v4667_v10, %v4667_v10  ;;  %v9337_v8 = vld [vmem:[%s11106_s3 + $0x118] sm:$0xff] }
 0x2b4   : > { %v4813_v34 = vunpack.c.l.b16 %v4700_v5  ;;  %6154 = vmatpush.bf16.msrb.mxu1 %v9337_v8 }
 0x2b5   : > { %v4000_v48 = vadd.f32 %v10129_v45, %v3900_v44  ;;  %v5251_v18 = vpack.c.b16 %v5221_v43, %v5220_v54  ;;  %v4269_v43 = vld [vmem:[#allocation2 + $0xb0] sm:$0xff]  ;;  %v4812_v41 = vunpack.c.l.b16 %v4699_v2 }
 0x2b6   : > { %v3026_v46 = vpop.f32.mrf.mxu2 }
 0x2b7   : > { %vm4032_vm0 = vcmp.ge.f32.partialorder %v4000_v48, 0.0  ;;  %v4064_v53 = vmul.f32 0.01, %v4000_v48  ;;  %v3081_v12 = vadd.f32 %v3026_v46, %v2670_v49  ;;  %v3436_v22 = vpop.f32.mrf.mxu3  ;;  %v4268_v46 = vld [vmem:[#allocation2 + $0xa8] sm:$0xff] }
 0x2b8   : > { %v3849_v16 = vpop.f32.mrf.mxu0 }
 0x2b9   : > { %v4096_v42 = vsel %vm4032_vm0, %v4000_v48, %v4064_v53  ;;  %v3491_v0 = vadd.f32 %v3436_v22, %v3081_v12  ;;  %v4194_v56 = vld [vmem:[#allocation2 + $0xcf] sm:$0x1]  ;;  %v5223_v12 = vunpack.c.l.b16 %v5110_v52 }
 0x2ba   : > { %4129 = vst [vmem:[#allocation2 + $0xd9] sm:$0xff] %v4096_v42  ;;  %v5079_v52 = vld [vmem:[#allocation2 + $0x4a] sm:$0xff] }
 0x2bb   : > { %v3901_v45 = vadd.f32 %v3846_v3, %v3491_v0  ;;  %4933 = vmatmul.bf16.gmra.mxu2 %v4841_v21  ;;  %5753 = vmatmul.bf16.gmra.mxu0 %v10245_v62  ;;  %4212 = vst [vmem:[#allocation2 + $0xd1] sm:$0x1] %v4194_v56  ;;  %v4713_v3 = vpack.c.bf16 %v4096_v42, %v4096_v42 }
 0x2bc   : > { %5343 = vmatmul.bf16.gmra.mxu3 %v5251_v18  ;;  %v4300_v0 = vpack.c.bf16 %v4268_v46, %v4268_v46  ;;  %v4301_v21 = vpack.c.bf16 %v4269_v43, %v4269_v43  ;;  %v4842_v56 = vpack.c.b16 %v4813_v34, %v4812_v41  ;;  %v2674_v46 = vadd.f32 %v10038_v13, %v10043_v27 }
 0x2bd   : > { %v4001_v4 = vadd.f32 %v10325_v15, %v3901_v45  ;;  %v10332_v49 = vunpack.c.l.b16 %v4713_v3  ;;  %v5080_v3 = vld [vmem:[#allocation2 + $0x52] sm:$0xff] }
 0x2be   : > { %v3029_v57 = vpop.f32.mrf.mxu2 }
 0x2bf   : > { %vm4033_vm1 = vcmp.ge.f32.partialorder %v4001_v4, 0.0  ;;  %v4065_v30 = vmul.f32 0.01, %v4001_v4  ;;  %v3082_v33 = vadd.f32 %v3029_v57, %v10026_v6  ;;  %v3439_v40 = vpop.f32.mrf.mxu3  ;;  %v5109_v6 = vpack.c.bf16 %v5077_v23, %v5077_v23 }
 0x2c0   : > { %v3851_v62 = vpop.f32.mrf.mxu0  ;;  %v4413_v57 = vunpack.c.l.b16 %v4301_v21 }
 0x2c1   : > { %v4097_v58 = vsel %vm4033_vm1, %v4001_v4, %v4065_v30  ;;  %v3492_v60 = vadd.f32 %v3439_v40, %v3082_v33  ;;  %v4159_v31 = vld [vmem:[#allocation2 + $0xda] sm:$0x1]  ;;  %v5222_v42 = vunpack.c.l.b16 %v5109_v6  ;;  %v4412_v4 = vunpack.c.l.b16 %v4300_v0  ;;  %v4670_v33 = vld [vmem:[#allocation2 + $0x51] sm:$0xff] }
 0x2c2   : > { %4130 = vst [vmem:[#allocation2 + $0xe1] sm:$0xff] %v4097_v58  ;;  %v4714_v44 = vpack.c.bf16 %v4097_v58, %v4097_v58 }
 0x2c3   : > { %4548 = vmatmul.bf16.gmra.mxu1 %v10329_v32  ;;  %v3902_v26 = vadd.f32 %v3849_v16, %v3492_v60  ;;  %4177 = vst [vmem:[#allocation2 + $0xd8] sm:$0x1] %v4159_v31  ;;  %v5252_v45 = vpack.c.b16 %v5223_v12, %v5222_v42  ;;  %v4669_v60 = vld [vmem:[#allocation2 + $0x49] sm:$0xff]  ;;  %v4702_v31 = vpack.c.bf16 %v4670_v33, %v4670_v33  ;;  %v4270_v12 = vld [vmem:[#allocation2 + $0xc0] sm:$0xff] }
 0x2c4   : > { %v10334_v48 = vunpack.c.l.b16 %v4714_v44  ;;  %v4302_v13 = vpack.c.bf16 %v4270_v12, %v4270_v12 }
 0x2c5   : > { %v4002_v7 = vadd.f32 %v10325_v15, %v3902_v26  ;;  %v5112_v26 = vpack.c.bf16 %v5080_v3, %v5080_v3 }
 0x2c6   : > { %v3031_v53 = vpop.f32.mrf.mxu2  ;;  %v4849_v22 = vpack.c.b16 %v10334_v48, %v10332_v49 }
 0x2c7   : > { %vm4034_vm2 = vcmp.ge.f32.partialorder %v4002_v7, 0.0  ;;  %v4066_v29 = vmul.f32 0.01, %v4002_v7  ;;  %v3083_v16 = vadd.f32 %v3031_v53, %v2672_v61  ;;  %v3441_v54 = vpop.f32.mrf.mxu3  ;;  %v4701_v61 = vpack.c.bf16 %v4669_v60, %v4669_v60 }
 0x2c8   : > { %v3854_v1 = vpop.f32.mrf.mxu0  ;;  %v4815_v53 = vunpack.c.l.b16 %v4702_v31 }
 0x2c9   : > { %v4098_v20 = vsel %vm4034_vm2, %v4002_v7, %v4066_v29  ;;  %v3493_v9 = vadd.f32 %v3441_v54, %v3083_v16  ;;  %v4195_v18 = vld [vmem:[#allocation2 + $0xe7] sm:$0x1]  ;;  %v4271_v29 = vld [vmem:[#allocation2 + $0xc8] sm:$0xff]  ;;  %v5225_v54 = vunpack.c.l.b16 %v5112_v26 }
 0x2ca   : > { %4131 = vst [vmem:[#allocation2 + $0xf1] sm:$0xff] %v4098_v20  ;;  %v4303_v27 = vpack.c.bf16 %v4271_v29, %v4271_v29  ;;  %v11113_v29 = vld [vmem:[#allocation5_spill] sm:$0xff] }
 0x2cb   : > { %v3903_v19 = vadd.f32 %v3851_v62, %v3493_v9  ;;  %4938 = vmatmul.bf16.gmra.mxu2 %v4842_v56  ;;  %5758 = vmatmul.bf16.gmra.mxu0 %v10289_v24  ;;  %4213 = vst [vmem:[#allocation2 + $0xe9] sm:$0x1] %v4195_v18  ;;  %v10347_v62 = vpack.c.b16 %v4413_v57, %v4412_v4 }
 0x2cc   : > { %5348 = vmatmul.bf16.gmra.mxu3 %v5252_v45  ;;  %v4715_v24 = vpack.c.bf16 %v4098_v20, %v4098_v20  ;;  %v4814_v20 = vunpack.c.l.b16 %v4701_v61 }
 0x2cd   : > { %v4003_v37 = vadd.f32 %v10325_v15, %v3903_v19 }
 0x2ce   : > { %v3034_v30 = vpop.f32.mrf.mxu2  ;;  %v10350_v7 = vunpack.c.l.b16 %v4715_v24  ;;  %v4843_v8 = vpack.c.b16 %v4815_v53, %v4814_v20  ;;  %v4273_v20 = vld [vmem:[#allocation2 + $0xe0] sm:$0xff] }
 0x2cf   : > { %vm4035_vm3 = vcmp.ge.f32.partialorder %v4003_v37, 0.0  ;;  %v4067_v40 = vmul.f32 0.01, %v4003_v37  ;;  %v3084_v25 = vadd.f32 %v3034_v30, %v10040_v51  ;;  %v3444_v10 = vpop.f32.mrf.mxu3  ;;  %v5111_v51 = vpack.c.bf16 %v5079_v52, %v5079_v52 }
 0x2d0   : > { %v3856_v58 = vpop.f32.mrf.mxu0  ;;  %v4415_v30 = vunpack.c.l.b16 %v4303_v27 }
 0x2d1   : > { %v4099_v5 = vsel %vm4035_vm3, %v4003_v37, %v4067_v40  ;;  %v3494_v23 = vadd.f32 %v3444_v10, %v3084_v25  ;;  %v4160_v44 = vld [vmem:[#allocation2 + $0xf2] sm:$0x1]  ;;  %v5224_v56 = vunpack.c.l.b16 %v5111_v51  ;;  %v4414_v37 = vunpack.c.l.b16 %v4302_v13  ;;  %v4672_v25 = vld [vmem:[#allocation2 + $0x69] sm:$0xff] }
 0x2d2   : > { %4132 = vst [vmem:[#allocation2 + $0xf9] sm:$0xff] %v4099_v5  ;;  %v4716_v2 = vpack.c.bf16 %v4099_v5, %v4099_v5  ;;  %v5082_v5 = vld [vmem:[#allocation2 + $0x6a] sm:$0xff]  ;;  %v4704_v26 = vpack.c.bf16 %v4672_v25, %v4672_v25 }
 0x2d3   : > { %4553 = vmatmul.bf16.gmra.mxu1 %v10347_v62  ;;  %v3904_v6 = vadd.f32 %v3854_v1, %v3494_v23  ;;  %4178 = vst [vmem:[#allocation2 + $0xf0] sm:$0x1] %v4160_v44  ;;  %v10359_v1 = vpop.f32.mrf.mxu1  ;;  %v5253_v4 = vpack.c.b16 %v5225_v54, %v5224_v56  ;;  %v10366_v23 = vpack.c.b16 %v4415_v30, %v4414_v37 }
 0x2d4   : > { %v10352_v34 = vunpack.c.l.b16 %v4716_v2  ;;  %v5081_v2 = vld [vmem:[#allocation2 + $0x62] sm:$0xff]  ;;  %v5114_v61 = vpack.c.bf16 %v5082_v5, %v5082_v5  ;;  %v4305_v30 = vpack.c.bf16 %v4273_v20, %v4273_v20 }
 0x2d5   : > { %v4004_v43 = vadd.f32 %v10325_v15, %v3904_v6 }
 0x2d6   : > { %v3036_v16 = vpop.f32.mrf.mxu2  ;;  %v4850_v41 = vpack.c.b16 %v10352_v34, %v10350_v7  ;;  %v5227_v13 = vunpack.c.l.b16 %v5114_v61 }
 0x2d7   : > { %vm4036_vm4 = vcmp.ge.f32.partialorder %v4004_v43, 0.0  ;;  %v4068_v42 = vmul.f32 0.01, %v4004_v43  ;;  %v3085_v0 = vadd.f32 %v3036_v16, %v2674_v46  ;;  %v3446_v21 = vpop.f32.mrf.mxu3  ;;  %v11114_v16 = vld [vmem:[#allocation4_spill] sm:$0xff] }
 0x2d8   : > { %v3859_v9 = vpop.f32.mrf.mxu0  ;;  %v2676_v54 = vadd.f32 %v11114_v16, %v11113_v29 }
 0x2d9   : > { %v4100_v18 = vsel %vm4036_vm4, %v4004_v43, %v4068_v42  ;;  %v3495_v45 = vadd.f32 %v3446_v21, %v3085_v0  ;;  %v4196_v19 = vld [vmem:[#allocation2 + $0xff] sm:$0x1]  ;;  %v4817_v0 = vunpack.c.l.b16 %v4704_v26  ;;  %v4674_v26 = vld [vmem:[#allocation2 + $0x81] sm:$0xff] }
 0x2da   : > { %4133 = vst [vmem:[#allocation2 + $0x109] sm:$0xff] %v4100_v18  ;;  %v4717_v31 = vpack.c.bf16 %v4100_v18, %v4100_v18  ;;  %v4272_v21 = vld [vmem:[#allocation2 + $0xd8] sm:$0xff] }
 0x2db   : > { %v3905_v57 = vadd.f32 %v3856_v58, %v3495_v45  ;;  %4943 = vmatmul.bf16.gmra.mxu2 %v4843_v8  ;;  %5763 = vmatmul.bf16.gmra.mxu0 %v10297_v14  ;;  %4214 = vst [vmem:[#allocation2 + $0x101] sm:$0x1] %v4196_v19  ;;  %v4671_v14 = vld [vmem:[#allocation2 + $0x61] sm:$0xff]  ;;  %v4304_v37 = vpack.c.bf16 %v4272_v21, %v4272_v21 }
 0x2dc   : > { %5353 = vmatmul.bf16.gmra.mxu3 %v5253_v4  ;;  %v4703_v43 = vpack.c.bf16 %v4671_v14, %v4671_v14  ;;  %v10369_v53 = vunpack.c.l.b16 %v4717_v31  ;;  %v4417_v31 = vunpack.c.l.b16 %v4305_v30  ;;  %v4275_v30 = vld [vmem:[#allocation2 + $0xf8] sm:$0xff] }
 0x2dd   : > { %v4005_v33 = vadd.f32 %v10325_v15, %v3905_v57  ;;  %v4416_v14 = vunpack.c.l.b16 %v4304_v37  ;;  %v4274_v37 = vld [vmem:[#allocation2 + $0xf0] sm:$0xff] }
 0x2de   : > { %v3039_v40 = vpop.f32.mrf.mxu2  ;;  %v4816_v19 = vunpack.c.l.b16 %v4703_v43 }
 0x2df   : > { %vm4037_vm5 = vcmp.ge.f32.partialorder %v4005_v33, 0.0  ;;  %v4069_v10 = vmul.f32 0.01, %v4005_v33  ;;  %v3086_v60 = vadd.f32 %v3039_v40, %v10057_v47  ;;  %v3449_v24 = vpop.f32.mrf.mxu3  ;;  %v5113_v47 = vpack.c.bf16 %v5081_v2, %v5081_v2 }
 0x2e0   : > { %v10363_v3 = vpop.f32.mrf.mxu1  ;;  %v3861_v58 = vpop.f32.mrf.mxu0  ;;  %v4844_v25 = vpack.c.b16 %v4817_v0, %v4816_v19  ;;  %v10388_v43 = vpack.c.b16 %v4417_v31, %v4416_v14 }
 0x2e1   : > { %v4101_v52 = vsel %vm4037_vm5, %v4005_v33, %v4069_v10  ;;  %v3496_v44 = vadd.f32 %v3449_v24, %v3086_v60  ;;  %v4161_v6 = vld [vmem:[#allocation2 + $0x10a] sm:$0x1]  ;;  %v5226_v57 = vunpack.c.l.b16 %v5113_v47  ;;  %v9336_v24 = vld [vmem:[%s11106_s3 + $0x110] sm:$0xff] }
 0x2e2   : > { %4134 = vst [vmem:[#allocation2 + $0x111] sm:$0xff] %v4101_v52  ;;  %v4718_v51 = vpack.c.bf16 %v4101_v52, %v4101_v52  ;;  %6155 = vmatpush.bf16.msrb.mxu1 %v9336_v24 }
 0x2e3   : > { %4558 = vmatmul.bf16.gmra.mxu1 %v10366_v23  ;;  %v3906_v46 = vadd.f32 %v3859_v9, %v3496_v44  ;;  %4179 = vst [vmem:[#allocation2 + $0x108] sm:$0x1] %v4161_v6  ;;  %v5254_v60 = vpack.c.b16 %v5227_v13, %v5226_v57 }
 0x2e4   : > { %v10371_v12 = vunpack.c.l.b16 %v4718_v51 }
 0x2e5   : > { %v4006_v42 = vadd.f32 %v10325_v15, %v3906_v46 }
 0x2e6   : > { %v3041_v56 = vpop.f32.mrf.mxu2  ;;  %v4851_v9 = vpack.c.b16 %v10371_v12, %v10369_v53  ;;  %v9364_v12 = vld [vmem:[%s11106_s3 + $0x1f0] sm:$0xff] }
 0x2e7   : > { %vm4038_vm6 = vcmp.ge.f32.partialorder %v4006_v42, 0.0  ;;  %v4070_v27 = vmul.f32 0.01, %v4006_v42  ;;  %v3087_v45 = vadd.f32 %v3041_v56, %v2676_v54  ;;  %v3451_v8 = vpop.f32.mrf.mxu3  ;;  %v4706_v54 = vpack.c.bf16 %v4674_v26, %v4674_v26 }
 0x2e8   : > { %v10378_v18 = vpop.f32.mrf.mxu1  ;;  %v3864_v4 = vpop.f32.mrf.mxu0 }
 0x2e9   : > { %v4102_v33 = vsel %vm4038_vm6, %v4006_v42, %v4070_v27  ;;  %v3497_v40 = vadd.f32 %v3451_v8, %v3087_v45  ;;  %v4197_v10 = vld [vmem:[#allocation2 + $0x117] sm:$0x1]  ;;  %v5083_v42 = vld [vmem:[#allocation2 + $0x7a] sm:$0xff]  ;;  %v2678_v8 = vadd.f32 %v10069_v63, %v10074_v59  ;;  %v4819_v57 = vunpack.c.l.b16 %v4706_v54  ;;  %v5095_v7 = vld [vmem:[#allocation2 + $0x10a] sm:$0xff] }
 0x2ea   : > { %4135 = vst [vmem:[#allocation2 + $0x121] sm:$0xff] %v4102_v33  ;;  %v4719_v47 = vpack.c.bf16 %v4102_v33, %v4102_v33  ;;  %v4306_v63 = vpack.c.bf16 %v4274_v37, %v4274_v37  ;;  %v4307_v59 = vpack.c.bf16 %v4275_v30, %v4275_v30 }
 0x2eb   : > { %v3907_v5 = vadd.f32 %v3861_v58, %v3497_v40  ;;  %4948 = vmatmul.bf16.gmra.mxu2 %v4844_v25  ;;  %5768 = vmatmul.bf16.gmra.mxu0 %v10312_v39  ;;  %4215 = vst [vmem:[#allocation2 + $0x119] sm:$0x1] %v4197_v10  ;;  %v5084_v58 = vld [vmem:[#allocation2 + $0x82] sm:$0xff]  ;;  %v4673_v39 = vld [vmem:[#allocation2 + $0x79] sm:$0xff] }
 0x2ec   : > { %5358 = vmatmul.bf16.gmra.mxu3 %v5254_v60  ;;  %v5116_v21 = vpack.c.bf16 %v5084_v58, %v5084_v58  ;;  %v4705_v13 = vpack.c.bf16 %v4673_v39, %v4673_v39  ;;  %v10391_v27 = vunpack.c.l.b16 %v4719_v47  ;;  %v4418_v58 = vunpack.c.l.b16 %v4306_v63 }
 0x2ed   : > { %v4007_v52 = vadd.f32 %v10325_v15, %v3907_v5  ;;  %v4419_v39 = vunpack.c.l.b16 %v4307_v59 }
 0x2ee   : > { %v3044_v44 = vpop.f32.mrf.mxu2  ;;  %v5229_v40 = vunpack.c.l.b16 %v5116_v21  ;;  %v4818_v5 = vunpack.c.l.b16 %v4705_v13 }
 0x2ef   : > { %vm4039_vm7 = vcmp.ge.f32.partialorder %v4007_v52, 0.0  ;;  %v4071_v2 = vmul.f32 0.01, %v4007_v52  ;;  %v3088_v61 = vadd.f32 %v3044_v44, %v10071_v38  ;;  %v3454_v51 = vpop.f32.mrf.mxu3  ;;  %v5115_v38 = vpack.c.bf16 %v5083_v42, %v5083_v42 }
 0x2f0   : > { %v10385_v6 = vpop.f32.mrf.mxu1  ;;  %v3866_v46 = vpop.f32.mrf.mxu0  ;;  %v4845_v26 = vpack.c.b16 %v4819_v57, %v4818_v5  ;;  %v5085_v57 = vld [vmem:[#allocation2 + $0x92] sm:$0xff]  ;;  %v11115_v5 = vld [vmem:[#allocation7_spill] sm:$0xff] }
 0x2f1   : > { %v4103_v29 = vsel %vm4039_vm7, %v4007_v52, %v4071_v2  ;;  %v3498_v16 = vadd.f32 %v3454_v51, %v3088_v61  ;;  %v4162_v0 = vld [vmem:[#allocation2 + $0x122] sm:$0x1]  ;;  %v5228_v31 = vunpack.c.l.b16 %v5115_v38 }
 0x2f2   : > { %4136 = vst [vmem:[#allocation2 + $0x129] sm:$0xff] %v4103_v29  ;;  %v4720_v20 = vpack.c.bf16 %v4103_v29, %v4103_v29 }
 0x2f3   : > { %4563 = vmatmul.bf16.gmra.mxu1 %v10388_v43  ;;  %v3908_v56 = vadd.f32 %v3864_v4, %v3498_v16  ;;  %4180 = vst [vmem:[#allocation2 + $0x120] sm:$0x1] %v4162_v0  ;;  %v5255_v61 = vpack.c.b16 %v5229_v40, %v5228_v31  ;;  %v4676_v16 = vld [vmem:[#allocation2 + $0x99] sm:$0xff] }
 0x2f4   : > { %v10393_v45 = vunpack.c.l.b16 %v4720_v20  ;;  %v5086_v20 = vld [vmem:[#allocation2 + $0x9a] sm:$0xff] }
 0x2f5   : > { %v4008_v19 = vadd.f32 %v10325_v15, %v3908_v56  ;;  %v10407_v56 = vpack.c.b16 %v4419_v39, %v4418_v58  ;;  %v5118_v30 = vpack.c.bf16 %v5086_v20, %v5086_v20  ;;  %v11116_v31 = vld [vmem:[#allocation6_spill] sm:$0xff] }
 0x2f6   : > { %v3046_v33 = vpop.f32.mrf.mxu2  ;;  %v4852_v4 = vpack.c.b16 %v10393_v45, %v10391_v27  ;;  %v2680_v63 = vadd.f32 %v11116_v31, %v11115_v5 }
 0x2f7   : > { %vm4040_vm8 = vcmp.ge.f32.partialorder %v4008_v19, 0.0  ;;  %v4072_v25 = vmul.f32 0.01, %v4008_v19  ;;  %v3089_v60 = vadd.f32 %v3046_v33, %v2678_v8  ;;  %v3456_v24 = vpop.f32.mrf.mxu3 }
 0x2f8   : > { %v10400_v10 = vpop.f32.mrf.mxu1  ;;  %v3869_v14 = vpop.f32.mrf.mxu0 }
 0x2f9   : > { %v4104_v52 = vsel %vm4040_vm8, %v4008_v19, %v4072_v25  ;;  %v3499_v44 = vadd.f32 %v3456_v24, %v3089_v60  ;;  %v4198_v2 = vld [vmem:[#allocation2 + $0x12f] sm:$0x1]  ;;  %v4708_v19 = vpack.c.bf16 %v4676_v16, %v4676_v16  ;;  %v5097_v53 = vld [vmem:[#allocation2 + $0x122] sm:$0xff] }
 0x2fa   : > { %4137 = vst [vmem:[#allocation2 + $0x139] sm:$0xff] %v4104_v52  ;;  %v4721_v13 = vpack.c.bf16 %v4104_v52, %v4104_v52 }
 0x2fb   : > { %v3909_v51 = vadd.f32 %v3866_v46, %v3499_v44  ;;  %4953 = vmatmul.bf16.gmra.mxu2 %v4845_v26  ;;  %5773 = vmatmul.bf16.gmra.mxu0 %v10329_v32  ;;  %4216 = vst [vmem:[#allocation2 + $0x131] sm:$0x1] %v4198_v2  ;;  %v4675_v32 = vld [vmem:[#allocation2 + $0x91] sm:$0xff]  ;;  %v4821_v52 = vunpack.c.l.b16 %v4708_v19  ;;  %v4276_v44 = vld [vmem:[#allocation2 + $0x108] sm:$0xff] }
 0x2fc   : > { %5363 = vmatmul.bf16.gmra.mxu3 %v5255_v61  ;;  %v4707_v25 = vpack.c.bf16 %v4675_v32, %v4675_v32  ;;  %v10410_v60 = vunpack.c.l.b16 %v4721_v13  ;;  %v4277_v26 = vld [vmem:[#allocation2 + $0x110] sm:$0xff]  ;;  %v5231_v61 = vunpack.c.l.b16 %v5118_v30  ;;  %v9335_v19 = vld [vmem:[%s11106_s3 + $0x108] sm:$0xff] }
 0x2fd   : > { %v4009_v47 = vadd.f32 %v10325_v15, %v3909_v51  ;;  %6156 = vmatpush.bf16.msrb.mxu1 %v9335_v19  ;;  %v4279_v19 = vld [vmem:[#allocation2 + $0x128] sm:$0xff] }
 0x2fe   : > { %v3049_v29 = vpop.f32.mrf.mxu2 }
 0x2ff   : > { %vm4041_vm9 = vcmp.ge.f32.partialorder %v4009_v47, 0.0  ;;  %v4073_v54 = vmul.f32 0.01, %v4009_v47  ;;  %v3090_v0 = vadd.f32 %v3049_v29, %v10088_v28  ;;  %v3459_v21 = vpop.f32.mrf.mxu3  ;;  %v5117_v28 = vpack.c.bf16 %v5085_v57, %v5085_v57 }
 0x300   : > { %v10404_v42 = vpop.f32.mrf.mxu1  ;;  %v3871_v46 = vpop.f32.mrf.mxu0  ;;  %v4820_v29 = vunpack.c.l.b16 %v4707_v25  ;;  %v4678_v25 = vld [vmem:[#allocation2 + $0xb1] sm:$0xff] }
 0x301   : > { %v4105_v38 = vsel %vm4041_vm9, %v4009_v47, %v4073_v54  ;;  %v3500_v8 = vadd.f32 %v3459_v21, %v3090_v0  ;;  %v4163_v37 = vld [vmem:[#allocation2 + $0x13a] sm:$0x1]  ;;  %v5230_v54 = vunpack.c.l.b16 %v5117_v28  ;;  %v4308_v0 = vpack.c.bf16 %v4276_v44, %v4276_v44 }
 0x302   : > { %4138 = vst [vmem:[#allocation2 + $0x141] sm:$0xff] %v4105_v38  ;;  %v4722_v33 = vpack.c.bf16 %v4105_v38, %v4105_v38  ;;  %v4309_v21 = vpack.c.bf16 %v4277_v26, %v4277_v26  ;;  %v4846_v13 = vpack.c.b16 %v4821_v52, %v4820_v29 }
 0x303   : > { %4568 = vmatmul.bf16.gmra.mxu1 %v10407_v56  ;;  %v3910_v40 = vadd.f32 %v3869_v14, %v3500_v8  ;;  %4181 = vst [vmem:[#allocation2 + $0x138] sm:$0x1] %v4163_v37  ;;  %v5256_v8 = vpack.c.b16 %v5231_v61, %v5230_v54  ;;  %v4420_v37 = vunpack.c.l.b16 %v4308_v0  ;;  %v4710_v61 = vpack.c.bf16 %v4678_v25, %v4678_v25 }
 0x304   : > { %v10412_v24 = vunpack.c.l.b16 %v4722_v33  ;;  %v4421_v30 = vunpack.c.l.b16 %v4309_v21 }
 0x305   : > { %v4010_v59 = vadd.f32 %v10325_v15, %v3910_v40 }
 0x306   : > { %v3051_v2 = vpop.f32.mrf.mxu2  ;;  %v4853_v14 = vpack.c.b16 %v10412_v24, %v10410_v60  ;;  %v10429_v52 = vpack.c.b16 %v4421_v30, %v4420_v37  ;;  %v9361_v60 = vld [vmem:[%s11106_s3 + $0x1d8] sm:$0xff] }
 0x307   : > { %vm4042_vm10 = vcmp.ge.f32.partialorder %v4010_v59, 0.0  ;;  %v4074_v51 = vmul.f32 0.01, %v4010_v59  ;;  %v3091_v39 = vadd.f32 %v3051_v2, %v2680_v63  ;;  %v3461_v47 = vpop.f32.mrf.mxu3 }
 0x308   : > { %v10419_v58 = vpop.f32.mrf.mxu1  ;;  %v3874_v16 = vpop.f32.mrf.mxu0 }
 0x309   : > { %v4106_v20 = vsel %vm4042_vm10, %v4010_v59, %v4074_v51  ;;  %v3501_v32 = vadd.f32 %v3461_v47, %v3091_v39  ;;  %v4199_v38 = vld [vmem:[#allocation2 + $0x147] sm:$0x1]  ;;  %v5087_v51 = vld [vmem:[#allocation2 + $0xaa] sm:$0xff]  ;;  %v5099_v27 = vld [vmem:[#allocation2 + $0x13a] sm:$0xff] }
 0x30a   : > { %4139 = vst [vmem:[#allocation2 + $0x151] sm:$0xff] %v4106_v20  ;;  %v4723_v44 = vpack.c.bf16 %v4106_v20, %v4106_v20  ;;  %v2682_v20 = vadd.f32 %v10103_v55, %v10105_v17  ;;  %v4311_v17 = vpack.c.bf16 %v4279_v19, %v4279_v19 }
 0x30b   : > { %v3911_v57 = vadd.f32 %v3871_v46, %v3501_v32  ;;  %4958 = vmatmul.bf16.gmra.mxu2 %v4846_v13  ;;  %5778 = vmatmul.bf16.gmra.mxu0 %v10347_v62  ;;  %4217 = vst [vmem:[#allocation2 + $0x149] sm:$0x1] %v4199_v38  ;;  %v5088_v46 = vld [vmem:[#allocation2 + $0xb2] sm:$0xff]  ;;  %v4677_v62 = vld [vmem:[#allocation2 + $0xa9] sm:$0xff]  ;;  %v4823_v38 = vunpack.c.l.b16 %v4710_v61 }
 0x30c   : > { %5368 = vmatmul.bf16.gmra.mxu3 %v5256_v8  ;;  %v5120_v47 = vpack.c.bf16 %v5088_v46, %v5088_v46  ;;  %v4709_v0 = vpack.c.bf16 %v4677_v62, %v4677_v62  ;;  %v10432_v21 = vunpack.c.l.b16 %v4723_v44  ;;  %v4278_v8 = vld [vmem:[#allocation2 + $0x120] sm:$0xff] }
 0x30d   : > { %v4011_v33 = vadd.f32 %v10325_v15, %v3911_v57  ;;  %v4310_v55 = vpack.c.bf16 %v4278_v8, %v4278_v8 }
 0x30e   : > { %v3054_v40 = vpop.f32.mrf.mxu2  ;;  %v5233_v37 = vunpack.c.l.b16 %v5120_v47 }
 0x30f   : > { %vm4043_vm11 = vcmp.ge.f32.partialorder %v4011_v33, 0.0  ;;  %v4075_v28 = vmul.f32 0.01, %v4011_v33  ;;  %v3092_v31 = vadd.f32 %v3054_v40, %v10100_v50  ;;  %v3464_v63 = vpop.f32.mrf.mxu3  ;;  %v5119_v50 = vpack.c.bf16 %v5087_v51, %v5087_v51 }
 0x310   : > { %v10426_v5 = vpop.f32.mrf.mxu1  ;;  %v3876_v59 = vpop.f32.mrf.mxu0  ;;  %v4422_v51 = vunpack.c.l.b16 %v4310_v55 }
 0x311   : > { %v4107_v26 = vsel %vm4043_vm11, %v4011_v33, %v4075_v28  ;;  %v3502_v2 = vadd.f32 %v3464_v63, %v3092_v31  ;;  %v4164_v39 = vld [vmem:[#allocation2 + $0x152] sm:$0x1]  ;;  %v4822_v28 = vunpack.c.l.b16 %v4709_v0  ;;  %v5232_v63 = vunpack.c.l.b16 %v5119_v50 }
 0x312   : > { %4140 = vst [vmem:[#allocation2 + $0x159] sm:$0xff] %v4107_v26  ;;  %v4724_v29 = vpack.c.bf16 %v4107_v26, %v4107_v26 }
 0x313   : > { %4573 = vmatmul.bf16.gmra.mxu1 %v10429_v52  ;;  %v3912_v54 = vadd.f32 %v3874_v16, %v3502_v2  ;;  %4182 = vst [vmem:[#allocation2 + $0x150] sm:$0x1] %v4164_v39  ;;  %v4847_v44 = vpack.c.b16 %v4823_v38, %v4822_v28  ;;  %v5257_v2 = vpack.c.b16 %v5233_v37, %v5232_v63  ;;  %v4423_v39 = vunpack.c.l.b16 %v4311_v17  ;;  %v5090_v38 = vld [vmem:[#allocation2 + $0xca] sm:$0xff] }
 0x314   : > { %v10434_v32 = vunpack.c.l.b16 %v4724_v29  ;;  %v5122_v28 = vpack.c.bf16 %v5090_v38, %v5090_v38 }
 0x315   : > { %v4012_v13 = vadd.f32 %v10325_v15, %v3912_v54  ;;  %v4679_v54 = vld [vmem:[#allocation2 + $0xc1] sm:$0xff]  ;;  %v10448_v8 = vpack.c.b16 %v4423_v39, %v4422_v51 }
 0x316   : > { %v3056_v57 = vpop.f32.mrf.mxu2  ;;  %v4854_v16 = vpack.c.b16 %v10434_v32, %v10432_v21  ;;  %v4711_v37 = vpack.c.bf16 %v4679_v54, %v4679_v54  ;;  %v4281_v51 = vld [vmem:[#allocation2 + $0x140] sm:$0xff] }
 0x317   : > { %vm4044_vm12 = vcmp.ge.f32.partialorder %v4012_v13, 0.0  ;;  %v4076_v30 = vmul.f32 0.01, %v4012_v13  ;;  %v3093_v40 = vadd.f32 %v3056_v57, %v2682_v20  ;;  %v3466_v25 = vpop.f32.mrf.mxu3 }
 0x318   : > { %v10441_v33 = vpop.f32.mrf.mxu1  ;;  %v3879_v31 = vpop.f32.mrf.mxu0 }
 0x319   : > { %v4108_v46 = vsel %vm4044_vm12, %v4012_v13, %v4076_v30  ;;  %v3503_v62 = vadd.f32 %v3466_v25, %v3093_v40  ;;  %v4200_v26 = vld [vmem:[#allocation2 + $0x15f] sm:$0x1]  ;;  %v4712_v30 = vpack.c.bf16 %v10314_v11, %v10314_v11  ;;  %v5089_v40 = vld [vmem:[#allocation2 + $0xc2] sm:$0xff]  ;;  %v2684_v11 = vadd.f32 %v10359_v1, %v10117_v35 }
 0x31a   : > { %4141 = vst [vmem:[#allocation2 + $0x169] sm:$0xff] %v4108_v46  ;;  %v5121_v17 = vpack.c.bf16 %v5089_v40, %v5089_v40 }
 0x31b   : > { %4148 = vst [vmem:[#allocation2 + $0x199] sm:$0xff] %v4108_v46  ;;  %v3913_v61 = vadd.f32 %v3876_v59, %v3503_v62  ;;  %4963 = vmatmul.bf16.gmra.mxu2 %v4847_v44  ;;  %5783 = vmatmul.bf16.gmra.mxu0 %v10366_v23  ;;  %v4725_v23 = vpack.c.bf16 %v4108_v46, %v4108_v46 }
 0x31c   : > { %5373 = vmatmul.bf16.gmra.mxu3 %v5257_v2  ;;  %4218 = vst [vmem:[#allocation2 + $0x161] sm:$0x1] %v4200_v26  ;;  %v4824_v26 = vunpack.c.l.b16 %v4711_v37  ;;  %v4825_v2 = vunpack.c.l.b16 %v4712_v30  ;;  %v5234_v35 = vunpack.c.l.b16 %v5121_v17 }
 0x31d   : > { %v4013_v47 = vadd.f32 %v10325_v15, %v3913_v61  ;;  %v10456_v46 = vunpack.c.l.b16 %v4725_v23  ;;  %v4280_v61 = vld [vmem:[#allocation2 + $0x138] sm:$0xff]  ;;  %v4313_v23 = vpack.c.bf16 %v4281_v51, %v4281_v51 }
 0x31e   : > { %v3059_v29 = vpop.f32.mrf.mxu2  ;;  %v4312_v1 = vpack.c.bf16 %v4280_v61, %v4280_v61  ;;  %v4848_v37 = vpack.c.b16 %v4825_v2, %v4824_v26  ;;  %v5092_v2 = vld [vmem:[#allocation2 + $0xe2] sm:$0xff] }
 0x31f   : > { %vm4045_vm13 = vcmp.ge.f32.partialorder %v4013_v47, 0.0  ;;  %v4077_v0 = vmul.f32 0.01, %v4013_v47  ;;  %v3094_v20 = vadd.f32 %v3059_v29, %v10114_v36  ;;  %v3469_v13 = vpop.f32.mrf.mxu3  ;;  %v9334_v36 = vld [vmem:[%s11106_s3 + $0x100] sm:$0xff] }
 0x320   : > { %v10445_v50 = vpop.f32.mrf.mxu1  ;;  %v3881_v59 = vpop.f32.mrf.mxu0  ;;  %6157 = vmatpush.bf16.msrb.mxu1 %v9334_v36  ;;  %v4425_v36 = vunpack.c.l.b16 %v4313_v23 }
 0x321   : > { %v4109_v19 = vsel %vm4045_vm13, %v4013_v47, %v4077_v0  ;;  %v3504_v57 = vadd.f32 %v3469_v13, %v3094_v20  ;;  %v4165_v25 = vld [vmem:[#allocation2 + $0x16a] sm:$0x1]  ;;  %v5235_v47 = vunpack.c.l.b16 %v5122_v28  ;;  %v4424_v28 = vunpack.c.l.b16 %v4312_v1 }
 0x322   : > { %4142 = vst [vmem:[#allocation2 + $0x171] sm:$0xff] %v4109_v19  ;;  %v4726_v63 = vpack.c.bf16 %v4109_v19, %v4109_v19  ;;  %v4167_v13 = vld [vmem:[#allocation2 + $0x19a] sm:$0x1] }
 0x323   : > { %4578 = vmatmul.bf16.gmra.mxu1 %v10448_v8  ;;  %4149 = vst [vmem:[#allocation2 + $0x1a1] sm:$0xff] %v4109_v19  ;;  %v3914_v55 = vadd.f32 %v3879_v31, %v3504_v57  ;;  %v5258_v40 = vpack.c.b16 %v5235_v47, %v5234_v35  ;;  %v10472_v61 = vpack.c.b16 %v4425_v36, %v4424_v28  ;;  %v4283_v35 = vld [vmem:[#allocation2 + $0x158] sm:$0xff] }
 0x324   : > { %4183 = vst [vmem:[#allocation2 + $0x168] sm:$0x1] %v4165_v25  ;;  %v10458_v62 = vunpack.c.l.b16 %v4726_v63  ;;  %v4315_v28 = vpack.c.bf16 %v4283_v35, %v4283_v35 }
 0x325   : > { %v4014_v44 = vadd.f32 %v10325_v15, %v3914_v55  ;;  %4185 = vst [vmem:[#allocation2 + $0x198] sm:$0x1] %v4167_v13  ;;  %v4282_v13 = vld [vmem:[#allocation2 + $0x150] sm:$0xff] }
 0x326   : > { %v3061_v39 = vpop.f32.mrf.mxu2  ;;  %v4855_v31 = vpack.c.b16 %v10458_v62, %v10456_v46  ;;  %v6303_v46 = vld [vmem:[#allocation2 + $0x1a] sm:$0xff] }
 0x327   : > { %vm4046_vm14 = vcmp.ge.f32.partialorder %v4014_v44, 0.0  ;;  %v4078_v29 = vmul.f32 0.01, %v4014_v44  ;;  %v3095_v0 = vadd.f32 %v3061_v39, %v2684_v11  ;;  %v3471_v20 = vpop.f32.mrf.mxu3  ;;  %v5091_v39 = vld [vmem:[#allocation2 + $0xda] sm:$0xff] }
 0x328   : > { %v10465_v54 = vpop.f32.mrf.mxu1  ;;  %v5749_v38 = vpop.f32.mrf.mxu0 }
 0x329   : > { %v4110_v19 = vsel %vm4046_vm14, %v4014_v44, %v4078_v29  ;;  %v3505_v57 = vadd.f32 %v3471_v20, %v3095_v0  ;;  %v4201_v30 = vld [vmem:[#allocation2 + $0x177] sm:$0x1]  ;;  %v9349_v0 = vld [vmem:[%s11106_s3 + $0x178] sm:$0xff]  ;;  %v5123_v20 = vpack.c.bf16 %v5091_v39, %v5091_v39 }
 0x32a   : > { %4143 = vst [vmem:[#allocation2 + $0x181] sm:$0xff] %v4110_v19  ;;  %v4203_v29 = vld [vmem:[#allocation2 + $0x1a7] sm:$0x1]  ;;  %6560 = vmatpush.bf16.msra.mxu2 %v9349_v0 }
 0x32b   : > { %v3915_v25 = vadd.f32 %v3881_v59, %v3505_v57  ;;  %4968 = vmatmul.bf16.gmra.mxu2 %v4848_v37  ;;  %5788 = vmatmul.bf16.gmra.mxu0 %v10388_v43  ;;  %4219 = vst [vmem:[#allocation2 + $0x179] sm:$0x1] %v4201_v30  ;;  %v4284_v0 = vld [vmem:[#allocation2 + $0x168] sm:$0xff] }
 0x32c   : > { %5378 = vmatmul.bf16.gmra.mxu3 %v5258_v40  ;;  %4221 = vst [vmem:[#allocation2 + $0x1a9] sm:$0x1] %v4203_v29  ;;  %v5236_v40 = vunpack.c.l.b16 %v5123_v20  ;;  %v4285_v20 = vld [vmem:[#allocation2 + $0x170] sm:$0xff] }
 0x32d   : > { %v4015_v63 = vadd.f32 %v10325_v15, %v3915_v25  ;;  %v5124_v15 = vpack.c.bf16 %v5092_v2, %v5092_v2  ;;  %v4314_v25 = vpack.c.bf16 %v4282_v13, %v4282_v13 }
 0x32e   : > { %v4929_v55 = vpop.f32.mrf.mxu2 }
 0x32f   : > { %vm4047_vm15 = vcmp.ge.f32.partialorder %v4015_v63, 0.0  ;;  %v4079_v17 = vmul.f32 0.01, %v4015_v63  ;;  %v5009_v44 = vadd.f32 %v4929_v55, %v10363_v3  ;;  %v5339_v26 = vpop.f32.mrf.mxu3  ;;  %v5237_v23 = vunpack.c.l.b16 %v5124_v15 }
 0x330   : > { %v10469_v11 = vpop.f32.mrf.mxu1  ;;  %v5751_v59 = vpop.f32.mrf.mxu0 }
 0x331   : > { %v4111_v51 = vsel %vm4047_vm15, %v4015_v63, %v4079_v17  ;;  %v5419_v43 = vadd.f32 %v5339_v26, %v5009_v44  ;;  %v4166_v47 = vld [vmem:[#allocation2 + $0x182] sm:$0x1]  ;;  %v5259_v63 = vpack.c.b16 %v5237_v23, %v5236_v40  ;;  %v4427_v17 = vunpack.c.l.b16 %v4315_v28 }
 0x332   : > { %4144 = vst [vmem:[#allocation2 + $0x189] sm:$0xff] %v4111_v51  ;;  %v4317_v28 = vpack.c.bf16 %v4285_v20, %v4285_v20  ;;  %v5104_v21 = vld [vmem:[#allocation2 + $0x172] sm:$0xff] }
 0x333   : > { %4583 = vmatmul.bf16.gmra.mxu1 %v10472_v61  ;;  %4184 = vst [vmem:[#allocation2 + $0x180] sm:$0x1] %v4166_v47  ;;  %v10478_v3 = vadd.f32 %v5749_v38, %v5419_v43  ;;  %v9357_v38 = vld [vmem:[%s11106_s3 + $0x1b8] sm:$0xff] }
 0x334   : > { %6971 = vmatpush.bf16.msra.mxu3 %v9357_v38  ;;  %v5094_v43 = vld [vmem:[#allocation2 + $0xfa] sm:$0xff] }
 0x336   : > { %v4931_v1 = vpop.f32.mrf.mxu2 }
 0x337   : > { %v5010_v57 = vadd.f32 %v4931_v1, %v10378_v18  ;;  %v5341_v37 = vpop.f32.mrf.mxu3  ;;  %v4426_v18 = vunpack.c.l.b16 %v4314_v25  ;;  %v4316_v25 = vpack.c.bf16 %v4284_v0, %v4284_v0  ;;  %v5893_v0 = vld [vmem:[#allocation2 + $0x19] sm:$0xff] }
 0x338   : > { %v10480_v19 = vpop.f32.mrf.mxu1  ;;  %v5754_v30 = vpop.f32.mrf.mxu0 }
 0x339   : > { %v5420_v36 = vadd.f32 %v5341_v37, %v5010_v57  ;;  %v4202_v39 = vld [vmem:[#allocation2 + $0x18f] sm:$0x1]  ;;  %v10495_v47 = vpack.c.b16 %v4427_v17, %v4426_v18  ;;  %v4429_v18 = vunpack.c.l.b16 %v4317_v28 }
 0x33a   : > { %4220 = vst [vmem:[#allocation2 + $0x191] sm:$0x1] %v4202_v39 }
 0x33b   : > { %4973 = vmatmul.bf16.gmra.mxu2 %v4849_v22  ;;  %5793 = vmatmul.bf16.gmra.mxu0 %v10407_v56  ;;  %v10490_v55 = vadd.f32 %v5751_v59, %v5420_v36  ;;  %v5093_v22 = vld [vmem:[#allocation2 + $0xf2] sm:$0xff]  ;;  %v5126_v59 = vpack.c.bf16 %v5094_v43, %v5094_v43 }
 0x33c   : > { %5383 = vmatmul.bf16.gmra.mxu3 %v5259_v63  ;;  %v9365_v56 = vld [vmem:[%s11106_s3 + $0x1f8] sm:$0xff]  ;;  %v5125_v15 = vpack.c.bf16 %v5093_v22, %v5093_v22  ;;  %v4428_v63 = vunpack.c.l.b16 %v4316_v25  ;;  %v5894_v22 = vld [vmem:[#allocation2 + $0x21] sm:$0xff] }
 0x33d   : > { %7381 = vmatpush.bf16.msra.mxu0 %v9365_v56  ;;  %v5239_v35 = vunpack.c.l.b16 %v5126_v59 }
 0x33e   : > { %v4934_v44 = vpop.f32.mrf.mxu2  ;;  %v5238_v40 = vunpack.c.l.b16 %v5125_v15  ;;  %v10518_v43 = vpack.c.b16 %v4429_v18, %v4428_v63 }
 0x33f   : > { %v5011_v2 = vadd.f32 %v4934_v44, %v10385_v6  ;;  %v5344_v51 = vpop.f32.mrf.mxu3  ;;  %v9373_v6 = vld [vmem:[%s11106_s3 + $0x238] sm:$0xff] }
 0x340   : > { %v10492_v26 = vpop.f32.mrf.mxu1  ;;  %v5756_v49 = vpop.f32.mrf.mxu0  ;;  %7791 = vmatpush.bf16.msra.mxu1 %v9373_v6  ;;  %v5260_v38 = vpack.c.b16 %v5239_v35, %v5238_v40  ;;  %v5926_v35 = vpack.c.bf16 %v5894_v22, %v5894_v22  ;;  %v5925_v40 = vpack.c.bf16 %v5893_v0, %v5893_v0 }
 0x341   : > { %v5421_v48 = vadd.f32 %v5344_v51, %v5011_v2  ;;  %v5096_v51 = vld [vmem:[#allocation2 + $0x112] sm:$0xff]  ;;  %7382 = vmatpush.bf16.msra.mxu0 %v9364_v12 }
 0x342   : > { %v5128_v34 = vpack.c.bf16 %v5096_v51, %v5096_v51 }
 0x343   : > { %4588 = vmatmul.bf16.gmra.mxu1 %v10495_v47  ;;  %v10504_v29 = vadd.f32 %v5754_v30, %v5421_v48 }
 0x344   : > { %v5241_v56 = vunpack.c.l.b16 %v5128_v34 }
 0x346   : > { %v4936_v13 = vpop.f32.mrf.mxu2 }
 0x347   : > { %v5012_v23 = vadd.f32 %v4936_v13, %v10400_v10  ;;  %v5346_v57 = vpop.f32.mrf.mxu3 }
 0x348   : > { %v10506_v1 = vpop.f32.mrf.mxu1  ;;  %v5759_v37 = vpop.f32.mrf.mxu0 }
 0x349   : > { %v5422_v36 = vadd.f32 %v5346_v57, %v5012_v23  ;;  %v9356_v57 = vld [vmem:[%s11106_s3 + $0x1b0] sm:$0xff] }
 0x34a   : > { %6972 = vmatpush.bf16.msra.mxu3 %v9356_v57 }
 0x34b   : > { %4978 = vmatmul.bf16.gmra.mxu2 %v4850_v41  ;;  %5798 = vmatmul.bf16.gmra.mxu0 %v10429_v52  ;;  %v10513_v30 = vadd.f32 %v5756_v49, %v5422_v36  ;;  %v9348_v41 = vld [vmem:[%s11106_s3 + $0x170] sm:$0xff]  ;;  %v5127_v49 = vpack.c.bf16 %v5095_v7, %v5095_v7  ;;  %v6038_v36 = vunpack.c.l.b16 %v5925_v40 }
 0x34c   : > { %5388 = vmatmul.bf16.gmra.mxu3 %v5260_v38  ;;  %6561 = vmatpush.bf16.msra.mxu2 %v9348_v41 }
 0x34d   : > { %v5240_v13 = vunpack.c.l.b16 %v5127_v49 }
 0x34e   : > { %v4939_v17 = vpop.f32.mrf.mxu2 }
 0x34f   : > { %v5013_v44 = vadd.f32 %v4939_v17, %v10404_v42  ;;  %v5349_v2 = vpop.f32.mrf.mxu3  ;;  %v5098_v17 = vld [vmem:[#allocation2 + $0x12a] sm:$0xff] }
 0x350   : > { %v10515_v10 = vpop.f32.mrf.mxu1  ;;  %v5761_v39 = vpop.f32.mrf.mxu0 }
 0x351   : > { %v5423_v48 = vadd.f32 %v5349_v2, %v5013_v44 }
 0x353   : > { %4593 = vmatmul.bf16.gmra.mxu1 %v10518_v43  ;;  %v10524_v52 = vadd.f32 %v5759_v37, %v5423_v48  ;;  %v5261_v37 = vpack.c.b16 %v5241_v56, %v5240_v13  ;;  %v5896_v48 = vld [vmem:[#allocation2 + $0x39] sm:$0xff] }
 0x356   : > { %v4941_v42 = vpop.f32.mrf.mxu2 }
 0x357   : > { %v5014_v6 = vadd.f32 %v4941_v42, %v10419_v58  ;;  %v5351_v15 = vpop.f32.mrf.mxu3  ;;  %v6039_v58 = vunpack.c.l.b16 %v5926_v35  ;;  %v5895_v42 = vld [vmem:[#allocation2 + $0x31] sm:$0xff] }
 0x358   : > { %v10526_v59 = vpop.f32.mrf.mxu1  ;;  %v5764_v20 = vpop.f32.mrf.mxu0  ;;  %v5927_v35 = vpack.c.bf16 %v5895_v42, %v5895_v42  ;;  %v9354_v42 = vld [vmem:[%s11106_s3 + $0x1a0] sm:$0xff] }
 0x359   : > { %v5424_v23 = vadd.f32 %v5351_v15, %v5014_v6  ;;  %v6070_v2 = vpack.c.b16 %v6039_v58, %v6038_v36  ;;  %v5928_v15 = vpack.c.bf16 %v5896_v48, %v5896_v48 }
 0x35b   : > { %4983 = vmatmul.bf16.gmra.mxu2 %v4851_v9  ;;  %5803 = vmatmul.bf16.gmra.mxu0 %v10448_v8  ;;  %v10536_v25 = vadd.f32 %v5761_v39, %v5424_v23  ;;  %v5130_v9 = vpack.c.bf16 %v5098_v17, %v5098_v17  ;;  %v9372_v8 = vld [vmem:[%s11106_s3 + $0x230] sm:$0xff]  ;;  %v6041_v23 = vunpack.c.l.b16 %v5928_v15 }
 0x35c   : > { %5393 = vmatmul.bf16.gmra.mxu3 %v5261_v37  ;;  %7792 = vmatpush.bf16.msra.mxu1 %v9372_v8 }
 0x35d   : > { %v5243_v34 = vunpack.c.l.b16 %v5130_v9 }
 0x35e   : > { %v4944_v28 = vpop.f32.mrf.mxu2 }
 0x35f   : > { %v5015_v63 = vadd.f32 %v4944_v28, %v10426_v5  ;;  %v5354_v18 = vpop.f32.mrf.mxu3  ;;  %v5129_v5 = vpack.c.bf16 %v5097_v53, %v5097_v53  ;;  %v5100_v28 = vld [vmem:[#allocation2 + $0x142] sm:$0xff] }
 0x360   : > { %v10538_v38 = vpop.f32.mrf.mxu1  ;;  %v5766_v44 = vpop.f32.mrf.mxu0  ;;  %v5132_v45 = vpack.c.bf16 %v5100_v28, %v5100_v28 }
 0x361   : > { %v5425_v51 = vadd.f32 %v5354_v18, %v5015_v63  ;;  %v5242_v6 = vunpack.c.l.b16 %v5129_v5  ;;  %v5897_v5 = vld [vmem:[#allocation2 + $0x49] sm:$0xff] }
 0x362   : > { %v5245_v53 = vunpack.c.l.b16 %v5132_v45  ;;  %v9360_v45 = vld [vmem:[%s11106_s3 + $0x1d0] sm:$0xff] }
 0x363   : > { %6158 = vmatmul.bf16.vlgmr.msrb.gmra.mxu1 %v6070_v2  ;;  %v10547_v39 = vadd.f32 %v5764_v20, %v5425_v51  ;;  %v5262_v13 = vpack.c.b16 %v5243_v34, %v5242_v6  ;;  %v5898_v2 = vld [vmem:[#allocation2 + $0x51] sm:$0xff] }
 0x364   : > { %v5930_v34 = vpack.c.bf16 %v5898_v2, %v5898_v2  ;;  %v5900_v2 = vld [vmem:[#allocation2 + $0x69] sm:$0xff] }
 0x366   : > { %v4946_v7 = vpop.f32.mrf.mxu2 }
 0x367   : > { %v5016_v49 = vadd.f32 %v4946_v7, %v10441_v33  ;;  %v5356_v22 = vpop.f32.mrf.mxu3  ;;  %v6040_v33 = vunpack.c.l.b16 %v5927_v35  ;;  %v9353_v35 = vld [vmem:[%s11106_s3 + $0x198] sm:$0xff] }
 0x368   : > { %v10549_v41 = vpop.f32.mrf.mxu1  ;;  %v5769_v56 = vpop.f32.mrf.mxu0 }
 0x369   : > { %v5426_v0 = vadd.f32 %v5356_v22, %v5016_v49  ;;  %v10561_v63 = vpack.c.b16 %v6041_v23, %v6040_v33  ;;  %v9346_v22 = vld [vmem:[%s11106_s3 + $0x160] sm:$0xff] }
 0x36a   : > { %v5102_v33 = vld [vmem:[#allocation2 + $0x15a] sm:$0xff] }
 0x36b   : > { %4988 = vmatmul.bf16.gmra.mxu2 %v4852_v4  ;;  %5808 = vmatmul.bf16.gmra.mxu0 %v10472_v61  ;;  %v10556_v20 = vadd.f32 %v5766_v44, %v5426_v0  ;;  %v9347_v4 = vld [vmem:[%s11106_s3 + $0x168] sm:$0xff]  ;;  %v5131_v44 = vpack.c.bf16 %v5099_v27, %v5099_v27  ;;  %v6043_v0 = vunpack.c.l.b16 %v5930_v34  ;;  %v9344_v27 = vld [vmem:[%s11106_s3 + $0x150] sm:$0xff] }
 0x36c   : > { %5398 = vmatmul.bf16.gmra.mxu3 %v5262_v13  ;;  %v9355_v61 = vld [vmem:[%s11106_s3 + $0x1a8] sm:$0xff]  ;;  %6562 = vmatpush.bf16.msra.mxu2 %v9347_v4  ;;  %v9345_v13 = vld [vmem:[%s11106_s3 + $0x158] sm:$0xff] }
 0x36d   : > { %6973 = vmatpush.bf16.msra.mxu3 %v9355_v61  ;;  %v5244_v7 = vunpack.c.l.b16 %v5131_v44  ;;  %v9371_v4 = vld [vmem:[%s11106_s3 + $0x228] sm:$0xff] }
 0x36e   : > { %v4949_v57 = vpop.f32.mrf.mxu2  ;;  %v9343_v44 = vld [vmem:[%s11106_s3 + $0x148] sm:$0xff]  ;;  %7793 = vmatpush.bf16.msra.mxu1 %v9371_v4 }
 0x36f   : > { %v5017_v40 = vadd.f32 %v4949_v57, %v10445_v50  ;;  %v5359_v58 = vpop.f32.mrf.mxu3  ;;  %v9363_v50 = vld [vmem:[%s11106_s3 + $0x1e8] sm:$0xff]  ;;  %v5263_v6 = vpack.c.b16 %v5245_v53, %v5244_v7 }
 0x370   : > { %v10558_v37 = vpop.f32.mrf.mxu1  ;;  %v5771_v36 = vpop.f32.mrf.mxu0  ;;  %7383 = vmatpush.bf16.msra.mxu0 %v9363_v50  ;;  %6563 = vmatpush.bf16.msra.mxu2 %v9346_v22  ;;  %v9359_v53 = vld [vmem:[%s11106_s3 + $0x1c8] sm:$0xff] }
 0x371   : > { %v5427_v18 = vadd.f32 %v5359_v58, %v5017_v40  ;;  %6974 = vmatpush.bf16.msra.mxu3 %v9354_v42  ;;  %v5899_v34 = vld [vmem:[#allocation2 + $0x61] sm:$0xff]  ;;  %v5932_v42 = vpack.c.bf16 %v5900_v2, %v5900_v2 }
 0x372   : > { %v5902_v2 = vld [vmem:[#allocation2 + $0x81] sm:$0xff] }
 0x373   : > { %6163 = vmatmul.bf16.gmra.mxu1 %v10561_v63  ;;  %v10573_v17 = vadd.f32 %v5769_v56, %v5427_v18  ;;  %v9362_v56 = vld [vmem:[%s11106_s3 + $0x1e0] sm:$0xff]  ;;  %v5134_v18 = vpack.c.bf16 %v5102_v33, %v5102_v33 }
 0x374   : > { %7384 = vmatpush.bf16.msra.mxu0 %v9362_v56  ;;  %6564 = vmatpush.bf16.msra.mxu2 %v9345_v13  ;;  %v5931_v13 = vpack.c.bf16 %v5899_v34, %v5899_v34 }
 0x375   : > { %6975 = vmatpush.bf16.msra.mxu3 %v9353_v35 }
 0x376   : > { %v4951_v51 = vpop.f32.mrf.mxu2 }
 0x377   : > { %v5018_v9 = vadd.f32 %v4951_v51, %v10465_v54  ;;  %v5361_v8 = vpop.f32.mrf.mxu3  ;;  %v5929_v54 = vpack.c.bf16 %v5897_v5, %v5897_v5  ;;  %v9351_v51 = vld [vmem:[%s11106_s3 + $0x188] sm:$0xff] }
 0x378   : > { %v10575_v12 = vpop.f32.mrf.mxu1  ;;  %v5774_v48 = vpop.f32.mrf.mxu0  ;;  %7385 = vmatpush.bf16.msra.mxu0 %v9361_v60  ;;  %6565 = vmatpush.bf16.msra.mxu2 %v9344_v27  ;;  %v6045_v60 = vunpack.c.l.b16 %v5932_v42 }
 0x379   : > { %v5428_v49 = vadd.f32 %v5361_v8, %v5018_v9  ;;  %v5247_v8 = vunpack.c.l.b16 %v5134_v18 }
 0x37b   : > { %4993 = vmatmul.bf16.gmra.mxu2 %v4853_v14  ;;  %5813 = vmatmul.bf16.gmra.mxu0 %v10495_v47  ;;  %v10591_v15 = vadd.f32 %v5771_v36, %v5428_v49  ;;  %v6042_v14 = vunpack.c.l.b16 %v5929_v54  ;;  %v5101_v36 = vld [vmem:[#allocation2 + $0x152] sm:$0xff]  ;;  %v9350_v54 = vld [vmem:[%s11106_s3 + $0x180] sm:$0xff] }
 0x37c   : > { %5403 = vmatmul.bf16.gmra.mxu3 %v5263_v6  ;;  %v5133_v50 = vpack.c.bf16 %v5101_v36, %v5101_v36  ;;  %7386 = vmatpush.bf16.msra.mxu0 %v9360_v45  ;;  %v9342_v6 = vld [vmem:[%s11106_s3 + $0x140] sm:$0xff] }
 0x37d   : > { %v10605_v58 = vpack.c.b16 %v6043_v0, %v6042_v14  ;;  %6566 = vmatpush.bf16.msra.mxu2 %v9343_v44  ;;  %v6044_v14 = vunpack.c.l.b16 %v5931_v13  ;;  %v6304_v13 = vld [vmem:[#allocation2 + $0x22] sm:$0xff] }
 0x37e   : > { %v4954_v24 = vpop.f32.mrf.mxu2  ;;  %v5246_v22 = vunpack.c.l.b16 %v5133_v50 }
 0x37f   : > { %v5019_v23 = vadd.f32 %v4954_v24, %v10469_v11  ;;  %v5364_v57 = vpop.f32.mrf.mxu3  ;;  %v9352_v11 = vld [vmem:[%s11106_s3 + $0x190] sm:$0xff] }
 0x380   : > { %v10602_v47 = vpop.f32.mrf.mxu1  ;;  %v5776_v40 = vpop.f32.mrf.mxu0  ;;  %6976 = vmatpush.bf16.msra.mxu3 %v9352_v11  ;;  %7387 = vmatpush.bf16.msra.mxu0 %v9359_v53  ;;  %v5264_v0 = vpack.c.b16 %v5247_v8, %v5246_v22  ;;  %v5136_v11 = vpack.c.bf16 %v5104_v21, %v5104_v21  ;;  %v5934_v22 = vpack.c.bf16 %v5902_v2, %v5902_v2 }
 0x381   : > { %v5429_v28 = vadd.f32 %v5364_v57, %v5019_v23  ;;  %6567 = vmatpush.bf16.msra.mxu2 %v9342_v6  ;;  %v5513_v23 = vld [vmem:[#allocation2 + $0x180] sm:$0xff]  ;;  %v5514_v57 = vld [vmem:[#allocation2 + $0x188] sm:$0xff] }
 0x382   : > { %v5545_v18 = vpack.c.bf16 %v5513_v23, %v5513_v23  ;;  %v5546_v27 = vpack.c.bf16 %v5514_v57, %v5514_v57  ;;  %v6714_v23 = vld [vmem:[#allocation2 + $0x30] sm:$0xff]  ;;  %v6715_v57 = vld [vmem:[#allocation2 + $0x38] sm:$0xff] }
 0x383   : > { %6168 = vmatmul.bf16.gmra.mxu1 %v10605_v58  ;;  %v10620_v61 = vadd.f32 %v5774_v48, %v5429_v28  ;;  %v6746_v21 = vpack.c.bf16 %v6714_v23, %v6714_v23 }
 0x384   : > { %6977 = vmatpush.bf16.msra.mxu3 %v9351_v51  ;;  %v5658_v50 = vunpack.c.l.b16 %v5545_v18  ;;  %v5659_v44 = vunpack.c.l.b16 %v5546_v27  ;;  %v5904_v27 = vld [vmem:[#allocation2 + $0x99] sm:$0xff] }
 0x386   : > { %v4956_v9 = vpop.f32.mrf.mxu2 }
 0x387   : > { %v5020_v48 = vadd.f32 %v4956_v9, %v10480_v19  ;;  %v5366_v7 = vpop.f32.mrf.mxu3  ;;  %v9358_v19 = vld [vmem:[%s11106_s3 + $0x1c0] sm:$0xff] }
 0x388   : > { %v10631_v5 = vpop.f32.mrf.mxu1  ;;  %v5779_v49 = vpop.f32.mrf.mxu0  ;;  %6978 = vmatpush.bf16.msra.mxu3 %v9350_v54  ;;  %7388 = vmatpush.bf16.msra.mxu0 %v9358_v19  ;;  %v6047_v19 = vunpack.c.l.b16 %v5934_v22 }
 0x389   : > { %v5430_v56 = vadd.f32 %v5366_v7, %v5020_v48  ;;  %v5901_v48 = vld [vmem:[#allocation2 + $0x79] sm:$0xff] }
 0x38b   : > { %4998 = vmatmul.bf16.gmra.mxu2 %v4854_v16  ;;  %5818 = vmatmul.bf16.gmra.mxu0 %v10518_v43  ;;  %v10647_v35 = vadd.f32 %v5776_v40, %v5430_v56  ;;  %v10652_v16 = vpack.c.b16 %v6045_v60, %v6044_v14  ;;  %v5103_v40 = vld [vmem:[#allocation2 + $0x16a] sm:$0xff]  ;;  %v5675_v56 = vpack.c.b16 %v5659_v44, %v5658_v50 }
 0x38c   : > { %5408 = vmatmul.bf16.gmra.mxu3 %v5264_v0  ;;  %v5135_v4 = vpack.c.bf16 %v5103_v40, %v5103_v40  ;;  %v6335_v40 = vpack.c.bf16 %v6303_v46, %v6303_v46  ;;  %v6305_v46 = vld [vmem:[#allocation2 + $0x32] sm:$0xff] }
 0x38e   : > { %v4959_v24 = vpop.f32.mrf.mxu2  ;;  %v5248_v34 = vunpack.c.l.b16 %v5135_v4  ;;  %v6859_v4 = vunpack.c.l.b16 %v6746_v21  ;;  %v6337_v21 = vpack.c.bf16 %v6305_v46, %v6305_v46  ;;  %v6307_v46 = vld [vmem:[#allocation2 + $0x4a] sm:$0xff] }
 0x38f   : > { %v5021_v28 = vadd.f32 %v4959_v24, %v10492_v26  ;;  %v5369_v36 = vpop.f32.mrf.mxu3  ;;  %v5249_v26 = vunpack.c.l.b16 %v5136_v11 }
 0x390   : > { %v10649_v33 = vpop.f32.mrf.mxu1  ;;  %v5781_v32 = vpop.f32.mrf.mxu0 }
 0x391   : > { %v5431_v43 = vadd.f32 %v5369_v36, %v5021_v28  ;;  %v5265_v6 = vpack.c.b16 %v5249_v26, %v5248_v34  ;;  %v6448_v26 = vunpack.c.l.b16 %v6335_v40  ;;  %v5906_v40 = vld [vmem:[#allocation2 + $0xb1] sm:$0xff] }
 0x393   : > { %6173 = vmatmul.bf16.gmra.mxu1 %v10652_v16  ;;  %v10655_v45 = vadd.f32 %v5779_v49, %v5431_v43  ;;  %v5933_v49 = vpack.c.bf16 %v5901_v48, %v5901_v48  ;;  %v9370_v43 = vld [vmem:[%s11106_s3 + $0x220] sm:$0xff]  ;;  %v5936_v48 = vpack.c.bf16 %v5904_v27, %v5904_v27 }
 0x394   : > { %7794 = vmatpush.bf16.msra.mxu1 %v9370_v43 }
 0x396   : > { %v4961_v51 = vpop.f32.mrf.mxu2 }
 0x397   : > { %v5022_v9 = vadd.f32 %v4961_v51, %v10506_v1  ;;  %v5371_v8 = vpop.f32.mrf.mxu3  ;;  %v6046_v1 = vunpack.c.l.b16 %v5933_v49 }
 0x398   : > { %v10657_v53 = vpop.f32.mrf.mxu1  ;;  %v5784_v7 = vpop.f32.mrf.mxu0 }
 0x399   : > { %v5432_v42 = vadd.f32 %v5371_v8, %v5022_v9  ;;  %v10668_v36 = vpack.c.b16 %v6047_v19, %v6046_v1  ;;  %v5903_v9 = vld [vmem:[#allocation2 + $0x91] sm:$0xff] }
 0x39b   : > { %5003 = vmatmul.bf16.gmra.mxu2 %v4855_v31  ;;  %5823 = vmatmul.bf16.gmra.mxu0 %v5675_v56  ;;  %v10663_v54 = vadd.f32 %v5781_v32, %v5432_v42  ;;  %v6336_v31 = vpack.c.bf16 %v6304_v13, %v6304_v13  ;;  %v6747_v32 = vpack.c.bf16 %v6715_v57, %v6715_v57 }
 0x39c   : > { %5413 = vmatmul.bf16.gmra.mxu3 %v5265_v6  ;;  %v6049_v6 = vunpack.c.l.b16 %v5936_v48 }
 0x39d   : > { %v6860_v50 = vunpack.c.l.b16 %v6747_v32 }
 0x39e   : > { %v4964_v0 = vpop.f32.mrf.mxu2 }
 0x39f   : > { %v5023_v24 = vadd.f32 %v4964_v0, %v10515_v10  ;;  %v5374_v14 = vpop.f32.mrf.mxu3  ;;  %v6449_v10 = vunpack.c.l.b16 %v6336_v31  ;;  %v6891_v42 = vpack.c.b16 %v6860_v50, %v6859_v4  ;;  %v6306_v0 = vld [vmem:[#allocation2 + $0x3a] sm:$0xff] }
 0x3a0   : > { %v10665_v60 = vpop.f32.mrf.mxu1  ;;  %v5786_v28 = vpop.f32.mrf.mxu0 }
 0x3a1   : > { %v5433_v62 = vadd.f32 %v5374_v14, %v5023_v24  ;;  %v6480_v22 = vpack.c.b16 %v6449_v10, %v6448_v26  ;;  %v6716_v24 = vld [vmem:[#allocation2 + $0x48] sm:$0xff]  ;;  %v6717_v14 = vld [vmem:[#allocation2 + $0x50] sm:$0xff] }
 0x3a2   : > { %v6749_v31 = vpack.c.bf16 %v6717_v14, %v6717_v14 }
 0x3a3   : > { %6178 = vmatmul.bf16.gmra.mxu1 %v10668_v36  ;;  %v10674_v18 = vadd.f32 %v5784_v7, %v5433_v62  ;;  %v5935_v7 = vpack.c.bf16 %v5903_v9, %v5903_v9  ;;  %v5938_v9 = vpack.c.bf16 %v5906_v40, %v5906_v40  ;;  %v5908_v40 = vld [vmem:[#allocation2 + $0xc9] sm:$0xff] }
 0x3a4   : > { %v6862_v27 = vunpack.c.l.b16 %v6749_v31 }
 0x3a5   : > { %v6048_v19 = vunpack.c.l.b16 %v5935_v7 }
 0x3a6   : > { %v4966_v11 = vpop.f32.mrf.mxu2 }
 0x3a7   : > { %v5024_v2 = vadd.f32 %v4966_v11, %v10526_v59  ;;  %v5376_v51 = vpop.f32.mrf.mxu3  ;;  %v10685_v57 = vpack.c.b16 %v6049_v6, %v6048_v19 }
 0x3a8   : > { %v10676_v44 = vpop.f32.mrf.mxu1  ;;  %v5789_v8 = vpop.f32.mrf.mxu0 }
 0x3a9   : > { %v5434_v34 = vadd.f32 %v5376_v51, %v5024_v2  ;;  %v6450_v2 = vunpack.c.l.b16 %v6337_v21  ;;  %v5905_v51 = vld [vmem:[#allocation2 + $0xa9] sm:$0xff]  ;;  %v9369_v21 = vld [vmem:[%s11106_s3 + $0x218] sm:$0xff] }
 0x3aa   : > { %7795 = vmatpush.bf16.msra.mxu1 %v9369_v21 }
 0x3ab   : > { %6568 = vmatmul.bf16.vlgmr.msra.gmra.mxu2 %v6480_v22  ;;  %7389 = vmatmul.bf16.vlgmr.msra.gmra.mxu0 %v10561_v63  ;;  %v10680_v56 = vadd.f32 %v5786_v28, %v5434_v34  ;;  %v6338_v63 = vpack.c.bf16 %v6306_v0, %v6306_v0  ;;  %v6748_v28 = vpack.c.bf16 %v6716_v24, %v6716_v24 }
 0x3ac   : > { %6979 = vmatmul.bf16.vlgmr.msra.gmra.mxu3 %v6891_v42  ;;  %v5937_v42 = vpack.c.bf16 %v5905_v51, %v5905_v51  ;;  %v5907_v51 = vld [vmem:[#allocation2 + $0xc1] sm:$0xff] }
 0x3ad   : > { %v6451_v43 = vunpack.c.l.b16 %v6338_v63 }
 0x3ae   : > { %v4969_v49 = vpop.f32.mrf.mxu2  ;;  %v6050_v6 = vunpack.c.l.b16 %v5937_v42 }
 0x3af   : > { %v5025_v1 = vadd.f32 %v4969_v49, %v10538_v38  ;;  %v5379_v13 = vpop.f32.mrf.mxu3  ;;  %v6861_v38 = vunpack.c.l.b16 %v6748_v28  ;;  %v6481_v34 = vpack.c.b16 %v6451_v43, %v6450_v2  ;;  %v6308_v49 = vld [vmem:[#allocation2 + $0x52] sm:$0xff] }
 0x3b0   : > { %v10682_v59 = vpop.f32.mrf.mxu1  ;;  %v5791_v23 = vpop.f32.mrf.mxu0  ;;  %v6340_v63 = vpack.c.bf16 %v6308_v49, %v6308_v49 }
 0x3b1   : > { %v5435_v62 = vadd.f32 %v5379_v13, %v5025_v1  ;;  %v6892_v22 = vpack.c.b16 %v6862_v27, %v6861_v38  ;;  %v6718_v1 = vld [vmem:[#allocation2 + $0x60] sm:$0xff]  ;;  %v6719_v13 = vld [vmem:[#allocation2 + $0x68] sm:$0xff] }
 0x3b2   : > { %v6751_v31 = vpack.c.bf16 %v6719_v13, %v6719_v13  ;;  %v6453_v43 = vunpack.c.l.b16 %v6340_v63  ;;  %v6721_v63 = vld [vmem:[#allocation2 + $0x80] sm:$0xff] }
 0x3b3   : > { %6183 = vmatmul.bf16.gmra.mxu1 %v10685_v57  ;;  %v10688_v32 = vadd.f32 %v5789_v8, %v5435_v62  ;;  %v6051_v8 = vunpack.c.l.b16 %v5938_v9 }
 0x3b4   : > { %v6864_v27 = vunpack.c.l.b16 %v6751_v31 }
 0x3b5   : > { %v10697_v14 = vpack.c.b16 %v6051_v8, %v6050_v6 }
 0x3b6   : > { %v4971_v10 = vpop.f32.mrf.mxu2 }
 0x3b7   : > { %v5026_v4 = vadd.f32 %v4971_v10, %v10549_v41  ;;  %v5381_v50 = vpop.f32.mrf.mxu3 }
 0x3b8   : > { %v10690_v11 = vpop.f32.mrf.mxu1  ;;  %v5794_v26 = vpop.f32.mrf.mxu0 }
 0x3b9   : > { %v5436_v48 = vadd.f32 %v5381_v50, %v5026_v4 }
 0x3bb   : > { %6573 = vmatmul.bf16.gmra.mxu2 %v6481_v34  ;;  %7394 = vmatmul.bf16.gmra.mxu0 %v10605_v58  ;;  %v10699_v28 = vadd.f32 %v5791_v23, %v5436_v48  ;;  %v6750_v58 = vpack.c.bf16 %v6718_v1, %v6718_v1  ;;  %v5940_v48 = vpack.c.bf16 %v5908_v40, %v5908_v40 }
 0x3bc   : > { %6984 = vmatmul.bf16.gmra.mxu3 %v6892_v22 }
 0x3bd   : > { %v6863_v38 = vunpack.c.l.b16 %v6750_v58  ;;  %v6053_v6 = vunpack.c.l.b16 %v5940_v48 }
 0x3be   : > { %v4974_v7 = vpop.f32.mrf.mxu2 }
 0x3bf   : > { %v5027_v41 = vadd.f32 %v4974_v7, %v10558_v37  ;;  %v5384_v0 = vpop.f32.mrf.mxu3  ;;  %v6339_v37 = vpack.c.bf16 %v6307_v46, %v6307_v46  ;;  %v6893_v8 = vpack.c.b16 %v6864_v27, %v6863_v38  ;;  %v5939_v7 = vpack.c.bf16 %v5907_v51, %v5907_v51  ;;  %v6720_v46 = vld [vmem:[#allocation2 + $0x78] sm:$0xff]  ;;  %v5910_v38 = vld [vmem:[#allocation2 + $0xe1] sm:$0xff] }
 0x3c0   : > { %v10694_v19 = vpop.f32.mrf.mxu1  ;;  %v5796_v24 = vpop.f32.mrf.mxu0 }
 0x3c1   : > { %v5437_v62 = vadd.f32 %v5384_v0, %v5027_v41  ;;  %v6452_v2 = vunpack.c.l.b16 %v6339_v37  ;;  %v6052_v41 = vunpack.c.l.b16 %v5939_v7  ;;  %v6310_v0 = vld [vmem:[#allocation2 + $0x6a] sm:$0xff] }
 0x3c2   : > { %v6342_v21 = vpack.c.bf16 %v6310_v0, %v6310_v0 }
 0x3c3   : > { %6188 = vmatmul.bf16.gmra.mxu1 %v10697_v14  ;;  %v6482_v22 = vpack.c.b16 %v6453_v43, %v6452_v2  ;;  %v10708_v42 = vadd.f32 %v5794_v26, %v5437_v62  ;;  %v10714_v26 = vpack.c.b16 %v6053_v6, %v6052_v41  ;;  %v6309_v62 = vld [vmem:[#allocation2 + $0x62] sm:$0xff]  ;;  %v6753_v43 = vpack.c.bf16 %v6721_v63, %v6721_v63 }
 0x3c4   : > { %v6341_v40 = vpack.c.bf16 %v6309_v62, %v6309_v62 }
 0x3c6   : > { %v4976_v10 = vpop.f32.mrf.mxu2  ;;  %v6454_v48 = vunpack.c.l.b16 %v6341_v40  ;;  %v6311_v40 = vld [vmem:[#allocation2 + $0x7a] sm:$0xff] }
 0x3c7   : > { %v5028_v23 = vadd.f32 %v4976_v10, %v10575_v12  ;;  %v5386_v50 = vpop.f32.mrf.mxu3  ;;  %v6455_v10 = vunpack.c.l.b16 %v6342_v21  ;;  %v6722_v21 = vld [vmem:[#allocation2 + $0x90] sm:$0xff] }
 0x3c8   : > { %v10705_v4 = vpop.f32.mrf.mxu1  ;;  %v5799_v9 = vpop.f32.mrf.mxu0 }
 0x3c9   : > { %v5438_v34 = vadd.f32 %v5386_v50, %v5028_v23  ;;  %v6866_v23 = vunpack.c.l.b16 %v6753_v43  ;;  %v6483_v7 = vpack.c.b16 %v6455_v10, %v6454_v48 }
 0x3cb   : > { %6578 = vmatmul.bf16.gmra.mxu2 %v6482_v22  ;;  %7399 = vmatmul.bf16.gmra.mxu0 %v10652_v16  ;;  %v10716_v37 = vadd.f32 %v5796_v24, %v5438_v34  ;;  %v6752_v16 = vpack.c.bf16 %v6720_v46, %v6720_v46  ;;  %v5909_v22 = vld [vmem:[#allocation2 + $0xd9] sm:$0xff]  ;;  %v5942_v24 = vpack.c.bf16 %v5910_v38, %v5910_v38  ;;  %v6312_v46 = vld [vmem:[#allocation2 + $0x82] sm:$0xff] }
 0x3cc   : > { %6989 = vmatmul.bf16.gmra.mxu3 %v6893_v8  ;;  %v5941_v41 = vpack.c.bf16 %v5909_v22, %v5909_v22 }
 0x3cd   : > { %v6055_v0 = vunpack.c.l.b16 %v5942_v24 }
 0x3ce   : > { %v4979_v49 = vpop.f32.mrf.mxu2 }
 0x3cf   : > { %v5029_v1 = vadd.f32 %v4979_v49, %v10602_v47  ;;  %v5389_v13 = vpop.f32.mrf.mxu3  ;;  %v6865_v47 = vunpack.c.l.b16 %v6752_v16  ;;  %v6723_v16 = vld [vmem:[#allocation2 + $0x98] sm:$0xff] }
 0x3d0   : > { %v10711_v12 = vpop.f32.mrf.mxu1  ;;  %v5801_v58 = vpop.f32.mrf.mxu0 }
 0x3d1   : > { %v5439_v31 = vadd.f32 %v5389_v13, %v5029_v1  ;;  %v6894_v49 = vpack.c.b16 %v6866_v23, %v6865_v47  ;;  %v6054_v13 = vunpack.c.l.b16 %v5941_v41  ;;  %v6755_v47 = vpack.c.bf16 %v6723_v16, %v6723_v16 }
 0x3d2   : > { %v6343_v23 = vpack.c.bf16 %v6311_v40, %v6311_v40  ;;  %v6314_v40 = vld [vmem:[#allocation2 + $0x9a] sm:$0xff] }
 0x3d3   : > { %6193 = vmatmul.bf16.gmra.mxu1 %v10714_v26  ;;  %v10722_v6 = vadd.f32 %v5799_v9, %v5439_v31  ;;  %v10729_v31 = vpack.c.b16 %v6055_v0, %v6054_v13  ;;  %v6868_v22 = vunpack.c.l.b16 %v6755_v47  ;;  %v6724_v47 = vld [vmem:[#allocation2 + $0xa8] sm:$0xff] }
 0x3d6   : > { %v4981_v27 = vpop.f32.mrf.mxu2 }
 0x3d7   : > { %v5030_v2 = vadd.f32 %v4981_v27, %v10631_v5  ;;  %v5391_v51 = vpop.f32.mrf.mxu3  ;;  %v6754_v27 = vpack.c.bf16 %v6722_v21, %v6722_v21 }
 0x3d8   : > { %v10719_v50 = vpop.f32.mrf.mxu1  ;;  %v5804_v8 = vpop.f32.mrf.mxu0 }
 0x3d9   : > { %v5440_v34 = vadd.f32 %v5391_v51, %v5030_v2  ;;  %v5912_v2 = vld [vmem:[#allocation2 + $0xf9] sm:$0xff]  ;;  %v6867_v48 = vunpack.c.l.b16 %v6754_v27 }
 0x3db   : > { %6583 = vmatmul.bf16.gmra.mxu2 %v6483_v7  ;;  %7404 = vmatmul.bf16.gmra.mxu0 %v10668_v36  ;;  %v6344_v36 = vpack.c.bf16 %v6312_v46, %v6312_v46  ;;  %v10731_v38 = vadd.f32 %v5801_v58, %v5440_v34  ;;  %v6456_v34 = vunpack.c.l.b16 %v6343_v23 }
 0x3dc   : > { %6994 = vmatmul.bf16.gmra.mxu3 %v6894_v49  ;;  %v5911_v49 = vld [vmem:[#allocation2 + $0xf1] sm:$0xff] }
 0x3de   : > { %v4984_v1 = vpop.f32.mrf.mxu2 }
 0x3df   : > { %v5031_v63 = vadd.f32 %v4984_v1, %v10649_v33  ;;  %v5394_v62 = vpop.f32.mrf.mxu3  ;;  %v9368_v33 = vld [vmem:[%s11106_s3 + $0x210] sm:$0xff]  ;;  %v5944_v1 = vpack.c.bf16 %v5912_v2, %v5912_v2 }
 0x3e0   : > { %v6159_v5 = vpop.f32.mrf.mxu1  ;;  %v5806_v9 = vpop.f32.mrf.mxu0  ;;  %7796 = vmatpush.bf16.msra.mxu1 %v9368_v33  ;;  %v6725_v33 = vld [vmem:[#allocation2 + $0xb0] sm:$0xff] }
 0x3e1   : > { %v10727_v43 = vadd.f32 %v6159_v5, %v10478_v3  ;;  %v5441_v10 = vadd.f32 %v5394_v62, %v5031_v63  ;;  %v6457_v3 = vunpack.c.l.b16 %v6344_v36  ;;  %v6895_v63 = vpack.c.b16 %v6868_v22, %v6867_v48 }
 0x3e2   : > { %v5943_v62 = vpack.c.bf16 %v5911_v49, %v5911_v49  ;;  %v6057_v21 = vunpack.c.l.b16 %v5944_v1  ;;  %v6756_v48 = vpack.c.bf16 %v6724_v47, %v6724_v47  ;;  %v6757_v22 = vpack.c.bf16 %v6725_v33, %v6725_v33  ;;  %v6316_v33 = vld [vmem:[#allocation2 + $0xb2] sm:$0xff] }
 0x3e3   : > { %6198 = vmatmul.bf16.gmra.mxu1 %v10729_v31  ;;  %v6484_v46 = vpack.c.b16 %v6457_v3, %v6456_v34  ;;  %v10741_v5 = vadd.f32 %v5804_v8, %v5441_v10  ;;  %v6313_v3 = vld [vmem:[#allocation2 + $0x92] sm:$0xff] }
 0x3e4   : > { %v6056_v16 = vunpack.c.l.b16 %v5943_v62  ;;  %v6869_v34 = vunpack.c.l.b16 %v6756_v48  ;;  %v6870_v49 = vunpack.c.l.b16 %v6757_v22  ;;  %v5913_v62 = vld [vmem:[#allocation2 + $0x109] sm:$0xff]  ;;  %v6726_v48 = vld [vmem:[#allocation2 + $0xc0] sm:$0xff] }
 0x3e5   : > { %v6727_v22 = vld [vmem:[#allocation2 + $0xc8] sm:$0xff] }
 0x3e6   : > { %v4986_v51 = vpop.f32.mrf.mxu2  ;;  %v10748_v10 = vpack.c.b16 %v6057_v21, %v6056_v16 }
 0x3e7   : > { %v5032_v7 = vadd.f32 %v4986_v51, %v10657_v53  ;;  %v5396_v58 = vpop.f32.mrf.mxu3 }
 0x3e8   : > { %v6161_v24 = vpop.f32.mrf.mxu1  ;;  %v5809_v0 = vpop.f32.mrf.mxu0 }
 0x3e9   : > { %v10739_v41 = vadd.f32 %v6161_v24, %v10490_v55  ;;  %v5442_v13 = vadd.f32 %v5396_v58, %v5032_v7  ;;  %v6345_v24 = vpack.c.bf16 %v6313_v3, %v6313_v3  ;;  %v5914_v7 = vld [vmem:[#allocation2 + $0x111] sm:$0xff] }
 0x3eb   : > { %6588 = vmatmul.bf16.gmra.mxu2 %v6484_v46  ;;  %7409 = vmatmul.bf16.gmra.mxu0 %v10685_v57  ;;  %v6346_v57 = vpack.c.bf16 %v6314_v40, %v6314_v40  ;;  %v10750_v51 = vadd.f32 %v5806_v9, %v5442_v13  ;;  %v5946_v13 = vpack.c.bf16 %v5914_v7, %v5914_v7 }
 0x3ec   : > { %6999 = vmatmul.bf16.gmra.mxu3 %v6895_v63  ;;  %v6458_v63 = vunpack.c.l.b16 %v6345_v24 }
 0x3ee   : > { %v4989_v53 = vpop.f32.mrf.mxu2 }
 0x3ef   : > { %v5033_v55 = vadd.f32 %v4989_v53, %v10665_v60  ;;  %v5399_v27 = vpop.f32.mrf.mxu3  ;;  %v6459_v60 = vunpack.c.l.b16 %v6346_v57 }
 0x3f0   : > { %v6164_v36 = vpop.f32.mrf.mxu1  ;;  %v5811_v8 = vpop.f32.mrf.mxu0 }
 0x3f1   : > { %v10746_v23 = vadd.f32 %v6164_v36, %v10504_v29  ;;  %v5443_v2 = vadd.f32 %v5399_v27, %v5033_v55  ;;  %v6485_v16 = vpack.c.b16 %v6459_v60, %v6458_v63  ;;  %v6896_v36 = vpack.c.b16 %v6870_v49, %v6869_v34  ;;  %v6315_v60 = vld [vmem:[#allocation2 + $0xaa] sm:$0xff] }
 0x3f2   : > { %v5945_v55 = vpack.c.bf16 %v5913_v62, %v5913_v62  ;;  %v6059_v27 = vunpack.c.l.b16 %v5946_v13  ;;  %v6758_v34 = vpack.c.bf16 %v6726_v48, %v6726_v48  ;;  %v6759_v49 = vpack.c.bf16 %v6727_v22, %v6727_v22 }
 0x3f3   : > { %6203 = vmatmul.bf16.gmra.mxu1 %v10748_v10  ;;  %v10757_v40 = vadd.f32 %v5809_v0, %v5443_v2 }
 0x3f4   : > { %v6058_v47 = vunpack.c.l.b16 %v5945_v55  ;;  %v6871_v63 = vunpack.c.l.b16 %v6758_v34  ;;  %v6872_v62 = vunpack.c.l.b16 %v6759_v49  ;;  %v6728_v49 = vld [vmem:[#allocation2 + $0xd8] sm:$0xff] }
 0x3f6   : > { %v4991_v58 = vpop.f32.mrf.mxu2  ;;  %v10764_v2 = vpack.c.b16 %v6059_v27, %v6058_v47 }
 0x3f7   : > { %v5034_v1 = vadd.f32 %v4991_v58, %v10676_v44  ;;  %v5401_v46 = vpop.f32.mrf.mxu3 }
 0x3f8   : > { %v6166_v29 = vpop.f32.mrf.mxu1  ;;  %v5814_v9 = vpop.f32.mrf.mxu0 }
 0x3f9   : > { %v10755_v21 = vadd.f32 %v6166_v29, %v10513_v30  ;;  %v5444_v53 = vadd.f32 %v5401_v46, %v5034_v1  ;;  %v6347_v29 = vpack.c.bf16 %v6315_v60, %v6315_v60  ;;  %v5916_v1 = vld [vmem:[#allocation2 + $0x129] sm:$0xff] }
 0x3fa   : > { %v6318_v60 = vld [vmem:[#allocation2 + $0xca] sm:$0xff] }
 0x3fb   : > { %6593 = vmatmul.bf16.gmra.mxu2 %v6485_v16  ;;  %7414 = vmatmul.bf16.gmra.mxu0 %v10697_v14  ;;  %v6348_v14 = vpack.c.bf16 %v6316_v33, %v6316_v33  ;;  %v10766_v58 = vadd.f32 %v5811_v8, %v5444_v53  ;;  %v6460_v53 = vunpack.c.l.b16 %v6347_v29 }
 0x3fc   : > { %7004 = vmatmul.bf16.gmra.mxu3 %v6896_v36  ;;  %v5915_v36 = vld [vmem:[#allocation2 + $0x121] sm:$0xff] }
 0x3fe   : > { %v4994_v44 = vpop.f32.mrf.mxu2 }
 0x3ff   : > { %v5035_v30 = vadd.f32 %v4994_v44, %v10682_v59  ;;  %v5404_v57 = vpop.f32.mrf.mxu3  ;;  %v9367_v59 = vld [vmem:[%s11106_s3 + $0x208] sm:$0xff]  ;;  %v5948_v44 = vpack.c.bf16 %v5916_v1, %v5916_v1 }
 0x400   : > { %v6169_v3 = vpop.f32.mrf.mxu1  ;;  %v5816_v0 = vpop.f32.mrf.mxu0  ;;  %7797 = vmatpush.bf16.msra.mxu1 %v9367_v59  ;;  %v6729_v59 = vld [vmem:[#allocation2 + $0xe0] sm:$0xff] }
 0x401   : > { %v10762_v24 = vadd.f32 %v6169_v3, %v10524_v52  ;;  %v5445_v7 = vadd.f32 %v5404_v57, %v5035_v30  ;;  %v6461_v52 = vunpack.c.l.b16 %v6348_v14  ;;  %v6897_v30 = vpack.c.b16 %v6872_v62, %v6871_v63 }
 0x402   : > { %v5947_v57 = vpack.c.bf16 %v5915_v36, %v5915_v36  ;;  %v6760_v63 = vpack.c.bf16 %v6728_v49, %v6728_v49  ;;  %v6761_v62 = vpack.c.bf16 %v6729_v59, %v6729_v59 }
 0x403   : > { %6208 = vmatmul.bf16.gmra.mxu1 %v10764_v2  ;;  %v10776_v33 = vpack.c.b16 %v6461_v52, %v6460_v53  ;;  %v10778_v3 = vadd.f32 %v5814_v9, %v5445_v7  ;;  %v6317_v52 = vld [vmem:[#allocation2 + $0xc2] sm:$0xff] }
 0x404   : > { %v6060_v22 = vunpack.c.l.b16 %v5947_v57  ;;  %v6873_v53 = vunpack.c.l.b16 %v6760_v63  ;;  %v6874_v36 = vunpack.c.l.b16 %v6761_v62  ;;  %v6730_v62 = vld [vmem:[#allocation2 + $0xf0] sm:$0xff] }
 0x406   : > { %v4996_v46 = vpop.f32.mrf.mxu2 }
 0x407   : > { %v5036_v16 = vadd.f32 %v4996_v46, %v10690_v11  ;;  %v5406_v8 = vpop.f32.mrf.mxu3  ;;  %v6061_v11 = vunpack.c.l.b16 %v5948_v44 }
 0x408   : > { %v6171_v13 = vpop.f32.mrf.mxu1  ;;  %v5819_v27 = vpop.f32.mrf.mxu0 }
 0x409   : > { %v10774_v55 = vadd.f32 %v6171_v13, %v10536_v25  ;;  %v5446_v47 = vadd.f32 %v5406_v8, %v5036_v16  ;;  %v10786_v29 = vpack.c.b16 %v6061_v11, %v6060_v22  ;;  %v6349_v13 = vpack.c.bf16 %v6317_v52, %v6317_v52  ;;  %v5918_v16 = vld [vmem:[#allocation2 + $0x141] sm:$0xff]  ;;  %v5917_v11 = vld [vmem:[#allocation2 + $0x139] sm:$0xff] }
 0x40a   : > { %v6320_v52 = vld [vmem:[#allocation2 + $0xe2] sm:$0xff] }
 0x40b   : > { %6598 = vmatmul.bf16.gmra.mxu2 %v10776_v33  ;;  %7419 = vmatmul.bf16.gmra.mxu0 %v10714_v26  ;;  %v6350_v26 = vpack.c.bf16 %v6318_v60, %v6318_v60  ;;  %v10788_v46 = vadd.f32 %v5816_v0, %v5446_v47  ;;  %v6462_v57 = vunpack.c.l.b16 %v6349_v13  ;;  %v5950_v47 = vpack.c.bf16 %v5918_v16, %v5918_v16  ;;  %v6731_v13 = vld [vmem:[#allocation2 + $0xf8] sm:$0xff] }
 0x40c   : > { %7009 = vmatmul.bf16.gmra.mxu3 %v6897_v30  ;;  %v6319_v16 = vld [vmem:[#allocation2 + $0xda] sm:$0xff] }
 0x40e   : > { %v4999_v48 = vpop.f32.mrf.mxu2 }
 0x40f   : > { %v5037_v14 = vadd.f32 %v4999_v48, %v10694_v19  ;;  %v5409_v34 = vpop.f32.mrf.mxu3  ;;  %v6463_v19 = vunpack.c.l.b16 %v6350_v26 }
 0x410   : > { %v6174_v25 = vpop.f32.mrf.mxu1  ;;  %v5821_v7 = vpop.f32.mrf.mxu0 }
 0x411   : > { %v10784_v9 = vadd.f32 %v6174_v25, %v10547_v39  ;;  %v5447_v1 = vadd.f32 %v5409_v34, %v5037_v14  ;;  %v10795_v60 = vpack.c.b16 %v6463_v19, %v6462_v57  ;;  %v6898_v14 = vpack.c.b16 %v6874_v36, %v6873_v53 }
 0x412   : > { %v5949_v34 = vpack.c.bf16 %v5917_v11, %v5917_v11  ;;  %v6762_v36 = vpack.c.bf16 %v6730_v62, %v6730_v62 }
 0x413   : > { %6213 = vmatmul.bf16.gmra.mxu1 %v10786_v29  ;;  %v10797_v25 = vadd.f32 %v5819_v27, %v5447_v1 }
 0x414   : > { %v6062_v59 = vunpack.c.l.b16 %v5949_v34  ;;  %v6875_v11 = vunpack.c.l.b16 %v6762_v36  ;;  %v6322_v36 = vld [vmem:[#allocation2 + $0xfa] sm:$0xff] }
 0x416   : > { %v5001_v8 = vpop.f32.mrf.mxu2 }
 0x417   : > { %v5038_v44 = vadd.f32 %v5001_v8, %v10705_v4  ;;  %v5411_v30 = vpop.f32.mrf.mxu3  ;;  %v6063_v4 = vunpack.c.l.b16 %v5950_v47 }
 0x418   : > { %v6176_v39 = vpop.f32.mrf.mxu1  ;;  %v5824_v0 = vpop.f32.mrf.mxu0 }
 0x419   : > { %v10793_v48 = vadd.f32 %v6176_v39, %v10556_v20  ;;  %v5448_v22 = vadd.f32 %v5411_v30, %v5038_v44  ;;  %v10805_v19 = vpack.c.b16 %v6063_v4, %v6062_v59  ;;  %v6763_v39 = vpack.c.bf16 %v6731_v13, %v6731_v13  ;;  %v5920_v30 = vld [vmem:[#allocation2 + $0x159] sm:$0xff]  ;;  %v5919_v4 = vld [vmem:[#allocation2 + $0x151] sm:$0xff] }
 0x41a   : > { %v6351_v44 = vpack.c.bf16 %v6319_v16, %v6319_v16  ;;  %v5952_v59 = vpack.c.bf16 %v5920_v30, %v5920_v30  ;;  %v5951_v13 = vpack.c.bf16 %v5919_v4, %v5919_v4  ;;  %v6321_v30 = vld [vmem:[#allocation2 + $0xf2] sm:$0xff] }
 0x41b   : > { %6603 = vmatmul.bf16.gmra.mxu2 %v10795_v60  ;;  %7424 = vmatmul.bf16.gmra.mxu0 %v10729_v31  ;;  %v6352_v31 = vpack.c.bf16 %v6320_v52, %v6320_v52  ;;  %v10807_v53 = vadd.f32 %v5821_v7, %v5448_v22  ;;  %v6876_v47 = vunpack.c.l.b16 %v6763_v39 }
 0x41c   : > { %7014 = vmatmul.bf16.gmra.mxu3 %v6898_v14  ;;  %v6464_v22 = vunpack.c.l.b16 %v6351_v44  ;;  %v6732_v44 = vld [vmem:[#allocation2 + $0x108] sm:$0xff] }
 0x41d   : > { %v6899_v62 = vpack.c.b16 %v6876_v47, %v6875_v11  ;;  %v6354_v11 = vpack.c.bf16 %v6322_v36, %v6322_v36  ;;  %v6764_v47 = vpack.c.bf16 %v6732_v44, %v6732_v44 }
 0x41e   : > { %v5004_v49 = vpop.f32.mrf.mxu2 }
 0x41f   : > { %v5039_v26 = vadd.f32 %v5004_v49, %v10711_v12  ;;  %v5414_v63 = vpop.f32.mrf.mxu3  ;;  %v9366_v12 = vld [vmem:[%s11106_s3 + $0x200] sm:$0xff] }
 0x420   : > { %v6179_v20 = vpop.f32.mrf.mxu1  ;;  %v5826_v1 = vpop.f32.mrf.mxu0  ;;  %7798 = vmatpush.bf16.msra.mxu1 %v9366_v12 }
 0x421   : > { %v10803_v27 = vadd.f32 %v6179_v20, %v10573_v17  ;;  %v5449_v8 = vadd.f32 %v5414_v63, %v5039_v26  ;;  %v6465_v17 = vunpack.c.l.b16 %v6352_v31  ;;  %v6064_v31 = vunpack.c.l.b16 %v5951_v13 }
 0x423   : > { %6218 = vmatmul.bf16.gmra.mxu1 %v10805_v19  ;;  %v10817_v20 = vpack.c.b16 %v6465_v17, %v6464_v22  ;;  %v10819_v26 = vadd.f32 %v5824_v0, %v5449_v8  ;;  %v6733_v17 = vld [vmem:[#allocation2 + $0x110] sm:$0xff] }
 0x424   : > { %v5922_v22 = vld [vmem:[#allocation2 + $0x171] sm:$0xff] }
 0x426   : > { %v5006_v57 = vpop.f32.mrf.mxu2 }
 0x427   : > { %v5040_v34 = vadd.f32 %v5006_v57, %v10719_v50  ;;  %v5416_v7 = vpop.f32.mrf.mxu3  ;;  %v6065_v50 = vunpack.c.l.b16 %v5952_v59  ;;  %v6877_v59 = vunpack.c.l.b16 %v6764_v47  ;;  %v6324_v47 = vld [vmem:[#allocation2 + $0x112] sm:$0xff] }
 0x428   : > { %v6181_v14 = vpop.f32.mrf.mxu1  ;;  %v7390_v63 = vpop.f32.mrf.mxu0 }
 0x429   : > { %v10815_v49 = vadd.f32 %v6181_v14, %v10591_v15  ;;  %v5450_v52 = vadd.f32 %v5416_v7, %v5040_v34  ;;  %v10827_v8 = vpack.c.b16 %v6065_v50, %v6064_v31  ;;  %v6765_v14 = vpack.c.bf16 %v6733_v17, %v6733_v17  ;;  %v5921_v31 = vld [vmem:[#allocation2 + $0x169] sm:$0xff] }
 0x42a   : > { %v6353_v34 = vpack.c.bf16 %v6321_v30, %v6321_v30  ;;  %v5953_v44 = vpack.c.bf16 %v5921_v31, %v5921_v31 }
 0x42b   : > { %6608 = vmatmul.bf16.gmra.mxu2 %v10817_v20  ;;  %7429 = vmatmul.bf16.gmra.mxu0 %v10748_v10  ;;  %v10829_v10 = vadd.f32 %v5826_v1, %v5450_v52  ;;  %v5954_v52 = vpack.c.bf16 %v5922_v22, %v5922_v22  ;;  %v6735_v22 = vld [vmem:[#allocation2 + $0x128] sm:$0xff] }
 0x42c   : > { %7019 = vmatmul.bf16.gmra.mxu3 %v6899_v62  ;;  %v6878_v62 = vunpack.c.l.b16 %v6765_v14 }
 0x42e   : > { %v6569_v16 = vpop.f32.mrf.mxu2 }
 0x42f   : > { %v6649_v39 = vadd.f32 %v6569_v16, %v10727_v43  ;;  %v6980_v12 = vpop.f32.mrf.mxu3  ;;  %v6467_v43 = vunpack.c.l.b16 %v6354_v11  ;;  %v6466_v16 = vunpack.c.l.b16 %v6353_v34  ;;  %v6066_v11 = vunpack.c.l.b16 %v5953_v44 }
 0x430   : > { %v6184_v15 = vpop.f32.mrf.mxu1  ;;  %v7392_v7 = vpop.f32.mrf.mxu0 }
 0x431   : > { %v10825_v0 = vadd.f32 %v6184_v15, %v10620_v61  ;;  %v7060_v57 = vadd.f32 %v6980_v12, %v6649_v39  ;;  %v10836_v15 = vpack.c.b16 %v6467_v43, %v6466_v16  ;;  %v6900_v12 = vpack.c.b16 %v6878_v62, %v6877_v59  ;;  %v6734_v43 = vld [vmem:[#allocation2 + $0x120] sm:$0xff] }
 0x433   : > { %6223 = vmatmul.bf16.gmra.mxu1 %v10827_v8  ;;  %v10838_v39 = vadd.f32 %v7390_v63, %v7060_v57 }
 0x436   : > { %v6571_v4 = vpop.f32.mrf.mxu2 }
 0x437   : > { %v6650_v13 = vadd.f32 %v6571_v4, %v10739_v41  ;;  %v6982_v50 = vpop.f32.mrf.mxu3  ;;  %v6067_v41 = vunpack.c.l.b16 %v5954_v52  ;;  %v6323_v4 = vld [vmem:[#allocation2 + $0x10a] sm:$0xff] }
 0x438   : > { %v6186_v61 = vpop.f32.mrf.mxu1  ;;  %v7395_v17 = vpop.f32.mrf.mxu0 }
 0x439   : > { %v10834_v1 = vadd.f32 %v6186_v61, %v10647_v35  ;;  %v7061_v36 = vadd.f32 %v6982_v50, %v6650_v13  ;;  %v10846_v57 = vpack.c.b16 %v6067_v41, %v6066_v11  ;;  %v6766_v61 = vpack.c.bf16 %v6734_v43, %v6734_v43  ;;  %v5923_v11 = vld [vmem:[#allocation2 + $0x181] sm:$0xff] }
 0x43a   : > { %v6767_v13 = vpack.c.bf16 %v6735_v22, %v6735_v22  ;;  %v6355_v50 = vpack.c.bf16 %v6323_v4, %v6323_v4  ;;  %v5955_v22 = vpack.c.bf16 %v5923_v11, %v5923_v11  ;;  %v7535_v11 = vld [vmem:[#allocation2 + $0x3a] sm:$0xff] }
 0x43b   : > { %6613 = vmatmul.bf16.gmra.mxu2 %v10836_v15  ;;  %7434 = vmatmul.bf16.gmra.mxu0 %v10764_v2  ;;  %v6356_v2 = vpack.c.bf16 %v6324_v47, %v6324_v47  ;;  %v10848_v62 = vadd.f32 %v7392_v7, %v7061_v36  ;;  %v6879_v52 = vunpack.c.l.b16 %v6766_v61  ;;  %v6326_v61 = vld [vmem:[#allocation2 + $0x12a] sm:$0xff] }
 0x43c   : > { %7024 = vmatmul.bf16.gmra.mxu3 %v6900_v12  ;;  %v6880_v12 = vunpack.c.l.b16 %v6767_v13 }
 0x43d   : > { %v6469_v16 = vunpack.c.l.b16 %v6356_v2  ;;  %v6068_v2 = vunpack.c.l.b16 %v5955_v22 }
 0x43e   : > { %v6574_v30 = vpop.f32.mrf.mxu2  ;;  %v6901_v43 = vpack.c.b16 %v6880_v12, %v6879_v52  ;;  %v6358_v12 = vpack.c.bf16 %v6326_v61, %v6326_v61 }
 0x43f   : > { %v6651_v14 = vadd.f32 %v6574_v30, %v10746_v23  ;;  %v6985_v34 = vpop.f32.mrf.mxu3  ;;  %v5924_v23 = vld [vmem:[#allocation2 + $0x189] sm:$0xff]  ;;  %v6468_v30 = vunpack.c.l.b16 %v6355_v50 }
 0x440   : > { %v6189_v35 = vpop.f32.mrf.mxu1  ;;  %v5956_v36 = vpack.c.bf16 %v5924_v23, %v5924_v23  ;;  %v6736_v23 = vld [vmem:[#allocation2 + $0x138] sm:$0xff] }
 0x441   : > { %v10844_v63 = vadd.f32 %v6189_v35, %v10655_v45  ;;  %v7062_v59 = vadd.f32 %v6985_v34, %v6651_v14  ;;  %v7397_v35 = vpop.f32.mrf.mxu0  ;;  %v10855_v14 = vpack.c.b16 %v6469_v16, %v6468_v30  ;;  %v6737_v16 = vld [vmem:[#allocation2 + $0x140] sm:$0xff] }
 0x443   : > { %6228 = vmatmul.bf16.gmra.mxu1 %v10846_v57  ;;  %v10857_v34 = vadd.f32 %v7395_v17, %v7062_v59 }
 0x446   : > { %v6576_v31 = vpop.f32.mrf.mxu2 }
 0x447   : > { %v6652_v45 = vadd.f32 %v6576_v31, %v10755_v21  ;;  %v6987_v41 = vpop.f32.mrf.mxu3  ;;  %v6069_v21 = vunpack.c.l.b16 %v5956_v36  ;;  %v6325_v31 = vld [vmem:[#allocation2 + $0x122] sm:$0xff] }
 0x448   : > { %v6191_v44 = vpop.f32.mrf.mxu1  ;;  %v6357_v30 = vpack.c.bf16 %v6325_v31, %v6325_v31 }
 0x449   : > { %v10853_v7 = vadd.f32 %v6191_v44, %v10663_v54  ;;  %v7063_v47 = vadd.f32 %v6987_v41, %v6652_v45  ;;  %v10865_v59 = vpack.c.b16 %v6069_v21, %v6068_v2  ;;  %v7400_v44 = vpop.f32.mrf.mxu0  ;;  %v6768_v45 = vpack.c.bf16 %v6736_v23, %v6736_v23 }
 0x44a   : > { %v6769_v41 = vpack.c.bf16 %v6737_v16, %v6737_v16  ;;  %v6470_v2 = vunpack.c.l.b16 %v6357_v30 }
 0x44b   : > { %6618 = vmatmul.bf16.gmra.mxu2 %v10855_v14  ;;  %7439 = vmatmul.bf16.gmra.mxu0 %v10786_v29  ;;  %v10867_v29 = vadd.f32 %v7397_v35, %v7063_v47  ;;  %v7567_v47 = vpack.c.bf16 %v7535_v11, %v7535_v11 }
 0x44c   : > { %7029 = vmatmul.bf16.gmra.mxu3 %v6901_v43  ;;  %v6881_v43 = vunpack.c.l.b16 %v6768_v45  ;;  %v6882_v22 = vunpack.c.l.b16 %v6769_v41  ;;  %v6328_v41 = vld [vmem:[#allocation2 + $0x142] sm:$0xff] }
 0x44e   : > { %v6579_v4 = vpop.f32.mrf.mxu2  ;;  %v6902_v23 = vpack.c.b16 %v6882_v22, %v6881_v43  ;;  %v6327_v43 = vld [vmem:[#allocation2 + $0x13a] sm:$0xff] }
 0x44f   : > { %v6653_v54 = vadd.f32 %v6579_v4, %v10762_v24  ;;  %v6990_v50 = vpop.f32.mrf.mxu3  ;;  %v6471_v24 = vunpack.c.l.b16 %v6358_v12 }
 0x450   : > { %v6194_v13 = vpop.f32.mrf.mxu1 }
 0x451   : > { %v10863_v17 = vadd.f32 %v6194_v13, %v10674_v18  ;;  %v7064_v52 = vadd.f32 %v6990_v50, %v6653_v54  ;;  %v7534_v13 = vld [vmem:[#allocation2 + $0x32] sm:$0xff]  ;;  %v10874_v54 = vpack.c.b16 %v6471_v24, %v6470_v2  ;;  %v7402_v31 = vpop.f32.mrf.mxu0  ;;  %v6359_v2 = vpack.c.bf16 %v6327_v43, %v6327_v43  ;;  %v6330_v43 = vld [vmem:[#allocation2 + $0x15a] sm:$0xff] }
 0x452   : > { %v7566_v16 = vpack.c.bf16 %v7534_v13, %v7534_v13  ;;  %v6738_v24 = vld [vmem:[#allocation2 + $0x150] sm:$0xff] }
 0x453   : > { %6233 = vmatmul.bf16.gmra.mxu1 %v10865_v59  ;;  %v10876_v50 = vadd.f32 %v7400_v44, %v7064_v52 }
 0x454   : > { %v7679_v45 = vunpack.c.l.b16 %v7566_v16 }
 0x456   : > { %v6581_v36 = vpop.f32.mrf.mxu2 }
 0x457   : > { %v6654_v21 = vadd.f32 %v6581_v36, %v10774_v55  ;;  %v6992_v4 = vpop.f32.mrf.mxu3  ;;  %v7680_v55 = vunpack.c.l.b16 %v7567_v47  ;;  %v6739_v36 = vld [vmem:[#allocation2 + $0x158] sm:$0xff] }
 0x458   : > { %v6196_v18 = vpop.f32.mrf.mxu1  ;;  %v7537_v47 = vld [vmem:[#allocation2 + $0x52] sm:$0xff] }
 0x459   : > { %v10872_v35 = vadd.f32 %v6196_v18, %v10680_v56  ;;  %v7065_v61 = vadd.f32 %v6992_v4, %v6654_v21  ;;  %v7711_v44 = vpack.c.b16 %v7680_v55, %v7679_v45  ;;  %v6360_v18 = vpack.c.bf16 %v6328_v41, %v6328_v41  ;;  %v7536_v55 = vld [vmem:[#allocation2 + $0x4a] sm:$0xff] }
 0x45a   : > { %v6770_v21 = vpack.c.bf16 %v6738_v24, %v6738_v24  ;;  %v6771_v4 = vpack.c.bf16 %v6739_v36, %v6739_v36  ;;  %v7568_v36 = vpack.c.bf16 %v7536_v55, %v7536_v55 }
 0x45b   : > { %11117 = vst [vmem:[#allocation5_spill] sm:$0xff] %v10872_v35  ;;  %6623 = vmatmul.bf16.gmra.mxu2 %v10874_v54  ;;  %7444 = vmatmul.bf16.gmra.mxu0 %v10805_v19  ;;  %v10884_v19 = vadd.f32 %v7402_v31, %v7065_v61  ;;  %v6473_v13 = vunpack.c.l.b16 %v6360_v18  ;;  %v7569_v31 = vpack.c.bf16 %v7537_v47, %v7537_v47 }
 0x45c   : > { %7034 = vmatmul.bf16.gmra.mxu3 %v6902_v23  ;;  %v7405_v23 = vpop.f32.mrf.mxu0  ;;  %v6883_v16 = vunpack.c.l.b16 %v6770_v21 }
 0x45e   : > { %v6584_v12 = vpop.f32.mrf.mxu2 }
 0x45f   : > { %v6655_v30 = vadd.f32 %v6584_v12, %v10784_v9  ;;  %v6995_v11 = vpop.f32.mrf.mxu3  ;;  %v6884_v12 = vunpack.c.l.b16 %v6771_v4 }
 0x460   : > { %v6199_v56 = vpop.f32.mrf.mxu1 }
 0x461   : > { %v10882_v52 = vadd.f32 %v6199_v56, %v10688_v32  ;;  %v7066_v22 = vadd.f32 %v6995_v11, %v6655_v30  ;;  %v6472_v56 = vunpack.c.l.b16 %v6359_v2  ;;  %v6903_v24 = vpack.c.b16 %v6884_v12, %v6883_v16  ;;  %v7539_v12 = vld [vmem:[#allocation2 + $0x6a] sm:$0xff] }
 0x463   : > { %7799 = vmatmul.bf16.vlgmr.msra.gmra.mxu1 %v7711_v44  ;;  %v10890_v30 = vpack.c.b16 %v6473_v13, %v6472_v56  ;;  %v10892_v11 = vadd.f32 %v7405_v23, %v7066_v22  ;;  %v7681_v44 = vunpack.c.l.b16 %v7568_v36  ;;  %v6329_v22 = vld [vmem:[#allocation2 + $0x152] sm:$0xff]  ;;  %v6362_v13 = vpack.c.bf16 %v6330_v43, %v6330_v43 }
 0x464   : > { %v7407_v21 = vpop.f32.mrf.mxu0 }
 0x465   : > { %v6475_v16 = vunpack.c.l.b16 %v6362_v13 }
 0x466   : > { %v6586_v9 = vpop.f32.mrf.mxu2 }
 0x467   : > { %v6656_v32 = vadd.f32 %v6586_v9, %v10793_v48  ;;  %v6997_v61 = vpop.f32.mrf.mxu3  ;;  %v7682_v48 = vunpack.c.l.b16 %v7569_v31  ;;  %v7538_v31 = vld [vmem:[#allocation2 + $0x62] sm:$0xff] }
 0x468   : > { %v6201_v35 = vpop.f32.mrf.mxu1 }
 0x469   : > { %v10888_v45 = vadd.f32 %v6201_v35, %v10699_v28  ;;  %v7067_v41 = vadd.f32 %v6997_v61, %v6656_v32  ;;  %v6740_v28 = vld [vmem:[#allocation2 + $0x168] sm:$0xff]  ;;  %v6741_v35 = vld [vmem:[#allocation2 + $0x170] sm:$0xff]  ;;  %v7712_v2 = vpack.c.b16 %v7682_v48, %v7681_v44 }
 0x46a   : > { %v6772_v23 = vpack.c.bf16 %v6740_v28, %v6740_v28  ;;  %v6773_v9 = vpack.c.bf16 %v6741_v35, %v6741_v35  ;;  %v6742_v35 = vld [vmem:[#allocation2 + $0x180] sm:$0xff] }
 0x46b   : > { %6628 = vmatmul.bf16.gmra.mxu2 %v10890_v30  ;;  %7449 = vmatmul.bf16.gmra.mxu0 %v10827_v8  ;;  %v10899_v47 = vadd.f32 %v7407_v21, %v7067_v41  ;;  %v6361_v8 = vpack.c.bf16 %v6329_v22, %v6329_v22  ;;  %v7570_v41 = vpack.c.bf16 %v7538_v31, %v7538_v31  ;;  %v6743_v21 = vld [vmem:[#allocation2 + $0x188] sm:$0xff] }
 0x46c   : > { %7039 = vmatmul.bf16.gmra.mxu3 %v6903_v24  ;;  %v6885_v32 = vunpack.c.l.b16 %v6772_v23  ;;  %v6886_v56 = vunpack.c.l.b16 %v6773_v9  ;;  %v6331_v22 = vld [vmem:[#allocation2 + $0x16a] sm:$0xff]  ;;  %v6774_v23 = vpack.c.bf16 %v6742_v35, %v6742_v35  ;;  %v6775_v9 = vpack.c.bf16 %v6743_v21, %v6743_v21  ;;  %v6744_v21 = vld [vmem:[#allocation2 + $0x198] sm:$0xff] }
 0x46d   : > { %v6474_v61 = vunpack.c.l.b16 %v6361_v8  ;;  %v7683_v43 = vunpack.c.l.b16 %v7570_v41  ;;  %v6363_v8 = vpack.c.bf16 %v6331_v22, %v6331_v22 }
 0x46e   : > { %v6904_v48 = vpack.c.b16 %v6886_v56, %v6885_v32  ;;  %v6888_v32 = vunpack.c.l.b16 %v6775_v9 }
 0x46f   : > { %v10904_v36 = vpack.c.b16 %v6475_v16, %v6474_v61  ;;  %v7540_v61 = vld [vmem:[#allocation2 + $0x7a] sm:$0xff] }
 0x470   : > { %v6204_v18 = vpop.f32.mrf.mxu1  ;;  %v7572_v41 = vpack.c.bf16 %v7540_v61, %v7540_v61 }
 0x471   : > { %v10897_v4 = vadd.f32 %v6204_v18, %v10708_v42  ;;  %v7571_v42 = vpack.c.bf16 %v7539_v12, %v7539_v12  ;;  %v6332_v18 = vld [vmem:[#allocation2 + $0x172] sm:$0xff]  ;;  %v7541_v12 = vld [vmem:[#allocation2 + $0x82] sm:$0xff] }
 0x472   : > { %v6364_v13 = vpack.c.bf16 %v6332_v18, %v6332_v18  ;;  %v6334_v18 = vld [vmem:[#allocation2 + $0x18a] sm:$0xff] }
 0x473   : > { %7804 = vmatmul.bf16.gmra.mxu1 %v7712_v2  ;;  %v7684_v44 = vunpack.c.l.b16 %v7571_v42  ;;  %v7573_v42 = vpack.c.bf16 %v7541_v12, %v7541_v12  ;;  %v6366_v9 = vpack.c.bf16 %v6334_v18, %v6334_v18 }
 0x474   : > { %v6477_v16 = vunpack.c.l.b16 %v6364_v13  ;;  %v6333_v13 = vld [vmem:[#allocation2 + $0x182] sm:$0xff] }
 0x478   : > { %v6206_v55 = vpop.f32.mrf.mxu1 }
 0x479   : > { %v10902_v24 = vadd.f32 %v6206_v55, %v10716_v37  ;;  %v7713_v37 = vpack.c.b16 %v7684_v44, %v7683_v43  ;;  %v6476_v55 = vunpack.c.l.b16 %v6363_v8  ;;  %v7686_v44 = vunpack.c.l.b16 %v7573_v42 }
 0x47a   : > { %v7685_v43 = vunpack.c.l.b16 %v7572_v41 }
 0x47b   : > { %6633 = vmatmul.bf16.gmra.mxu2 %v10904_v36  ;;  %7454 = vmatmul.bf16.gmra.mxu0 %v10846_v57  ;;  %v6887_v57 = vunpack.c.l.b16 %v6774_v23  ;;  %v7154_v23 = vld [vmem:[#allocation2 + $0x199] sm:$0xff] }
 0x47c   : > { %7044 = vmatmul.bf16.gmra.mxu3 %v6904_v48  ;;  %v7714_v22 = vpack.c.b16 %v7686_v44, %v7685_v43 }
 0x47d   : > { %v6905_v48 = vpack.c.b16 %v6888_v32, %v6887_v57  ;;  %v7186_v57 = vpack.c.bf16 %v7154_v23, %v7154_v23  ;;  %v6479_v32 = vunpack.c.l.b16 %v6366_v9 }
 0x480   : > { %v6209_v28 = vpop.f32.mrf.mxu1 }
 0x481   : > { %v10909_v2 = vadd.f32 %v6209_v28, %v10722_v6  ;;  %v10914_v6 = vpack.c.b16 %v6477_v16, %v6476_v55  ;;  %v7155_v28 = vld [vmem:[#allocation2 + $0x1a1] sm:$0xff]  ;;  %v6776_v16 = vpack.c.bf16 %v6744_v21, %v6744_v21 }
 0x482   : > { %v7187_v8 = vpack.c.bf16 %v7155_v28, %v7155_v28  ;;  %v7543_v55 = vld [vmem:[#allocation2 + $0x9a] sm:$0xff] }
 0x483   : > { %7809 = vmatmul.bf16.gmra.mxu1 %v7713_v37  ;;  %v6745_v37 = vld [vmem:[#allocation2 + $0x1a0] sm:$0xff]  ;;  %v6889_v61 = vunpack.c.l.b16 %v6776_v16  ;;  %v7575_v43 = vpack.c.bf16 %v7543_v55, %v7543_v55 }
 0x484   : > { %v6777_v12 = vpack.c.bf16 %v6745_v37, %v6745_v37  ;;  %v9195_v55 = vld [vmem:[%s9481_s16 + $0x19] sm:$0xff] }
 0x485   : > { %v7688_v37 = vunpack.c.l.b16 %v7575_v43 }
 0x486   : > { %v6890_v42 = vunpack.c.l.b16 %v6777_v12 }
 0x488   : > { %v6211_v56 = vpop.f32.mrf.mxu1 }
 0x489   : > { %v10912_v31 = vadd.f32 %v6211_v56, %v10731_v38  ;;  %v7300_v56 = vunpack.c.l.b16 %v7187_v8 }
 0x48b   : > { %11118 = vst [vmem:[#allocation4_spill] sm:$0xff] %v10912_v31  ;;  %6638 = vmatmul.bf16.gmra.mxu2 %v10914_v6  ;;  %7459 = vmatmul.bf16.gmra.mxu0 %v10865_v59  ;;  %v6365_v59 = vpack.c.bf16 %v6333_v13, %v6333_v13  ;;  %v7299_v31 = vunpack.c.l.b16 %v7186_v57 }
 0x48c   : > { %7049 = vmatmul.bf16.gmra.mxu3 %v6905_v48 }
 0x48d   : > { %v6478_v41 = vunpack.c.l.b16 %v6365_v59  ;;  %v7316_v28 = vpack.c.b16 %v7300_v56, %v7299_v31 }
 0x48f   : > { %v10924_v18 = vpack.c.b16 %v6479_v32, %v6478_v41  ;;  %v7000_v41 = vpop.f32.mrf.mxu3 }
 0x490   : > { %v6214_v35 = vpop.f32.mrf.mxu1 }
 0x491   : > { %v10919_v38 = vadd.f32 %v6214_v35, %v10741_v5  ;;  %v7542_v5 = vld [vmem:[#allocation2 + $0x92] sm:$0xff]  ;;  %v6906_v35 = vpack.c.b16 %v6890_v42, %v6889_v61  ;;  %v9196_v42 = vld [vmem:[%s9481_s16 + $0x21] sm:$0xff] }
 0x492   : > { %v7574_v21 = vpack.c.bf16 %v7542_v5, %v7542_v5  ;;  %v7410_v5 = vpop.f32.mrf.mxu0 }
 0x493   : > { %7814 = vmatmul.bf16.gmra.mxu1 %v7714_v22 }
 0x494   : > { %v7687_v22 = vunpack.c.l.b16 %v7574_v21  ;;  %v9197_v21 = vld [vmem:[%s9481_s16 + $0x31] sm:$0xff] }
 0x496   : > { %v7715_v9 = vpack.c.b16 %v7688_v37, %v7687_v22 }
 0x497   : > { %v7002_v22 = vpop.f32.mrf.mxu3 }
 0x498   : > { %v6216_v48 = vpop.f32.mrf.mxu1 }
 0x499   : > { %v10922_v44 = vadd.f32 %v6216_v48, %v10750_v51 }
 0x49b   : > { %6643 = vmatmul.bf16.gmra.mxu2 %v10924_v18  ;;  %7464 = vmatmul.bf16.gmra.mxu0 %v7316_v28 }
 0x49c   : > { %7054 = vmatmul.bf16.gmra.mxu3 %v6906_v35 }
 0x4a0   : > { %v6219_v13 = vpop.f32.mrf.mxu1 }
 0x4a1   : > { %v10928_v23 = vadd.f32 %v6219_v13, %v10757_v40 }
 0x4a3   : > { %7819 = vmatmul.bf16.gmra.mxu1 %v7715_v9  ;;  %v7412_v9 = vpop.f32.mrf.mxu0 }
 0x4a8   : > { %v6221_v51 = vpop.f32.mrf.mxu1 }
 0x4a9   : > { %v10931_v8 = vadd.f32 %v6221_v51, %v10766_v58 }
 0x4b0   : > { %v6224_v16 = vpop.f32.mrf.mxu1 }
 0x4b1   : > { %v10934_v31 = vadd.f32 %v6224_v16, %v10778_v3 }
 0x4b3   : > { %7824 = vmatmul.bf16.gmra.mxu1 %v10776_v33 }
 0x4b8   : > { %v6226_v12 = vpop.f32.mrf.mxu1 }
 0x4b9   : > { %v10938_v59 = vadd.f32 %v6226_v12, %v10788_v46  ;;  %v9198_v12 = vld [vmem:[%s9481_s16 + $0x39] sm:$0xff] }
 0x4c0   : > { %v6229_v40 = vpop.f32.mrf.mxu1 }
 0x4c1   : > { %v10941_v57 = vadd.f32 %v6229_v40, %v10797_v25  ;;  %v10957_v25 = vld [vmem:[%s11107_s4] ss:$0 sm:$0xff] }
 0x4c3   : > { %7829 = vmatmul.bf16.gmra.mxu1 %v10795_v60 }
 0x4c8   : > { %v6231_v58 = vpop.f32.mrf.mxu1 }
 0x4c9   : > { %v10945_v32 = vadd.f32 %v6231_v58, %v10807_v53  ;;  %v7005_v58 = vpop.f32.mrf.mxu3 }
 0x4d0   : > { %v6234_v3 = vpop.f32.mrf.mxu1 }
 0x4d1   : > { %v10948_v56 = vadd.f32 %v6234_v3, %v10819_v26 }
 0x4d3   : > { %7834 = vmatmul.bf16.gmra.mxu1 %v10817_v20 }
 0x4d8   : > { %v6236_v33 = vpop.f32.mrf.mxu1 }
 0x4d9   : > { %v10952_v46 = vadd.f32 %v6236_v33, %v10829_v10  ;;  %v6589_v10 = vpop.f32.mrf.mxu2 }
 0x4e0   : > { %v7800_v60 = vpop.f32.mrf.mxu1 }
 0x4e1   : > { %v7880_v53 = vadd.f32 %v7800_v60, %v10838_v39  ;;  %v6591_v43 = vpop.f32.mrf.mxu2  ;;  %v7415_v60 = vpop.f32.mrf.mxu0 }
 0x4e3   : > { %v7980_v26 = vadd.f32 %v10957_v25, %v7880_v53  ;;  %7839 = vmatmul.bf16.gmra.mxu1 %v10836_v15 }
 0x4e5   : > { %v8044_v20 = vadd.f32 %v9195_v55, %v7980_v26 }
 0x4e7   : > { %8076 = vst [vmem:[%s10967_s9] sm:$0xff] %v8044_v20 }
 0x4e8   : > { %v7802_v61 = vpop.f32.mrf.mxu1 }
 0x4e9   : > { %v7881_v39 = vadd.f32 %v7802_v61, %v10848_v62  ;;  %v6594_v16 = vpop.f32.mrf.mxu2  ;;  %v7007_v61 = vpop.f32.mrf.mxu3 }
 0x4eb   : > { %v7981_v48 = vadd.f32 %v10957_v25, %v7881_v39  ;;  %v9200_v39 = vld [vmem:[%s9481_s16 + $0x51] sm:$0xff] }
 0x4ed   : > { %v8045_v15 = vadd.f32 %v9196_v42, %v7981_v48 }
 0x4ef   : > { %8077 = vst [vmem:[%s10967_s9 + $0x8] sm:$0xff] %v8045_v15 }
 0x4f0   : > { %v7805_v28 = vpop.f32.mrf.mxu1 }
 0x4f1   : > { %v7882_v35 = vadd.f32 %v7805_v28, %v10857_v34 }
 0x4f3   : > { %v7982_v37 = vadd.f32 %v10957_v25, %v7882_v35  ;;  %7844 = vmatmul.bf16.gmra.mxu1 %v10855_v14  ;;  %v9199_v14 = vld [vmem:[%s9481_s16 + $0x49] sm:$0xff] }
 0x4f5   : > { %v8046_v62 = vadd.f32 %v9197_v21, %v7982_v37 }
 0x4f7   : > { %8078 = vst [vmem:[%s10967_s9 + $0x10] sm:$0xff] %v8046_v62  ;;  %v6657_v62 = vadd.f32 %v6589_v10, %v10803_v27 }
 0x4f8   : > { %v7807_v13 = vpop.f32.mrf.mxu1 }
 0x4f9   : > { %v7883_v51 = vadd.f32 %v7807_v13, %v10867_v29  ;;  %v6596_v29 = vpop.f32.mrf.mxu2 }
 0x4fb   : > { %v7983_v40 = vadd.f32 %v10957_v25, %v7883_v51 }
 0x4fd   : > { %v8047_v34 = vadd.f32 %v9198_v12, %v7983_v40 }
 0x4ff   : > { %8079 = vst [vmem:[%s10967_s9 + $0x18] sm:$0xff] %v8047_v34  ;;  %v9202_v34 = vld [vmem:[%s9481_s16 + $0x69] sm:$0xff] }
 0x500   : > { %v7810_v3 = vpop.f32.mrf.mxu1 }
 0x501   : > { %v7884_v33 = vadd.f32 %v7810_v3, %v10876_v50  ;;  %v7417_v50 = vpop.f32.mrf.mxu0  ;;  %v6599_v15 = vpop.f32.mrf.mxu2  ;;  %v7068_v3 = vadd.f32 %v7000_v41, %v6657_v62  ;;  %v6660_v62 = vadd.f32 %v6596_v29, %v10834_v1 }
 0x503   : > { %v7984_v53 = vadd.f32 %v10957_v25, %v7884_v33  ;;  %7849 = vmatmul.bf16.gmra.mxu1 %v10874_v54  ;;  %v9201_v54 = vld [vmem:[%s9481_s16 + $0x61] sm:$0xff] }
 0x505   : > { %v8048_v55 = vadd.f32 %v9199_v14, %v7984_v53  ;;  %v7478_v53 = vadd.f32 %v7410_v5, %v7068_v3 }
 0x507   : > { %8080 = vst [vmem:[%s10967_s9 + $0x20] sm:$0xff] %v8048_v55 }
 0x508   : > { %v7812_v26 = vpop.f32.mrf.mxu1 }
 0x509   : > { %v7885_v20 = vadd.f32 %v7812_v26, %v10884_v19  ;;  %v7010_v19 = vpop.f32.mrf.mxu3  ;;  %v7420_v13 = vpop.f32.mrf.mxu0 }
 0x50a   : > { %v6601_v51 = vpop.f32.mrf.mxu2 }
 0x50b   : > { %v7985_v42 = vadd.f32 %v10957_v25, %v7885_v20  ;;  %v9203_v20 = vld [vmem:[%s9481_s16 + $0x79] sm:$0xff] }
 0x50d   : > { %v8049_v48 = vadd.f32 %v9200_v39, %v7985_v42  ;;  %v6659_v42 = vadd.f32 %v6594_v16, %v10825_v0 }
 0x50f   : > { %8081 = vst [vmem:[%s10967_s9 + $0x28] sm:$0xff] %v8049_v48 }
 0x510   : > { %v7815_v28 = vpop.f32.mrf.mxu1 }
 0x511   : > { %v7886_v35 = vadd.f32 %v7815_v28, %v10892_v11  ;;  %v7012_v14 = vpop.f32.mrf.mxu3  ;;  %v7422_v10 = vpop.f32.mrf.mxu0  ;;  %v9204_v28 = vld [vmem:[%s9481_s16 + $0x81] sm:$0xff] }
 0x512   : > { %v6604_v26 = vpop.f32.mrf.mxu2 }
 0x513   : > { %v7986_v21 = vadd.f32 %v10957_v25, %v7886_v35  ;;  %7854 = vmatmul.bf16.gmra.mxu1 %v10890_v30  ;;  %v6658_v30 = vadd.f32 %v6591_v43, %v10815_v49  ;;  %v7070_v35 = vadd.f32 %v7005_v58, %v6659_v42 }
 0x515   : > { %v8050_v37 = vadd.f32 %v9201_v54, %v7986_v21  ;;  %v7069_v39 = vadd.f32 %v7002_v22, %v6658_v30  ;;  %v9206_v30 = vld [vmem:[%s9481_s16 + $0x99] sm:$0xff] }
 0x517   : > { %8082 = vst [vmem:[%s10967_s9 + $0x30] sm:$0xff] %v8050_v37  ;;  %v7479_v48 = vadd.f32 %v7412_v9, %v7069_v39 }
 0x518   : > { %v7817_v12 = vpop.f32.mrf.mxu1 }
 0x519   : > { %v7887_v40 = vadd.f32 %v7817_v12, %v10899_v47  ;;  %v7015_v49 = vpop.f32.mrf.mxu3  ;;  %v7425_v54 = vpop.f32.mrf.mxu0  ;;  %v9205_v12 = vld [vmem:[%s9481_s16 + $0x91] sm:$0xff] }
 0x51a   : > { %v6606_v22 = vpop.f32.mrf.mxu2 }
 0x51b   : > { %v7987_v11 = vadd.f32 %v10957_v25, %v7887_v40  ;;  %v7071_v40 = vadd.f32 %v7007_v61, %v6660_v62 }
 0x51d   : > { %v8051_v33 = vadd.f32 %v9202_v34, %v7987_v11  ;;  %v7481_v1 = vadd.f32 %v7417_v50, %v7071_v40 }
 0x51f   : > { %8083 = vst [vmem:[%s10967_s9 + $0x38] sm:$0xff] %v8051_v33  ;;  %v6661_v33 = vadd.f32 %v6599_v15, %v10844_v63  ;;  %v9207_v15 = vld [vmem:[%s9481_s16 + $0xa9] sm:$0xff] }
 0x520   : > { %v7820_v27 = vpop.f32.mrf.mxu1 }
 0x521   : > { %v7888_v55 = vadd.f32 %v7820_v27, %v7478_v53  ;;  %v7017_v9 = vpop.f32.mrf.mxu3  ;;  %v7427_v58 = vpop.f32.mrf.mxu0  ;;  %v7072_v53 = vadd.f32 %v7010_v19, %v6661_v33 }
 0x522   : > { %v6609_v11 = vpop.f32.mrf.mxu2 }
 0x523   : > { %v7988_v47 = vadd.f32 %v10957_v25, %v7888_v55  ;;  %7859 = vmatmul.bf16.gmra.mxu1 %v10904_v36  ;;  %v7480_v36 = vadd.f32 %v7415_v60, %v7070_v35  ;;  %v7482_v39 = vadd.f32 %v7420_v13, %v7072_v53  ;;  %v7564_v13 = vld [vmem:[#allocation2 + $0x19a] sm:$0xff] }
 0x525   : > { %v8052_v41 = vadd.f32 %v9203_v20, %v7988_v47 }
 0x527   : > { %8084 = vst [vmem:[%s10967_s9 + $0x40] sm:$0xff] %v8052_v41 }
 0x528   : > { %v7822_v5 = vpop.f32.mrf.mxu1 }
 0x529   : > { %v7889_v43 = vadd.f32 %v7822_v5, %v7479_v48  ;;  %v7020_v61 = vpop.f32.mrf.mxu3  ;;  %v7430_v20 = vpop.f32.mrf.mxu0  ;;  %v7565_v5 = vld [vmem:[#allocation2 + $0x1a2] sm:$0xff] }
 0x52a   : > { %v6611_v47 = vpop.f32.mrf.mxu2 }
 0x52b   : > { %v7989_v21 = vadd.f32 %v10957_v25, %v7889_v43  ;;  %v6663_v43 = vadd.f32 %v6604_v26, %v10863_v17 }
 0x52d   : > { %v8053_v37 = vadd.f32 %v9204_v28, %v7989_v21  ;;  %v7597_v21 = vpack.c.bf16 %v7565_v5, %v7565_v5  ;;  %v7074_v62 = vadd.f32 %v7015_v49, %v6663_v43  ;;  %v9211_v5 = vld [vmem:[%s9481_s16 + $0xd9] sm:$0xff] }
 0x52f   : > { %8085 = vst [vmem:[%s10967_s9 + $0x48] sm:$0xff] %v8053_v37  ;;  %v7484_v17 = vadd.f32 %v7425_v54, %v7074_v62 }
 0x530   : > { %v7825_v0 = vpop.f32.mrf.mxu1 }
 0x531   : > { %v7890_v16 = vadd.f32 %v7825_v0, %v7480_v36  ;;  %v7022_v48 = vpop.f32.mrf.mxu3  ;;  %v7432_v28 = vpop.f32.mrf.mxu0 }
 0x532   : > { %v6614_v37 = vpop.f32.mrf.mxu2 }
 0x533   : > { %v7990_v34 = vadd.f32 %v10957_v25, %v7890_v16  ;;  %7864 = vmatmul.bf16.gmra.mxu1 %v10914_v6  ;;  %v6662_v6 = vadd.f32 %v6601_v51, %v10853_v7  ;;  %v7710_v16 = vunpack.c.l.b16 %v7597_v21 }
 0x535   : > { %v8054_v3 = vadd.f32 %v9205_v12, %v7990_v34  ;;  %v7073_v50 = vadd.f32 %v7012_v14, %v6662_v6  ;;  %v9208_v14 = vld [vmem:[%s9481_s16 + $0xb1] sm:$0xff] }
 0x536   : > { %v11119_v12 = vld [vmem:[#allocation5_spill] sm:$0xff] }
 0x537   : > { %8086 = vst [vmem:[%s10967_s9 + $0x50] sm:$0xff] %v8054_v3  ;;  %v7483_v7 = vadd.f32 %v7422_v10, %v7073_v50  ;;  %v6664_v40 = vadd.f32 %v6606_v22, %v11119_v12  ;;  %v6665_v22 = vadd.f32 %v6609_v11, %v10882_v52  ;;  %v9213_v12 = vld [vmem:[%s9481_s16 + $0xf1] sm:$0xff] }
 0x538   : > { %v7827_v60 = vpop.f32.mrf.mxu1 }
 0x539   : > { %v7891_v29 = vadd.f32 %v7827_v60, %v7481_v1  ;;  %v7025_v26 = vpop.f32.mrf.mxu3  ;;  %v9209_v1 = vld [vmem:[%s9481_s16 + $0xc1] sm:$0xff]  ;;  %v7075_v60 = vadd.f32 %v7017_v9, %v6664_v40 }
 0x53b   : > { %v7991_v27 = vadd.f32 %v10957_v25, %v7891_v29  ;;  %v7435_v29 = vpop.f32.mrf.mxu0  ;;  %v7485_v54 = vadd.f32 %v7427_v58, %v7075_v60 }
 0x53d   : > { %v8055_v55 = vadd.f32 %v9206_v30, %v7991_v27  ;;  %v6616_v30 = vpop.f32.mrf.mxu2 }
 0x53f   : > { %8087 = vst [vmem:[%s10967_s9 + $0x58] sm:$0xff] %v8055_v55 }
 0x540   : > { %v7830_v41 = vpop.f32.mrf.mxu1 }
 0x541   : > { %v7892_v63 = vadd.f32 %v7830_v41, %v7482_v39  ;;  %v7027_v6 = vpop.f32.mrf.mxu3  ;;  %v9210_v39 = vld [vmem:[%s9481_s16 + $0xc9] sm:$0xff]  ;;  %v7076_v41 = vadd.f32 %v7020_v61, %v6665_v22 }
 0x542   : > { %v11120_v22 = vld [vmem:[#allocation4_spill] sm:$0xff] }
 0x543   : > { %v7992_v42 = vadd.f32 %v10957_v25, %v7892_v63  ;;  %7869 = vmatmul.bf16.gmra.mxu1 %v10924_v18  ;;  %v7596_v18 = vpack.c.bf16 %v7564_v13, %v7564_v13  ;;  %v7437_v9 = vpop.f32.mrf.mxu0 }
 0x545   : > { %v8056_v19 = vadd.f32 %v9207_v15, %v7992_v42  ;;  %v7709_v10 = vunpack.c.l.b16 %v7596_v18  ;;  %v6619_v50 = vpop.f32.mrf.mxu2  ;;  %v6666_v42 = vadd.f32 %v6611_v47, %v10888_v45  ;;  %v6668_v18 = vadd.f32 %v6616_v30, %v10902_v24 }
 0x547   : > { %8088 = vst [vmem:[%s10967_s9 + $0x60] sm:$0xff] %v8056_v19  ;;  %v7726_v33 = vpack.c.b16 %v7710_v16, %v7709_v10  ;;  %v7486_v19 = vadd.f32 %v7430_v20, %v7076_v41  ;;  %v7077_v58 = vadd.f32 %v7022_v48, %v6666_v42  ;;  %v7079_v40 = vadd.f32 %v7027_v6, %v6668_v18 }
 0x548   : > { %v7832_v51 = vpop.f32.mrf.mxu1 }
 0x549   : > { %v7893_v35 = vadd.f32 %v7832_v51, %v7483_v7  ;;  %v7030_v7 = vpop.f32.mrf.mxu3  ;;  %v6667_v51 = vadd.f32 %v6614_v37, %v10897_v4 }
 0x54b   : > { %v7993_v36 = vadd.f32 %v10957_v25, %v7893_v35  ;;  %v7440_v13 = vpop.f32.mrf.mxu0  ;;  %v7487_v35 = vadd.f32 %v7432_v28, %v7077_v58  ;;  %v7078_v20 = vadd.f32 %v7025_v26, %v6667_v51  ;;  %v6669_v26 = vadd.f32 %v6619_v50, %v10909_v2 }
 0x54d   : > { %v8057_v0 = vadd.f32 %v9208_v14, %v7993_v36  ;;  %v6621_v21 = vpop.f32.mrf.mxu2  ;;  %v9212_v14 = vld [vmem:[%s9481_s16 + $0xe1] sm:$0xff]  ;;  %v7080_v60 = vadd.f32 %v7030_v7, %v6669_v26 }
 0x54f   : > { %8089 = vst [vmem:[%s10967_s9 + $0x68] sm:$0xff] %v8057_v0  ;;  %v7488_v0 = vadd.f32 %v7435_v29, %v7078_v20 }
 0x550   : > { %v7835_v34 = vpop.f32.mrf.mxu1 }
 0x551   : > { %v7894_v3 = vadd.f32 %v7835_v34, %v7484_v17  ;;  %v7032_v36 = vpop.f32.mrf.mxu3  ;;  %v7489_v34 = vadd.f32 %v7437_v9, %v7079_v40 }
 0x553   : > { %v7994_v49 = vadd.f32 %v10957_v25, %v7894_v3  ;;  %7874 = vmatmul.bf16.gmra.mxu1 %v7726_v33  ;;  %v7442_v37 = vpop.f32.mrf.mxu0 }
 0x555   : > { %v8058_v53 = vadd.f32 %v9209_v1, %v7994_v49  ;;  %v6624_v28 = vpop.f32.mrf.mxu2  ;;  %v9214_v1 = vld [vmem:[%s9481_s16 + $0xf9] sm:$0xff] }
 0x556   : > { %v6671_v42 = vadd.f32 %v6624_v28, %v10919_v38 }
 0x557   : > { %8090 = vst [vmem:[%s10967_s9 + $0x70] sm:$0xff] %v8058_v53 }
 0x558   : > { %v7837_v27 = vpop.f32.mrf.mxu1 }
 0x559   : > { %v7895_v55 = vadd.f32 %v7837_v27, %v7485_v54  ;;  %v7035_v3 = vpop.f32.mrf.mxu3  ;;  %v6670_v54 = vadd.f32 %v6621_v21, %v11120_v22  ;;  %v7490_v27 = vadd.f32 %v7440_v13, %v7080_v60 }
 0x55a   : > { %v7082_v58 = vadd.f32 %v7035_v3, %v6671_v42  ;;  %v9219_v3 = vld [vmem:[%s9481_s16 + $0x139] sm:$0xff] }
 0x55b   : > { %v7995_v63 = vadd.f32 %v10957_v25, %v7895_v55  ;;  %v7445_v29 = vpop.f32.mrf.mxu0  ;;  %v7081_v41 = vadd.f32 %v7032_v36, %v6670_v54  ;;  %v9220_v54 = vld [vmem:[%s9481_s16 + $0x141] sm:$0xff] }
 0x55d   : > { %v8059_v15 = vadd.f32 %v9210_v39, %v7995_v63  ;;  %v6626_v30 = vpop.f32.mrf.mxu2  ;;  %v9215_v39 = vld [vmem:[%s9481_s16 + $0x109] sm:$0xff] }
 0x55e   : > { %v6672_v51 = vadd.f32 %v6626_v30, %v10922_v44 }
 0x55f   : > { %8091 = vst [vmem:[%s10967_s9 + $0x78] sm:$0xff] %v8059_v15 }
 0x560   : > { %v7840_v52 = vpop.f32.mrf.mxu1 }
 0x561   : > { %v7896_v11 = vadd.f32 %v7840_v52, %v7486_v19  ;;  %v7037_v6 = vpop.f32.mrf.mxu3  ;;  %v7491_v19 = vadd.f32 %v7442_v37, %v7081_v41 }
 0x563   : > { %v7996_v43 = vadd.f32 %v10957_v25, %v7896_v11  ;;  %v7447_v9 = vpop.f32.mrf.mxu0 }
 0x565   : > { %v8060_v61 = vadd.f32 %v9211_v5, %v7996_v43  ;;  %v6629_v50 = vpop.f32.mrf.mxu2  ;;  %v9216_v5 = vld [vmem:[%s9481_s16 + $0x111] sm:$0xff] }
 0x566   : > { %v6673_v36 = vadd.f32 %v6629_v50, %v10928_v23 }
 0x567   : > { %8092 = vst [vmem:[%s10967_s9 + $0x80] sm:$0xff] %v8060_v61 }
 0x568   : > { %v7842_v45 = vpop.f32.mrf.mxu1 }
 0x569   : > { %v7897_v47 = vadd.f32 %v7842_v45, %v7487_v35  ;;  %v7040_v7 = vpop.f32.mrf.mxu3  ;;  %v7492_v35 = vadd.f32 %v7445_v29, %v7082_v58 }
 0x56a   : > { %v7084_v28 = vadd.f32 %v7040_v7, %v6673_v36 }
 0x56b   : > { %v7997_v62 = vadd.f32 %v10957_v25, %v7897_v47  ;;  %v7450_v13 = vpop.f32.mrf.mxu0  ;;  %v9217_v47 = vld [vmem:[%s9481_s16 + $0x121] sm:$0xff] }
 0x56d   : > { %v8061_v48 = vadd.f32 %v9212_v14, %v7997_v62  ;;  %v6631_v21 = vpop.f32.mrf.mxu2  ;;  %v7083_v14 = vadd.f32 %v7037_v6, %v6672_v51 }
 0x56f   : > { %8093 = vst [vmem:[%s10967_s9 + $0x88] sm:$0xff] %v8061_v48  ;;  %v7493_v18 = vadd.f32 %v7447_v9, %v7083_v14 }
 0x570   : > { %v7845_v4 = vpop.f32.mrf.mxu1 }
 0x571   : > { %v7898_v16 = vadd.f32 %v7845_v4, %v7488_v0  ;;  %v7042_v48 = vpop.f32.mrf.mxu3 }
 0x573   : > { %v7998_v17 = vadd.f32 %v10957_v25, %v7898_v16  ;;  %v7452_v0 = vpop.f32.mrf.mxu0  ;;  %v9218_v16 = vld [vmem:[%s9481_s16 + $0x129] sm:$0xff] }
 0x575   : > { %v8062_v10 = vadd.f32 %v9213_v12, %v7998_v17  ;;  %v6634_v37 = vpop.f32.mrf.mxu2  ;;  %v6674_v17 = vadd.f32 %v6631_v21, %v10931_v8 }
 0x577   : > { %8094 = vst [vmem:[%s10967_s9 + $0x90] sm:$0xff] %v8062_v10  ;;  %v7494_v10 = vadd.f32 %v7450_v13, %v7084_v28 }
 0x578   : > { %v7847_v24 = vpop.f32.mrf.mxu1 }
 0x579   : > { %v7899_v33 = vadd.f32 %v7847_v24, %v7489_v34  ;;  %v7045_v26 = vpop.f32.mrf.mxu3  ;;  %v7085_v24 = vadd.f32 %v7042_v48, %v6674_v17 }
 0x57b   : > { %v7999_v49 = vadd.f32 %v10957_v25, %v7899_v33  ;;  %v7455_v33 = vpop.f32.mrf.mxu0  ;;  %v7495_v30 = vadd.f32 %v7452_v0, %v7085_v24  ;;  %v9225_v24 = vld [vmem:[%s9481_s16 + $0x181] sm:$0xff] }
 0x57d   : > { %v8063_v53 = vadd.f32 %v9214_v1, %v7999_v49  ;;  %v6636_v60 = vpop.f32.mrf.mxu2  ;;  %v6675_v49 = vadd.f32 %v6634_v37, %v10934_v31 }
 0x57e   : > { %v6676_v41 = vadd.f32 %v6636_v60, %v10938_v59 }
 0x57f   : > { %8095 = vst [vmem:[%s10967_s9 + $0x98] sm:$0xff] %v8063_v53 }
 0x580   : > { %v7850_v2 = vpop.f32.mrf.mxu1 }
 0x581   : > { %v7900_v55 = vadd.f32 %v7850_v2, %v7490_v27  ;;  %v7047_v22 = vpop.f32.mrf.mxu3  ;;  %v7086_v27 = vadd.f32 %v7045_v26, %v6675_v49 }
 0x582   : > { %v7087_v50 = vadd.f32 %v7047_v22, %v6676_v41 }
 0x583   : > { %v8000_v63 = vadd.f32 %v10957_v25, %v7900_v55  ;;  %v7457_v55 = vpop.f32.mrf.mxu0 }
 0x584   : > { %v7497_v58 = vadd.f32 %v7457_v55, %v7087_v50 }
 0x585   : > { %v8064_v15 = vadd.f32 %v9215_v39, %v8000_v63  ;;  %v6639_v39 = vpop.f32.mrf.mxu2  ;;  %v7496_v63 = vadd.f32 %v7455_v33, %v7086_v27 }
 0x587   : > { %8096 = vst [vmem:[%s10967_s9 + $0xa0] sm:$0xff] %v8064_v15  ;;  %v9221_v15 = vld [vmem:[%s9481_s16 + $0x151] sm:$0xff] }
 0x588   : > { %v7852_v52 = vpop.f32.mrf.mxu1 }
 0x589   : > { %v7901_v11 = vadd.f32 %v7852_v52, %v7491_v19  ;;  %v7050_v19 = vpop.f32.mrf.mxu3 }
 0x58b   : > { %v8001_v43 = vadd.f32 %v10957_v25, %v7901_v11  ;;  %v7460_v11 = vpop.f32.mrf.mxu0 }
 0x58d   : > { %v8065_v61 = vadd.f32 %v9216_v5, %v8001_v43  ;;  %v6677_v5 = vadd.f32 %v6639_v39, %v10941_v57  ;;  %v6641_v43 = vpop.f32.mrf.mxu2 }
 0x58f   : > { %8097 = vst [vmem:[%s10967_s9 + $0xa8] sm:$0xff] %v8065_v61  ;;  %v9222_v61 = vld [vmem:[%s9481_s16 + $0x159] sm:$0xff]  ;;  %v7088_v51 = vadd.f32 %v7050_v19, %v6677_v5 }
 0x590   : > { %v7855_v38 = vpop.f32.mrf.mxu1 }
 0x591   : > { %v7902_v45 = vadd.f32 %v7855_v38, %v7492_v35  ;;  %v7052_v21 = vpop.f32.mrf.mxu3  ;;  %v6678_v38 = vadd.f32 %v6641_v43, %v10945_v32 }
 0x593   : > { %v8002_v20 = vadd.f32 %v10957_v25, %v7902_v45  ;;  %v7498_v45 = vadd.f32 %v7460_v11, %v7088_v51  ;;  %v7462_v14 = vpop.f32.mrf.mxu0  ;;  %v7089_v48 = vadd.f32 %v7052_v21, %v6678_v38 }
 0x595   : > { %v8066_v62 = vadd.f32 %v9217_v47, %v8002_v20  ;;  %v6644_v20 = vpop.f32.mrf.mxu2  ;;  %v7499_v0 = vadd.f32 %v7462_v14, %v7089_v48 }
 0x597   : > { %8098 = vst [vmem:[%s10967_s9 + $0xb0] sm:$0xff] %v8066_v62  ;;  %v9223_v62 = vld [vmem:[%s9481_s16 + $0x169] sm:$0xff] }
 0x598   : > { %v7857_v44 = vpop.f32.mrf.mxu1 }
 0x599   : > { %v7903_v4 = vadd.f32 %v7857_v44, %v7493_v18  ;;  %v6679_v44 = vadd.f32 %v6644_v20, %v10948_v56 }
 0x59b   : > { %v8003_v12 = vadd.f32 %v10957_v25, %v7903_v4  ;;  %v7055_v4 = vpop.f32.mrf.mxu3 }
 0x59c   : > { %v7090_v28 = vadd.f32 %v7055_v4, %v6679_v44 }
 0x59d   : > { %v8067_v40 = vadd.f32 %v9218_v16, %v8003_v12  ;;  %v9224_v16 = vld [vmem:[%s9481_s16 + $0x171] sm:$0xff]  ;;  %v6646_v17 = vpop.f32.mrf.mxu2 }
 0x59e   : > { %v6680_v26 = vadd.f32 %v6646_v17, %v10952_v46 }
 0x59f   : > { %8099 = vst [vmem:[%s10967_s9 + $0xb8] sm:$0xff] %v8067_v40  ;;  %v7465_v40 = vpop.f32.mrf.mxu0 }
 0x5a0   : > { %v7860_v23 = vpop.f32.mrf.mxu1 }
 0x5a1   : > { %v7904_v34 = vadd.f32 %v7860_v23, %v7494_v10  ;;  %v7500_v23 = vadd.f32 %v7465_v40, %v7090_v28 }
 0x5a3   : > { %v8004_v1 = vadd.f32 %v10957_v25, %v7904_v34 }
 0x5a5   : > { %v8068_v29 = vadd.f32 %v9219_v3, %v8004_v1  ;;  %v7057_v3 = vpop.f32.mrf.mxu3 }
 0x5a6   : > { %v7091_v33 = vadd.f32 %v7057_v3, %v6680_v26 }
 0x5a7   : > { %8100 = vst [vmem:[%s10967_s9 + $0xc0] sm:$0xff] %v8068_v29  ;;  %v7467_v29 = vpop.f32.mrf.mxu0 }
 0x5a8   : > { %v7862_v8 = vpop.f32.mrf.mxu1  ;;  %v7501_v49 = vadd.f32 %v7467_v29, %v7091_v33 }
 0x5a9   : > { %v7905_v53 = vadd.f32 %v7862_v8, %v7495_v30 }
 0x5ab   : > { %v8005_v2 = vadd.f32 %v10957_v25, %v7905_v53  ;;  %v9226_v53 = vld [vmem:[%s9481_s16 + $0x189] sm:$0xff] }
 0x5ad   : > { %v8069_v6 = vadd.f32 %v9220_v54, %v8005_v2 }
 0x5af   : > { %8101 = vst [vmem:[%s10967_s9 + $0xc8] sm:$0xff] %v8069_v6 }
 0x5b0   : > { %v7865_v31 = vpop.f32.mrf.mxu1 }
 0x5b1   : > { %v7906_v9 = vadd.f32 %v7865_v31, %v7496_v63 }
 0x5b3   : > { %v8006_v42 = vadd.f32 %v10957_v25, %v7906_v9 }
 0x5b5   : > { %v8070_v52 = vadd.f32 %v9221_v15, %v8006_v42 }
 0x5b7   : > { %8102 = vst [vmem:[%s10967_s9 + $0xd0] sm:$0xff] %v8070_v52 }
 0x5b8   : > { %v7867_v59 = vpop.f32.mrf.mxu1 }
 0x5b9   : > { %v7907_v7 = vadd.f32 %v7867_v59, %v7497_v58 }
 0x5bb   : > { %v8007_v13 = vadd.f32 %v10957_v25, %v7907_v7 }
 0x5bd   : > { %v8071_v35 = vadd.f32 %v9222_v61, %v8007_v13 }
 0x5bf   : > { %8103 = vst [vmem:[%s10967_s9 + $0xd8] sm:$0xff] %v8071_v35 }
 0x5c0   : > { %v7870_v47 = vpop.f32.mrf.mxu1 }
 0x5c1   : > { %v7908_v57 = vadd.f32 %v7870_v47, %v7498_v45 }
 0x5c3   : > { %v8008_v36 = vadd.f32 %v10957_v25, %v7908_v57 }
 0x5c5   : > { %v8072_v18 = vadd.f32 %v9223_v62, %v8008_v36 }
 0x5c7   : > { %8104 = vst [vmem:[%s10967_s9 + $0xe0] sm:$0xff] %v8072_v18 }
 0x5c8   : > { %v7872_v32 = vpop.f32.mrf.mxu1 }
 0x5c9   : > { %v7909_v37 = vadd.f32 %v7872_v32, %v7499_v0 }
 0x5cb   : > { %v8009_v12 = vadd.f32 %v10957_v25, %v7909_v37 }
 0x5cd   : > { %v8073_v10 = vadd.f32 %v9224_v16, %v8009_v12 }
 0x5cf   : > { %8105 = vst [vmem:[%s10967_s9 + $0xe8] sm:$0xff] %v8073_v10 }
 0x5d0   : > { %v7875_v56 = vpop.f32.mrf.mxu1 }
 0x5d1   : > { %v7910_v34 = vadd.f32 %v7875_v56, %v7500_v23 }
 0x5d3   : > { %v8010_v1 = vadd.f32 %v10957_v25, %v7910_v34 }
 0x5d5   : > { %v8074_v60 = vadd.f32 %v9225_v24, %v8010_v1 }
 0x5d7   : > { %8106 = vst [vmem:[%s10967_s9 + $0xf0] sm:$0xff] %v8074_v60 }
 0x5d8   : > { %v7877_v30 = vpop.f32.mrf.mxu1 }
 0x5d9   : > { %v7911_v8 = vadd.f32 %v7877_v30, %v7501_v49 }
 0x5db   : > { %v8011_v22 = vadd.f32 %v10957_v25, %v7911_v8 }
 0x5dd   : > { %v8075_v46 = vadd.f32 %v9226_v53, %v8011_v22 }
 0x5df   : > { %8107 = vst [vmem:[%s10967_s9 + $0xf8] sm:$0xff] %v8075_v46 }
 0x5e0 PF: > { %s15_s18 = sadd.s32 1, %s9408_s18  }
 0x5e1   : > { %p12_p4 = scmp.ge.s32.totalorder %s15_s18, 4  }
 0x5e3   :  { %14 = sbr.rel (!%p12_p4) target bundleno = 1 (0x1), region = 91 }

</bundles_post_ra>
